<compile_context>
chip_gen: v5e
topology: v5e:2x2
jax: 0.10.0
libtpu: 0.0.40
codegen_flags: <defaults>
</compile_context>

<pallas_src>
import jax
import jax.numpy as jnp
from jax import lax
from jax.experimental import pallas as pl
from jax.experimental.pallas import tpu as pltpu

EPS = 1e-5
LANE = 128
VMEM_LIMIT_BYTES = 32 * 1024 * 1024   # fits v7x (64 MiB phys) with headroom


def _round_up(c, m=LANE):
    return ((c + m - 1) // m) * m


def _pick_m_tile(m):
    # Largest 8-aligned tile <= 1024 that divides M (full M as fallback).
    for t in (1024, 512, 256, 128, 64, 32, 16, 8):
        if m % t == 0:
            return t
    return m


def _compiler_params():
    return pltpu.CompilerParams(
        dimension_semantics=("parallel",),          # megacore sharding on v7x
        vmem_limit_bytes=VMEM_LIMIT_BYTES)


# ---------------------------------------------------------------------------
# Kernels
# ---------------------------------------------------------------------------
def _conv1x1_stats_kernel(x_ref, w_ref, y_ref, st_ref):
    """y = x @ w (bf16 MXU operands, f32 acc) + per-tile (sum, sum_sq)."""
    acc = jnp.dot(x_ref[...], w_ref[...], preferred_element_type=jnp.float32)
    y_ref[...] = acc.astype(y_ref.dtype)
    st_ref[0, 0:1, :] = jnp.sum(acc, axis=0, keepdims=True)
    st_ref[0, 1:2, :] = jnp.sum(acc * acc, axis=0, keepdims=True)


def _bn_relu_conv1x1_stats_kernel(y_ref, s_ref, b_ref, w_ref, o_ref, st_ref):
    """relu(y*scale+shift) @ w  + per-tile (sum, sum_sq) of the result."""
    h = jnp.maximum(y_ref[...].astype(jnp.float32) * s_ref[...] + b_ref[...], 0.0)
    acc = jnp.dot(h.astype(jnp.bfloat16), w_ref[...],
                  preferred_element_type=jnp.float32)
    o_ref[...] = acc.astype(o_ref.dtype)
    st_ref[0, 0:1, :] = jnp.sum(acc, axis=0, keepdims=True)
    st_ref[0, 1:2, :] = jnp.sum(acc * acc, axis=0, keepdims=True)


def _bn_relu_conv3x3_stats_kernel(y1_ref, s_ref, b_ref, w_ref,
                                  y2_ref, st_ref, hp_ref):
    """BN1+ReLU fused into an in-VMEM 3x3 conv (9 shifted matmuls)."""
    _, H, W, C1 = y1_ref.shape
    C2 = y2_ref.shape[3]
    scale = s_ref[...].reshape(1, 1, C1)
    shift = b_ref[...].reshape(1, 1, C1)
    h = jnp.maximum(y1_ref[0].astype(jnp.float32) * scale + shift, 0.0)

    # Zero halo pad into VMEM scratch (no HBM im2col round-trip).
    hp_ref[...] = jnp.zeros_like(hp_ref)
    hp_ref[1:H + 1, 1:W + 1, :] = h

    acc = jnp.zeros((H * W, C2), jnp.float32)
    for dy in range(3):
        for dx in range(3):
            win = hp_ref[dy:dy + H, dx:dx + W, :].reshape(H * W, C1)
            acc = acc + jnp.dot(win.astype(jnp.bfloat16), w_ref[dy * 3 + dx],
                                preferred_element_type=jnp.float32)

    y2_ref[0] = acc.reshape(H, W, C2).astype(y2_ref.dtype)
    st_ref[0, 0:1, :] = jnp.sum(acc, axis=0, keepdims=True)
    st_ref[0, 1:2, :] = jnp.sum(acc * acc, axis=0, keepdims=True)


def _bn_add_relu_kernel(y_ref, s_ref, b_ref, r_ref, o_ref):
    """BN3 (single FMA) + residual add + ReLU, all f32."""
    y = y_ref[...].astype(jnp.float32) * s_ref[...] + b_ref[...]
    o_ref[...] = jnp.maximum(y + r_ref[...], 0.0).astype(o_ref.dtype)


# ---------------------------------------------------------------------------
# pallas_call wrappers
# ---------------------------------------------------------------------------
def _conv1x1_stats(x, w, tm):
    m, cin = x.shape
    cout = w.shape[1]
    nt = m // tm
    return pl.pallas_call(
        _conv1x1_stats_kernel,
        out_shape=(jax.ShapeDtypeStruct((m, cout), jnp.bfloat16),
                   jax.ShapeDtypeStruct((nt, 2, cout), jnp.float32)),
        grid_spec=pltpu.PrefetchScalarGridSpec(
            num_scalar_prefetch=0, grid=(nt,),
            in_specs=[pl.BlockSpec((tm, cin), lambda i: (i, 0)),
                      pl.BlockSpec((cin, cout), lambda i: (0, 0))],
            out_specs=[pl.BlockSpec((tm, cout), lambda i: (i, 0)),
                       pl.BlockSpec((1, 2, cout), lambda i: (i, 0, 0))]),
        compiler_params=_compiler_params(),
        cost_estimate=pl.CostEstimate(
            flops=2 * m * cin * cout, transcendentals=0,
            bytes_accessed=2 * (m * cin + cin * cout + m * cout)),
    )(x, w)


def _bn_relu_conv1x1_stats(y, scale, shift, w, tm):
    m, cin = y.shape
    cout = w.shape[1]
    nt = m // tm
    return pl.pallas_call(
        _bn_relu_conv1x1_stats_kernel,
        out_shape=(jax.ShapeDtypeStruct((m, cout), jnp.bfloat16),
                   jax.ShapeDtypeStruct((nt, 2, cout), jnp.float32)),
        grid_spec=pltpu.PrefetchScalarGridSpec(
            num_scalar_prefetch=0, grid=(nt,),
            in_specs=[pl.BlockSpec((tm, cin), lambda i: (i, 0)),
                      pl.BlockSpec((1, cin), lambda i: (0, 0)),
                      pl.BlockSpec((1, cin), lambda i: (0, 0)),
                      pl.BlockSpec((cin, cout), lambda i: (0, 0))],
            out_specs=[pl.BlockSpec((tm, cout), lambda i: (i, 0)),
                       pl.BlockSpec((1, 2, cout), lambda i: (i, 0, 0))]),
        compiler_params=_compiler_params(),
        cost_estimate=pl.CostEstimate(
            flops=2 * m * cin * cout, transcendentals=0,
            bytes_accessed=2 * (m * cin + cin * cout + m * cout)),
    )(y, scale, shift, w)


def _bn_relu_conv3x3_stats(y1, scale, shift, w_taps, n, h, w):
    # TODO(synk): for very large H*W*C a row-chunked halo (manual DMA) tiling
    # would replace the one-image-per-grid-step blocking used here.
    c1 = y1.shape[-1]
    c2 = w_taps.shape[-1]
    y1_img = y1.reshape(n, h, w, c1)
    y2, st = pl.pallas_call(
        _bn_relu_conv3x3_stats_kernel,
        out_shape=(jax.ShapeDtypeStruct((n, h, w, c2), jnp.bfloat16),
                   jax.ShapeDtypeStruct((n, 2, c2), jnp.float32)),
        grid_spec=pltpu.PrefetchScalarGridSpec(
            num_scalar_prefetch=0, grid=(n,),
            in_specs=[pl.BlockSpec((1, h, w, c1), lambda i: (i, 0, 0, 0)),
                      pl.BlockSpec((1, c1), lambda i: (0, 0)),
                      pl.BlockSpec((1, c1), lambda i: (0, 0)),
                      pl.BlockSpec((9, c1, c2), lambda i: (0, 0, 0))],
            out_specs=[pl.BlockSpec((1, h, w, c2), lambda i: (i, 0, 0, 0)),
                       pl.BlockSpec((1, 2, c2), lambda i: (i, 0, 0))],
            scratch_shapes=[pltpu.VMEM((h + 2, w + 2, c1), jnp.float32)]),
        compiler_params=_compiler_params(),
        cost_estimate=pl.CostEstimate(
            flops=2 * n * h * w * 9 * c1 * c2, transcendentals=0,
            bytes_accessed=2 * (n * h * w * (c1 + c2) + 9 * c1 * c2)),
    )(y1_img, scale, shift, w_taps)
    return y2.reshape(n * h * w, c2), st


def _bn_add_relu(y, scale, shift, res, tm):
    m, c = y.shape
    nt = m // tm
    return pl.pallas_call(
        _bn_add_relu_kernel,
        out_shape=jax.ShapeDtypeStruct((m, c), jnp.float32),
        grid_spec=pltpu.PrefetchScalarGridSpec(
            num_scalar_prefetch=0, grid=(nt,),
            in_specs=[pl.BlockSpec((tm, c), lambda i: (i, 0)),
                      pl.BlockSpec((1, c), lambda i: (0, 0)),
                      pl.BlockSpec((1, c), lambda i: (0, 0)),
                      pl.BlockSpec((tm, c), lambda i: (i, 0))],
            out_specs=pl.BlockSpec((tm, c), lambda i: (i, 0))),
        compiler_params=_compiler_params(),
        cost_estimate=pl.CostEstimate(
            flops=3 * m * c, transcendentals=0,
            bytes_accessed=10 * m * c),
    )(y, scale, shift, res)


# ---------------------------------------------------------------------------
# Glue: global BN stats -> per-channel (scale, shift) FMA coefficients
# ---------------------------------------------------------------------------
def _bn_scale_shift(partial_stats, gamma_p, beta_p, count):
    s = jnp.sum(partial_stats, axis=0)                       # (2, Cp) exact f32
    mean = s[0] / count
    var = jnp.maximum(s[1] / count - mean * mean, 0.0)       # guard cancellation
    scale = gamma_p * lax.rsqrt(var + EPS)
    shift = beta_p - mean * scale
    return scale.reshape(1, -1), shift.reshape(1, -1)


# ---------------------------------------------------------------------------
# Forward wrapper (NCHW in/out to match the PyTorch module)
# ---------------------------------------------------------------------------
def bottleneck_forward(x_nchw, params):
    w1, w2, w3 = params["w1"], params["w2"], params["w3"]
    g1, b1 = params["g1"], params["b1"]
    g2, b2 = params["g2"], params["b2"]
    g3, b3 = params["g3"], params["b3"]

    n, cin, h, w = x_nchw.shape
    c1, c2, c3 = w1.shape[0], w2.shape[0], w3.shape[0]
    cinp, c1p, c2p, c3p = (_round_up(c) for c in (cin, c1, c2, c3))
    if cin != c3 or cinp != c3p:
        raise ValueError("residual add requires out_channels == in_channels")
    m = n * h * w
    tm = _pick_m_tile(m)

    # NCHW -> NHWC once; channels on the 128-lane axis, zero-padded lane-dense.
    x_nhwc = jnp.transpose(x_nchw, (0, 2, 3, 1)).astype(jnp.float32)
    x2d = jnp.pad(x_nhwc.reshape(m, cin), ((0, 0), (0, cinp - cin)))
    x2d_bf = x2d.astype(jnp.bfloat16)

    # Weights -> matmul layout, zero-padded lane-dense, bf16 MXU operands.
    w1m = jnp.pad(jnp.transpose(w1[:, :, 0, 0], (1, 0)),
                  ((0, cinp - w1.shape[1]), (0, c1p - c1))).astype(jnp.bfloat16)
    w2t = jnp.transpose(w2, (2, 3, 1, 0)).reshape(9, w2.shape[1], c2)
    w2m = jnp.pad(w2t, ((0, 0), (0, c1p - w2.shape[1]),
                        (0, c2p - c2))).astype(jnp.bfloat16)
    w3m = jnp.pad(jnp.transpose(w3[:, :, 0, 0], (1, 0)),
                  ((0, c2p - w3.shape[1]), (0, c3p - c3))).astype(jnp.bfloat16)

    g1p, b1p = jnp.pad(g1, (0, c1p - c1)), jnp.pad(b1, (0, c1p - c1))
    g2p, b2p = jnp.pad(g2, (0, c2p - c2)), jnp.pad(b2, (0, c2p - c2))
    g3p, b3p = jnp.pad(g3, (0, c3p - c3)), jnp.pad(b3, (0, c3p - c3))

    # Stage 1: conv1 (1x1) + per-tile BN stats.
    y1, st1 = _conv1x1_stats(x2d_bf, w1m, tm)
    s1, sh1 = _bn_scale_shift(st1, g1p, b1p, m)

    # Stage 2: BN1+ReLU fused into in-VMEM 3x3 conv + per-tile BN stats.
    y2, st2 = _bn_relu_conv3x3_stats(y1, s1, sh1, w2m, n, h, w)
    s2, sh2 = _bn_scale_shift(st2, g2p, b2p, m)

    # Stage 3: BN2+ReLU + conv3 (1x1) + per-tile BN stats.
    y3, st3 = _bn_relu_conv1x1_stats(y2, s2, sh2, w3m, tm)
    s3, sh3 = _bn_scale_shift(st3, g3p, b3p, m)

    # Stage 4: BN3 + residual add + ReLU (f32).
    out2d = _bn_add_relu(y3, s3, sh3, x2d, tm)

    out = out2d[:, :c3].reshape(n, h, w, c3)
    return jnp.transpose(out, (0, 3, 1, 2))


# ---------------------------------------------------------------------------
# Pure-JAX reference (NCHW, training-mode BN) for correctness check
# ---------------------------------------------------------------------------
def _reference(x, params):
    def conv(x, w, pad):
        return lax.conv_general_dilated(
            x, w, (1, 1), [(pad, pad), (pad, pad)],
            dimension_numbers=("NCHW", "OIHW", "NCHW"))

    def bn(x, gamma, beta):
        mean = jnp.mean(x, axis=(0, 2, 3), keepdims=True)
        var = jnp.mean(jnp.square(x - mean), axis=(0, 2, 3), keepdims=True)
        return ((x - mean) * lax.rsqrt(var + EPS) * gamma.reshape(1, -1, 1, 1)
                + beta.reshape(1, -1, 1, 1))

    out = jax.nn.relu(bn(conv(x, params["w1"], 0), params["g1"], params["b1"]))
    out = jax.nn.relu(bn(conv(out, params["w2"], 1), params["g2"], params["b2"]))
    out = bn(conv(out, params["w3"], 0), params["g3"], params["b3"])
    return jax.nn.relu(out + x)


# ---------------------------------------------------------------------------
if __name__ == "__main__":
    key = jax.random.PRNGKey(0)
    kx, k1, k2, k3 = jax.random.split(key, 4)

    N, C, H, W = 2, 4, 16, 16
    inplanes = planes = C
    expansion = 1  # TODO(synk): self.expansion is undefined on the reference class; 1 keeps the residual add shape-consistent.

    x = jax.random.normal(kx, (N, C, H, W), jnp.float32)

    params = {
        "w1": 0.2 * jax.random.normal(k1, (planes, inplanes, 1, 1), jnp.float32),
        "w2": 0.2 * jax.random.normal(k2, (planes, inplanes, 3, 3), jnp.float32),
        "w3": 0.2 * jax.random.normal(
            k3, (planes * expansion, inplanes, 1, 1), jnp.float32),
        "g1": 1.0 + 0.1 * jnp.arange(planes, dtype=jnp.float32),
        "b1": 0.05 * jnp.arange(planes, dtype=jnp.float32),
        "g2": 1.0 - 0.05 * jnp.arange(planes, dtype=jnp.float32),
        "b2": -0.02 * jnp.arange(planes, dtype=jnp.float32),
        "g3": 1.0 + 0.03 * jnp.arange(planes * expansion, dtype=jnp.float32),
        "b3": 0.01 * jnp.arange(planes * expansion, dtype=jnp.float32),
    }

    fwd = jax.jit(bottleneck_forward)
    out = jax.block_until_ready(fwd(x, params))
    ref = jax.block_until_ready(_reference(x, params))

    assert out.shape == (N, planes * expansion, H, W)
    # bf16 MXU operands + bf16 activation storage -> looser tolerance than f32.
    assert jnp.allclose(out, ref, atol=5e-2, rtol=5e-2)
    print("KERNEL_OK")
</pallas_src>

<mosaic_0001>
module attributes {stable_mosaic.version = 11 : i64} {
  func.func @_conv1x1_stats_kernel(%arg0: i32, %arg1: memref<512x128xbf16, #tpu.memory_space<vmem>>, %arg2: memref<128x128xbf16, #tpu.memory_space<vmem>>, %arg3: memref<512x128xbf16, #tpu.memory_space<vmem>>, %arg4: memref<1x2x128xf32, #tpu.memory_space<vmem>>) attributes {dimension_semantics = [#tpu.dimension_semantics<parallel>], iteration_bounds = array<i64: 1>, scalar_prefetch = 0 : i64, scratch_operands = 0 : i64, tpu.core_type = #tpu.core_type<tc>, window_params = [{transform_indices = @transform_0, window_bounds = array<i64: 512, 128>}, {pipeline_mode = #tpu.pipeline_mode<synchronous>, transform_indices = @transform_1, window_bounds = array<i64: 128, 128>}, {transform_indices = @transform_2, window_bounds = array<i64: 512, 128>}, {transform_indices = @transform_3, window_bounds = array<i64: 1, 2, 128>}]} {
    %c0 = arith.constant 0 : index
    %c0_0 = arith.constant 0 : index
    %0 = vector.load %arg1[%c0, %c0_0] : memref<512x128xbf16, #tpu.memory_space<vmem>>, vector<512x128xbf16>
    %c0_1 = arith.constant 0 : index
    %c0_2 = arith.constant 0 : index
    %1 = vector.load %arg2[%c0_1, %c0_2] : memref<128x128xbf16, #tpu.memory_space<vmem>>, vector<128x128xbf16>
    %cst = arith.constant dense<0.000000e+00> : vector<512x128xf32>
    %2 = tpu.matmul %0, %1, %cst {dimension_numbers = #tpu.dot_dimension_numbers<[1], [0], [0], [1], [0, 0, 1, 1], [], []>} : vector<512x128xbf16>, vector<128x128xbf16>, vector<512x128xf32> -> vector<512x128xf32>
    %3 = arith.truncf %2 : vector<512x128xf32> to vector<512x128xbf16>
    %c0_3 = arith.constant 0 : index
    %c0_4 = arith.constant 0 : index
    %4 = vector.load %arg3[%c0_3, %c0_4] : memref<512x128xbf16, #tpu.memory_space<vmem>>, vector<512x128xbf16>
    tpu.vector_store %arg3[%c0_3, %c0_4], %3 {strides = array<i32>} : memref<512x128xbf16, #tpu.memory_space<vmem>>, vector<512x128xbf16>,
    %cst_5 = arith.constant dense<0.000000e+00> : vector<128xf32>
    %5 = vector.multi_reduction <add>, %2, %cst_5 [0] : vector<512x128xf32> to vector<128xf32>
    %6 = vector.shape_cast %5 : vector<128xf32> to vector<1x128xf32>
    %c0_6 = arith.constant 0 : index
    %c0_7 = arith.constant 0 : index
    %c0_8 = arith.constant 0 : index
    %7 = vector.load %arg4[%c0_6, %c0_7, %c0_8] : memref<1x2x128xf32, #tpu.memory_space<vmem>>, vector<1x1x128xf32>
    %8 = vector.shape_cast %7 : vector<1x1x128xf32> to vector<1x128xf32>
    %9 = vector.shape_cast %6 : vector<1x128xf32> to vector<1x1x128xf32>
    tpu.vector_store %arg4[%c0_6, %c0_7, %c0_8], %9 {strides = array<i32>} : memref<1x2x128xf32, #tpu.memory_space<vmem>>, vector<1x1x128xf32>,
    %10 = arith.mulf %2, %2 : vector<512x128xf32>
    %cst_9 = arith.constant dense<0.000000e+00> : vector<128xf32>
    %11 = vector.multi_reduction <add>, %10, %cst_9 [0] : vector<512x128xf32> to vector<128xf32>
    %12 = vector.shape_cast %11 : vector<128xf32> to vector<1x128xf32>
    %c0_10 = arith.constant 0 : index
    %c1 = arith.constant 1 : index
    %c0_11 = arith.constant 0 : index
    %13 = vector.load %arg4[%c0_10, %c1, %c0_11] : memref<1x2x128xf32, #tpu.memory_space<vmem>>, vector<1x1x128xf32>
    %14 = vector.shape_cast %13 : vector<1x1x128xf32> to vector<1x128xf32>
    %15 = vector.shape_cast %12 : vector<1x128xf32> to vector<1x1x128xf32>
    tpu.vector_store %arg4[%c0_10, %c1, %c0_11], %15 {strides = array<i32>} : memref<1x2x128xf32, #tpu.memory_space<vmem>>, vector<1x1x128xf32>,
    return
  }
  func.func @transform_0(%arg0: i32) -> (i32, i32) {
    %c0_i32 = arith.constant 0 : i32
    %c0_i32_0 = arith.constant 0 : i32
    return %arg0, %c0_i32 : i32, i32
  }
  func.func @transform_1(%arg0: i32) -> (i32, i32) {
    %c0_i32 = arith.constant 0 : i32
    %c0_i32_0 = arith.constant 0 : i32
    %c0_i32_1 = arith.constant 0 : i32
    return %c0_i32, %c0_i32_0 : i32, i32
  }
  func.func @transform_2(%arg0: i32) -> (i32, i32) {
    %c0_i32 = arith.constant 0 : i32
    %c0_i32_0 = arith.constant 0 : i32
    return %arg0, %c0_i32 : i32, i32
  }
  func.func @transform_3(%arg0: i32) -> (i32, i32, i32) {
    %c0_i32 = arith.constant 0 : i32
    %c0_i32_0 = arith.constant 0 : i32
    %c0_i32_1 = arith.constant 0 : i32
    return %arg0, %c0_i32, %c0_i32_0 : i32, i32, i32
  }
}

module attributes {stable_mosaic.version = 11 : i64} {
  func.func @_bn_relu_conv3x3_stats_kernel(%arg0: i32, %arg1: memref<1x16x16x128xbf16, #tpu.memory_space<vmem>>, %arg2: memref<1x128xf32, #tpu.memory_space<vmem>>, %arg3: memref<1x128xf32, #tpu.memory_space<vmem>>, %arg4: memref<9x128x128xbf16, #tpu.memory_space<vmem>>, %arg5: memref<1x16x16x128xbf16, #tpu.memory_space<vmem>>, %arg6: memref<1x2x128xf32, #tpu.memory_space<vmem>>, %arg7: memref<18x18x128xf32, #tpu.memory_space<vmem>>) attributes {dimension_semantics = [#tpu.dimension_semantics<parallel>], iteration_bounds = array<i64: 2>, scalar_prefetch = 0 : i64, scratch_operands = 1 : i64, tpu.core_type = #tpu.core_type<tc>, window_params = [{transform_indices = @transform_0, window_bounds = array<i64: 1, 16, 16, 128>}, {pipeline_mode = #tpu.pipeline_mode<synchronous>, transform_indices = @transform_1, window_bounds = array<i64: 1, 128>}, {pipeline_mode = #tpu.pipeline_mode<synchronous>, transform_indices = @transform_2, window_bounds = array<i64: 1, 128>}, {pipeline_mode = #tpu.pipeline_mode<synchronous>, transform_indices = @transform_3, window_bounds = array<i64: 9, 128, 128>}, {transform_indices = @transform_4, window_bounds = array<i64: 1, 16, 16, 128>}, {transform_indices = @transform_5, window_bounds = array<i64: 1, 2, 128>}]} {
    %c0 = arith.constant 0 : index
    %c0_0 = arith.constant 0 : index
    %0 = vector.load %arg2[%c0, %c0_0] : memref<1x128xf32, #tpu.memory_space<vmem>>, vector<1x128xf32>
    %1 = vector.shape_cast %0 : vector<1x128xf32> to vector<1x1x128xf32>
    %c0_1 = arith.constant 0 : index
    %c0_2 = arith.constant 0 : index
    %2 = vector.load %arg3[%c0_1, %c0_2] : memref<1x128xf32, #tpu.memory_space<vmem>>, vector<1x128xf32>
    %3 = vector.shape_cast %2 : vector<1x128xf32> to vector<1x1x128xf32>
    %c0_3 = arith.constant 0 : index
    %c0_4 = arith.constant 0 : index
    %c0_5 = arith.constant 0 : index
    %c0_6 = arith.constant 0 : index
    %4 = vector.load %arg1[%c0_3, %c0_4, %c0_5, %c0_6] : memref<1x16x16x128xbf16, #tpu.memory_space<vmem>>, vector<1x16x16x128xbf16>
    %5 = vector.shape_cast %4 : vector<1x16x16x128xbf16> to vector<16x16x128xbf16>
    %6 = arith.extf %5 : vector<16x16x128xbf16> to vector<16x16x128xf32>
    %7 = vector.broadcast %1 : vector<1x1x128xf32> to vector<16x16x128xf32>
    %8 = arith.mulf %6, %7 : vector<16x16x128xf32>
    %9 = vector.broadcast %3 : vector<1x1x128xf32> to vector<16x16x128xf32>
    %10 = arith.addf %8, %9 : vector<16x16x128xf32>
    %cst = arith.constant 0.000000e+00 : f32
    %11 = vector.broadcast %cst : f32 to vector<16x16x128xf32>
    %12 = arith.maximumf %10, %11 : vector<16x16x128xf32>
    %cst_7 = arith.constant 0.000000e+00 : f32
    %13 = vector.broadcast %cst_7 : f32 to vector<18x18x128xf32>
    %c0_8 = arith.constant 0 : index
    %c0_9 = arith.constant 0 : index
    %c0_10 = arith.constant 0 : index
    %14 = vector.load %arg7[%c0_8, %c0_9, %c0_10] : memref<18x18x128xf32, #tpu.memory_space<vmem>>, vector<18x18x128xf32>
    tpu.vector_store %arg7[%c0_8, %c0_9, %c0_10], %13 {strides = array<i32>} : memref<18x18x128xf32, #tpu.memory_space<vmem>>, vector<18x18x128xf32>,
    %c1 = arith.constant 1 : index
    %c1_11 = arith.constant 1 : index
    %c0_12 = arith.constant 0 : index
    %15 = vector.load %arg7[%c1, %c1_11, %c0_12] : memref<18x18x128xf32, #tpu.memory_space<vmem>>, vector<16x16x128xf32>
    tpu.vector_store %arg7[%c1, %c1_11, %c0_12], %12 {strides = array<i32>} : memref<18x18x128xf32, #tpu.memory_space<vmem>>, vector<16x16x128xf32>,
    %cst_13 = arith.constant 0.000000e+00 : f32
    %16 = vector.broadcast %cst_13 : f32 to vector<256x128xf32>
    %c0_14 = arith.constant 0 : index
    %c0_15 = arith.constant 0 : index
    %c0_16 = arith.constant 0 : index
    %17 = vector.load %arg7[%c0_14, %c0_15, %c0_16] : memref<18x18x128xf32, #tpu.memory_space<vmem>>, vector<16x16x128xf32>
    %18 = vector.shape_cast %17 : vector<16x16x128xf32> to vector<256x128xf32>
    %19 = arith.truncf %18 : vector<256x128xf32> to vector<256x128xbf16>
    %c0_17 = arith.constant 0 : index
    %c0_18 = arith.constant 0 : index
    %c0_19 = arith.constant 0 : index
    %20 = vector.load %arg4[%c0_17, %c0_18, %c0_19] : memref<9x128x128xbf16, #tpu.memory_space<vmem>>, vector<1x128x128xbf16>
    %21 = vector.shape_cast %20 : vector<1x128x128xbf16> to vector<128x128xbf16>
    %cst_20 = arith.constant dense<0.000000e+00> : vector<256x128xf32>
    %22 = tpu.matmul %19, %21, %cst_20 {dimension_numbers = #tpu.dot_dimension_numbers<[1], [0], [0], [1], [0, 0, 1, 1], [], []>} : vector<256x128xbf16>, vector<128x128xbf16>, vector<256x128xf32> -> vector<256x128xf32>
    %23 = arith.addf %16, %22 : vector<256x128xf32>
    %c0_21 = arith.constant 0 : index
    %c1_22 = arith.constant 1 : index
    %c0_23 = arith.constant 0 : index
    %24 = vector.load %arg7[%c0_21, %c1_22, %c0_23] : memref<18x18x128xf32, #tpu.memory_space<vmem>>, vector<16x16x128xf32>
    %25 = vector.shape_cast %24 : vector<16x16x128xf32> to vector<256x128xf32>
    %26 = arith.truncf %25 : vector<256x128xf32> to vector<256x128xbf16>
    %c1_24 = arith.constant 1 : index
    %c0_25 = arith.constant 0 : index
    %c0_26 = arith.constant 0 : index
    %27 = vector.load %arg4[%c1_24, %c0_25, %c0_26] : memref<9x128x128xbf16, #tpu.memory_space<vmem>>, vector<1x128x128xbf16>
    %28 = vector.shape_cast %27 : vector<1x128x128xbf16> to vector<128x128xbf16>
    %cst_27 = arith.constant dense<0.000000e+00> : vector<256x128xf32>
    %29 = tpu.matmul %26, %28, %cst_27 {dimension_numbers = #tpu.dot_dimension_numbers<[1], [0], [0], [1], [0, 0, 1, 1], [], []>} : vector<256x128xbf16>, vector<128x128xbf16>, vector<256x128xf32> -> vector<256x128xf32>
    %30 = arith.addf %23, %29 : vector<256x128xf32>
    %c0_28 = arith.constant 0 : index
    %c2 = arith.constant 2 : index
    %c0_29 = arith.constant 0 : index
    %31 = vector.load %arg7[%c0_28, %c2, %c0_29] : memref<18x18x128xf32, #tpu.memory_space<vmem>>, vector<16x16x128xf32>
    %32 = vector.shape_cast %31 : vector<16x16x128xf32> to vector<256x128xf32>
    %33 = arith.truncf %32 : vector<256x128xf32> to vector<256x128xbf16>
    %c2_30 = arith.constant 2 : index
    %c0_31 = arith.constant 0 : index
    %c0_32 = arith.constant 0 : index
    %34 = vector.load %arg4[%c2_30, %c0_31, %c0_32] : memref<9x128x128xbf16, #tpu.memory_space<vmem>>, vector<1x128x128xbf16>
    %35 = vector.shape_cast %34 : vector<1x128x128xbf16> to vector<128x128xbf16>
    %cst_33 = arith.constant dense<0.000000e+00> : vector<256x128xf32>
    %36 = tpu.matmul %33, %35, %cst_33 {dimension_numbers = #tpu.dot_dimension_numbers<[1], [0], [0], [1], [0, 0, 1, 1], [], []>} : vector<256x128xbf16>, vector<128x128xbf16>, vector<256x128xf32> -> vector<256x128xf32>
    %37 = arith.addf %30, %36 : vector<256x128xf32>
    %c1_34 = arith.constant 1 : index
    %c0_35 = arith.constant 0 : index
    %c0_36 = arith.constant 0 : index
    %38 = vector.load %arg7[%c1_34, %c0_35, %c0_36] : memref<18x18x128xf32, #tpu.memory_space<vmem>>, vector<16x16x128xf32>
    %39 = vector.shape_cast %38 : vector<16x16x128xf32> to vector<256x128xf32>
    %40 = arith.truncf %39 : vector<256x128xf32> to vector<256x128xbf16>
    %c3 = arith.constant 3 : index
    %c0_37 = arith.constant 0 : index
    %c0_38 = arith.constant 0 : index
    %41 = vector.load %arg4[%c3, %c0_37, %c0_38] : memref<9x128x128xbf16, #tpu.memory_space<vmem>>, vector<1x128x128xbf16>
    %42 = vector.shape_cast %41 : vector<1x128x128xbf16> to vector<128x128xbf16>
    %cst_39 = arith.constant dense<0.000000e+00> : vector<256x128xf32>
    %43 = tpu.matmul %40, %42, %cst_39 {dimension_numbers = #tpu.dot_dimension_numbers<[1], [0], [0], [1], [0, 0, 1, 1], [], []>} : vector<256x128xbf16>, vector<128x128xbf16>, vector<256x128xf32> -> vector<256x128xf32>
    %44 = arith.addf %37, %43 : vector<256x128xf32>
    %c1_40 = arith.constant 1 : index
    %c1_41 = arith.constant 1 : index
    %c0_42 = arith.constant 0 : index
    %45 = vector.load %arg7[%c1_40, %c1_41, %c0_42] : memref<18x18x128xf32, #tpu.memory_space<vmem>>, vector<16x16x128xf32>
    %46 = vector.shape_cast %45 : vector<16x16x128xf32> to vector<256x128xf32>
    %47 = arith.truncf %46 : vector<256x128xf32> to vector<256x128xbf16>
    %c4 = arith.constant 4 : index
    %c0_43 = arith.constant 0 : index
    %c0_44 = arith.constant 0 : index
    %48 = vector.load %arg4[%c4, %c0_43, %c0_44] : memref<9x128x128xbf16, #tpu.memory_space<vmem>>, vector<1x128x128xbf16>
    %49 = vector.shape_cast %48 : vector<1x128x128xbf16> to vector<128x128xbf16>
    %cst_45 = arith.constant dense<0.000000e+00> : vector<256x128xf32>
    %50 = tpu.matmul %47, %49, %cst_45 {dimension_numbers = #tpu.dot_dimension_numbers<[1], [0], [0], [1], [0, 0, 1, 1], [], []>} : vector<256x128xbf16>, vector<128x128xbf16>, vector<256x128xf32> -> vector<256x128xf32>
    %51 = arith.addf %44, %50 : vector<256x128xf32>
    %c1_46 = arith.constant 1 : index
    %c2_47 = arith.constant 2 : index
    %c0_48 = arith.constant 0 : index
    %52 = vector.load %arg7[%c1_46, %c2_47, %c0_48] : memref<18x18x128xf32, #tpu.memory_space<vmem>>, vector<16x16x128xf32>
    %53 = vector.shape_cast %52 : vector<16x16x128xf32> to vector<256x128xf32>
    %54 = arith.truncf %53 : vector<256x128xf32> to vector<256x128xbf16>
    %c5 = arith.constant 5 : index
    %c0_49 = arith.constant 0 : index
    %c0_50 = arith.constant 0 : index
    %55 = vector.load %arg4[%c5, %c0_49, %c0_50] : memref<9x128x128xbf16, #tpu.memory_space<vmem>>, vector<1x128x128xbf16>
    %56 = vector.shape_cast %55 : vector<1x128x128xbf16> to vector<128x128xbf16>
    %cst_51 = arith.constant dense<0.000000e+00> : vector<256x128xf32>
    %57 = tpu.matmul %54, %56, %cst_51 {dimension_numbers = #tpu.dot_dimension_numbers<[1], [0], [0], [1], [0, 0, 1, 1], [], []>} : vector<256x128xbf16>, vector<128x128xbf16>, vector<256x128xf32> -> vector<256x128xf32>
    %58 = arith.addf %51, %57 : vector<256x128xf32>
    %c2_52 = arith.constant 2 : index
    %c0_53 = arith.constant 0 : index
    %c0_54 = arith.constant 0 : index
    %59 = vector.load %arg7[%c2_52, %c0_53, %c0_54] : memref<18x18x128xf32, #tpu.memory_space<vmem>>, vector<16x16x128xf32>
    %60 = vector.shape_cast %59 : vector<16x16x128xf32> to vector<256x128xf32>
    %61 = arith.truncf %60 : vector<256x128xf32> to vector<256x128xbf16>
    %c6 = arith.constant 6 : index
    %c0_55 = arith.constant 0 : index
    %c0_56 = arith.constant 0 : index
    %62 = vector.load %arg4[%c6, %c0_55, %c0_56] : memref<9x128x128xbf16, #tpu.memory_space<vmem>>, vector<1x128x128xbf16>
    %63 = vector.shape_cast %62 : vector<1x128x128xbf16> to vector<128x128xbf16>
    %cst_57 = arith.constant dense<0.000000e+00> : vector<256x128xf32>
    %64 = tpu.matmul %61, %63, %cst_57 {dimension_numbers = #tpu.dot_dimension_numbers<[1], [0], [0], [1], [0, 0, 1, 1], [], []>} : vector<256x128xbf16>, vector<128x128xbf16>, vector<256x128xf32> -> vector<256x128xf32>
    %65 = arith.addf %58, %64 : vector<256x128xf32>
    %c2_58 = arith.constant 2 : index
    %c1_59 = arith.constant 1 : index
    %c0_60 = arith.constant 0 : index
    %66 = vector.load %arg7[%c2_58, %c1_59, %c0_60] : memref<18x18x128xf32, #tpu.memory_space<vmem>>, vector<16x16x128xf32>
    %67 = vector.shape_cast %66 : vector<16x16x128xf32> to vector<256x128xf32>
    %68 = arith.truncf %67 : vector<256x128xf32> to vector<256x128xbf16>
    %c7 = arith.constant 7 : index
    %c0_61 = arith.constant 0 : index
    %c0_62 = arith.constant 0 : index
    %69 = vector.load %arg4[%c7, %c0_61, %c0_62] : memref<9x128x128xbf16, #tpu.memory_space<vmem>>, vector<1x128x128xbf16>
    %70 = vector.shape_cast %69 : vector<1x128x128xbf16> to vector<128x128xbf16>
    %cst_63 = arith.constant dense<0.000000e+00> : vector<256x128xf32>
    %71 = tpu.matmul %68, %70, %cst_63 {dimension_numbers = #tpu.dot_dimension_numbers<[1], [0], [0], [1], [0, 0, 1, 1], [], []>} : vector<256x128xbf16>, vector<128x128xbf16>, vector<256x128xf32> -> vector<256x128xf32>
    %72 = arith.addf %65, %71 : vector<256x128xf32>
    %c2_64 = arith.constant 2 : index
    %c2_65 = arith.constant 2 : index
    %c0_66 = arith.constant 0 : index
    %73 = vector.load %arg7[%c2_64, %c2_65, %c0_66] : memref<18x18x128xf32, #tpu.memory_space<vmem>>, vector<16x16x128xf32>
    %74 = vector.shape_cast %73 : vector<16x16x128xf32> to vector<256x128xf32>
    %75 = arith.truncf %74 : vector<256x128xf32> to vector<256x128xbf16>
    %c8 = arith.constant 8 : index
    %c0_67 = arith.constant 0 : index
    %c0_68 = arith.constant 0 : index
    %76 = vector.load %arg4[%c8, %c0_67, %c0_68] : memref<9x128x128xbf16, #tpu.memory_space<vmem>>, vector<1x128x128xbf16>
    %77 = vector.shape_cast %76 : vector<1x128x128xbf16> to vector<128x128xbf16>
    %cst_69 = arith.constant dense<0.000000e+00> : vector<256x128xf32>
    %78 = tpu.matmul %75, %77, %cst_69 {dimension_numbers = #tpu.dot_dimension_numbers<[1], [0], [0], [1], [0, 0, 1, 1], [], []>} : vector<256x128xbf16>, vector<128x128xbf16>, vector<256x128xf32> -> vector<256x128xf32>
    %79 = arith.addf %72, %78 : vector<256x128xf32>
    %80 = vector.shape_cast %79 : vector<256x128xf32> to vector<16x16x128xf32>
    %81 = arith.truncf %80 : vector<16x16x128xf32> to vector<16x16x128xbf16>
    %c0_70 = arith.constant 0 : index
    %c0_71 = arith.constant 0 : index
    %c0_72 = arith.constant 0 : index
    %c0_73 = arith.constant 0 : index
    %82 = vector.load %arg5[%c0_70, %c0_71, %c0_72, %c0_73] : memref<1x16x16x128xbf16, #tpu.memory_space<vmem>>, vector<1x16x16x128xbf16>
    %83 = vector.shape_cast %82 : vector<1x16x16x128xbf16> to vector<16x16x128xbf16>
    %84 = vector.shape_cast %81 : vector<16x16x128xbf16> to vector<1x16x16x128xbf16>
    tpu.vector_store %arg5[%c0_70, %c0_71, %c0_72, %c0_73], %84 {strides = array<i32>} : memref<1x16x16x128xbf16, #tpu.memory_space<vmem>>, vector<1x16x16x128xbf16>,
    %cst_74 = arith.constant dense<0.000000e+00> : vector<128xf32>
    %85 = vector.multi_reduction <add>, %79, %cst_74 [0] : vector<256x128xf32> to vector<128xf32>
    %86 = vector.shape_cast %85 : vector<128xf32> to vector<1x128xf32>
    %c0_75 = arith.constant 0 : index
    %c0_76 = arith.constant 0 : index
    %c0_77 = arith.constant 0 : index
    %87 = vector.load %arg6[%c0_75, %c0_76, %c0_77] : memref<1x2x128xf32, #tpu.memory_space<vmem>>, vector<1x1x128xf32>
    %88 = vector.shape_cast %87 : vector<1x1x128xf32> to vector<1x128xf32>
    %89 = vector.shape_cast %86 : vector<1x128xf32> to vector<1x1x128xf32>
    tpu.vector_store %arg6[%c0_75, %c0_76, %c0_77], %89 {strides = array<i32>} : memref<1x2x128xf32, #tpu.memory_space<vmem>>, vector<1x1x128xf32>,
    %90 = arith.mulf %79, %79 : vector<256x128xf32>
    %cst_78 = arith.constant dense<0.000000e+00> : vector<128xf32>
    %91 = vector.multi_reduction <add>, %90, %cst_78 [0] : vector<256x128xf32> to vector<128xf32>
    %92 = vector.shape_cast %91 : vector<128xf32> to vector<1x128xf32>
    %c0_79 = arith.constant 0 : index
    %c1_80 = arith.constant 1 : index
    %c0_81 = arith.constant 0 : index
    %93 = vector.load %arg6[%c0_79, %c1_80, %c0_81] : memref<1x2x128xf32, #tpu.memory_space<vmem>>, vector<1x1x128xf32>
    %94 = vector.shape_cast %93 : vector<1x1x128xf32> to vector<1x128xf32>
    %95 = vector.shape_cast %92 : vector<1x128xf32> to vector<1x1x128xf32>
    tpu.vector_store %arg6[%c0_79, %c1_80, %c0_81], %95 {strides = array<i32>} : memref<1x2x128xf32, #tpu.memory_space<vmem>>, vector<1x1x128xf32>,
    return
  }
  func.func @transform_0(%arg0: i32) -> (i32, i32, i32, i32) {
    %c0_i32 = arith.constant 0 : i32
    %c0_i32_0 = arith.constant 0 : i32
    %c0_i32_1 = arith.constant 0 : i32
    %c0_i32_2 = arith.constant 0 : i32
    return %arg0, %c0_i32, %c0_i32_0, %c0_i32_1 : i32, i32, i32, i32
  }
  func.func @transform_1(%arg0: i32) -> (i32, i32) {
    %c0_i32 = arith.constant 0 : i32
    %c0_i32_0 = arith.constant 0 : i32
    %c0_i32_1 = arith.constant 0 : i32
    return %c0_i32, %c0_i32_0 : i32, i32
  }
  func.func @transform_2(%arg0: i32) -> (i32, i32) {
    %c0_i32 = arith.constant 0 : i32
    %c0_i32_0 = arith.constant 0 : i32
    %c0_i32_1 = arith.constant 0 : i32
    return %c0_i32, %c0_i32_0 : i32, i32
  }
  func.func @transform_3(%arg0: i32) -> (i32, i32, i32) {
    %c0_i32 = arith.constant 0 : i32
    %c0_i32_0 = arith.constant 0 : i32
    %c0_i32_1 = arith.constant 0 : i32
    %c0_i32_2 = arith.constant 0 : i32
    return %c0_i32, %c0_i32_0, %c0_i32_1 : i32, i32, i32
  }
  func.func @transform_4(%arg0: i32) -> (i32, i32, i32, i32) {
    %c0_i32 = arith.constant 0 : i32
    %c0_i32_0 = arith.constant 0 : i32
    %c0_i32_1 = arith.constant 0 : i32
    %c0_i32_2 = arith.constant 0 : i32
    return %arg0, %c0_i32, %c0_i32_0, %c0_i32_1 : i32, i32, i32, i32
  }
  func.func @transform_5(%arg0: i32) -> (i32, i32, i32) {
    %c0_i32 = arith.constant 0 : i32
    %c0_i32_0 = arith.constant 0 : i32
    %c0_i32_1 = arith.constant 0 : i32
    return %arg0, %c0_i32, %c0_i32_0 : i32, i32, i32
  }
}

module attributes {stable_mosaic.version = 11 : i64} {
  func.func @_bn_relu_conv1x1_stats_kernel(%arg0: i32, %arg1: memref<512x128xbf16, #tpu.memory_space<vmem>>, %arg2: memref<1x128xf32, #tpu.memory_space<vmem>>, %arg3: memref<1x128xf32, #tpu.memory_space<vmem>>, %arg4: memref<128x128xbf16, #tpu.memory_space<vmem>>, %arg5: memref<512x128xbf16, #tpu.memory_space<vmem>>, %arg6: memref<1x2x128xf32, #tpu.memory_space<vmem>>) attributes {dimension_semantics = [#tpu.dimension_semantics<parallel>], iteration_bounds = array<i64: 1>, scalar_prefetch = 0 : i64, scratch_operands = 0 : i64, tpu.core_type = #tpu.core_type<tc>, window_params = [{transform_indices = @transform_0, window_bounds = array<i64: 512, 128>}, {pipeline_mode = #tpu.pipeline_mode<synchronous>, transform_indices = @transform_1, window_bounds = array<i64: 1, 128>}, {pipeline_mode = #tpu.pipeline_mode<synchronous>, transform_indices = @transform_2, window_bounds = array<i64: 1, 128>}, {pipeline_mode = #tpu.pipeline_mode<synchronous>, transform_indices = @transform_3, window_bounds = array<i64: 128, 128>}, {transform_indices = @transform_4, window_bounds = array<i64: 512, 128>}, {transform_indices = @transform_5, window_bounds = array<i64: 1, 2, 128>}]} {
    %c0 = arith.constant 0 : index
    %c0_0 = arith.constant 0 : index
    %0 = vector.load %arg1[%c0, %c0_0] : memref<512x128xbf16, #tpu.memory_space<vmem>>, vector<512x128xbf16>
    %1 = arith.extf %0 : vector<512x128xbf16> to vector<512x128xf32>
    %c0_1 = arith.constant 0 : index
    %c0_2 = arith.constant 0 : index
    %2 = vector.load %arg2[%c0_1, %c0_2] : memref<1x128xf32, #tpu.memory_space<vmem>>, vector<1x128xf32>
    %3 = vector.broadcast %2 : vector<1x128xf32> to vector<512x128xf32>
    %4 = arith.mulf %1, %3 : vector<512x128xf32>
    %c0_3 = arith.constant 0 : index
    %c0_4 = arith.constant 0 : index
    %5 = vector.load %arg3[%c0_3, %c0_4] : memref<1x128xf32, #tpu.memory_space<vmem>>, vector<1x128xf32>
    %6 = vector.broadcast %5 : vector<1x128xf32> to vector<512x128xf32>
    %7 = arith.addf %4, %6 : vector<512x128xf32>
    %cst = arith.constant 0.000000e+00 : f32
    %8 = vector.broadcast %cst : f32 to vector<512x128xf32>
    %9 = arith.maximumf %7, %8 : vector<512x128xf32>
    %10 = arith.truncf %9 : vector<512x128xf32> to vector<512x128xbf16>
    %c0_5 = arith.constant 0 : index
    %c0_6 = arith.constant 0 : index
    %11 = vector.load %arg4[%c0_5, %c0_6] : memref<128x128xbf16, #tpu.memory_space<vmem>>, vector<128x128xbf16>
    %cst_7 = arith.constant dense<0.000000e+00> : vector<512x128xf32>
    %12 = tpu.matmul %10, %11, %cst_7 {dimension_numbers = #tpu.dot_dimension_numbers<[1], [0], [0], [1], [0, 0, 1, 1], [], []>} : vector<512x128xbf16>, vector<128x128xbf16>, vector<512x128xf32> -> vector<512x128xf32>
    %13 = arith.truncf %12 : vector<512x128xf32> to vector<512x128xbf16>
    %c0_8 = arith.constant 0 : index
    %c0_9 = arith.constant 0 : index
    %14 = vector.load %arg5[%c0_8, %c0_9] : memref<512x128xbf16, #tpu.memory_space<vmem>>, vector<512x128xbf16>
    tpu.vector_store %arg5[%c0_8, %c0_9], %13 {strides = array<i32>} : memref<512x128xbf16, #tpu.memory_space<vmem>>, vector<512x128xbf16>,
    %cst_10 = arith.constant dense<0.000000e+00> : vector<128xf32>
    %15 = vector.multi_reduction <add>, %12, %cst_10 [0] : vector<512x128xf32> to vector<128xf32>
    %16 = vector.shape_cast %15 : vector<128xf32> to vector<1x128xf32>
    %c0_11 = arith.constant 0 : index
    %c0_12 = arith.constant 0 : index
    %c0_13 = arith.constant 0 : index
    %17 = vector.load %arg6[%c0_11, %c0_12, %c0_13] : memref<1x2x128xf32, #tpu.memory_space<vmem>>, vector<1x1x128xf32>
    %18 = vector.shape_cast %17 : vector<1x1x128xf32> to vector<1x128xf32>
    %19 = vector.shape_cast %16 : vector<1x128xf32> to vector<1x1x128xf32>
    tpu.vector_store %arg6[%c0_11, %c0_12, %c0_13], %19 {strides = array<i32>} : memref<1x2x128xf32, #tpu.memory_space<vmem>>, vector<1x1x128xf32>,
    %20 = arith.mulf %12, %12 : vector<512x128xf32>
    %cst_14 = arith.constant dense<0.000000e+00> : vector<128xf32>
    %21 = vector.multi_reduction <add>, %20, %cst_14 [0] : vector<512x128xf32> to vector<128xf32>
    %22 = vector.shape_cast %21 : vector<128xf32> to vector<1x128xf32>
    %c0_15 = arith.constant 0 : index
    %c1 = arith.constant 1 : index
    %c0_16 = arith.constant 0 : index
    %23 = vector.load %arg6[%c0_15, %c1, %c0_16] : memref<1x2x128xf32, #tpu.memory_space<vmem>>, vector<1x1x128xf32>
    %24 = vector.shape_cast %23 : vector<1x1x128xf32> to vector<1x128xf32>
    %25 = vector.shape_cast %22 : vector<1x128xf32> to vector<1x1x128xf32>
    tpu.vector_store %arg6[%c0_15, %c1, %c0_16], %25 {strides = array<i32>} : memref<1x2x128xf32, #tpu.memory_space<vmem>>, vector<1x1x128xf32>,
    return
  }
  func.func @transform_0(%arg0: i32) -> (i32, i32) {
    %c0_i32 = arith.constant 0 : i32
    %c0_i32_0 = arith.constant 0 : i32
    return %arg0, %c0_i32 : i32, i32
  }
  func.func @transform_1(%arg0: i32) -> (i32, i32) {
    %c0_i32 = arith.constant 0 : i32
    %c0_i32_0 = arith.constant 0 : i32
    %c0_i32_1 = arith.constant 0 : i32
    return %c0_i32, %c0_i32_0 : i32, i32
  }
  func.func @transform_2(%arg0: i32) -> (i32, i32) {
    %c0_i32 = arith.constant 0 : i32
    %c0_i32_0 = arith.constant 0 : i32
    %c0_i32_1 = arith.constant 0 : i32
    return %c0_i32, %c0_i32_0 : i32, i32
  }
  func.func @transform_3(%arg0: i32) -> (i32, i32) {
    %c0_i32 = arith.constant 0 : i32
    %c0_i32_0 = arith.constant 0 : i32
    %c0_i32_1 = arith.constant 0 : i32
    return %c0_i32, %c0_i32_0 : i32, i32
  }
  func.func @transform_4(%arg0: i32) -> (i32, i32) {
    %c0_i32 = arith.constant 0 : i32
    %c0_i32_0 = arith.constant 0 : i32
    return %arg0, %c0_i32 : i32, i32
  }
  func.func @transform_5(%arg0: i32) -> (i32, i32, i32) {
    %c0_i32 = arith.constant 0 : i32
    %c0_i32_0 = arith.constant 0 : i32
    %c0_i32_1 = arith.constant 0 : i32
    return %arg0, %c0_i32, %c0_i32_0 : i32, i32, i32
  }
}

module attributes {stable_mosaic.version = 11 : i64} {
  func.func @_bn_add_relu_kernel(%arg0: i32, %arg1: memref<512x128xbf16, #tpu.memory_space<vmem>>, %arg2: memref<1x128xf32, #tpu.memory_space<vmem>>, %arg3: memref<1x128xf32, #tpu.memory_space<vmem>>, %arg4: memref<512x128xf32, #tpu.memory_space<vmem>>, %arg5: memref<512x128xf32, #tpu.memory_space<vmem>>) attributes {dimension_semantics = [#tpu.dimension_semantics<parallel>], iteration_bounds = array<i64: 1>, scalar_prefetch = 0 : i64, scratch_operands = 0 : i64, tpu.core_type = #tpu.core_type<tc>, window_params = [{transform_indices = @transform_0, window_bounds = array<i64: 512, 128>}, {pipeline_mode = #tpu.pipeline_mode<synchronous>, transform_indices = @transform_1, window_bounds = array<i64: 1, 128>}, {pipeline_mode = #tpu.pipeline_mode<synchronous>, transform_indices = @transform_2, window_bounds = array<i64: 1, 128>}, {transform_indices = @transform_3, window_bounds = array<i64: 512, 128>}, {transform_indices = @transform_4, window_bounds = array<i64: 512, 128>}]} {
    %c0 = arith.constant 0 : index
    %c0_0 = arith.constant 0 : index
    %0 = vector.load %arg1[%c0, %c0_0] : memref<512x128xbf16, #tpu.memory_space<vmem>>, vector<512x128xbf16>
    %1 = arith.extf %0 : vector<512x128xbf16> to vector<512x128xf32>
    %c0_1 = arith.constant 0 : index
    %c0_2 = arith.constant 0 : index
    %2 = vector.load %arg2[%c0_1, %c0_2] : memref<1x128xf32, #tpu.memory_space<vmem>>, vector<1x128xf32>
    %3 = vector.broadcast %2 : vector<1x128xf32> to vector<512x128xf32>
    %4 = arith.mulf %1, %3 : vector<512x128xf32>
    %c0_3 = arith.constant 0 : index
    %c0_4 = arith.constant 0 : index
    %5 = vector.load %arg3[%c0_3, %c0_4] : memref<1x128xf32, #tpu.memory_space<vmem>>, vector<1x128xf32>
    %6 = vector.broadcast %5 : vector<1x128xf32> to vector<512x128xf32>
    %7 = arith.addf %4, %6 : vector<512x128xf32>
    %c0_5 = arith.constant 0 : index
    %c0_6 = arith.constant 0 : index
    %8 = vector.load %arg4[%c0_5, %c0_6] : memref<512x128xf32, #tpu.memory_space<vmem>>, vector<512x128xf32>
    %9 = arith.addf %7, %8 : vector<512x128xf32>
    %cst = arith.constant 0.000000e+00 : f32
    %10 = vector.broadcast %cst : f32 to vector<512x128xf32>
    %11 = arith.maximumf %9, %10 : vector<512x128xf32>
    %c0_7 = arith.constant 0 : index
    %c0_8 = arith.constant 0 : index
    %12 = vector.load %arg5[%c0_7, %c0_8] : memref<512x128xf32, #tpu.memory_space<vmem>>, vector<512x128xf32>
    tpu.vector_store %arg5[%c0_7, %c0_8], %11 {strides = array<i32>} : memref<512x128xf32, #tpu.memory_space<vmem>>, vector<512x128xf32>,
    return
  }
  func.func @transform_0(%arg0: i32) -> (i32, i32) {
    %c0_i32 = arith.constant 0 : i32
    %c0_i32_0 = arith.constant 0 : i32
    return %arg0, %c0_i32 : i32, i32
  }
  func.func @transform_1(%arg0: i32) -> (i32, i32) {
    %c0_i32 = arith.constant 0 : i32
    %c0_i32_0 = arith.constant 0 : i32
    %c0_i32_1 = arith.constant 0 : i32
    return %c0_i32, %c0_i32_0 : i32, i32
  }
  func.func @transform_2(%arg0: i32) -> (i32, i32) {
    %c0_i32 = arith.constant 0 : i32
    %c0_i32_0 = arith.constant 0 : i32
    %c0_i32_1 = arith.constant 0 : i32
    return %c0_i32, %c0_i32_0 : i32, i32
  }
  func.func @transform_3(%arg0: i32) -> (i32, i32) {
    %c0_i32 = arith.constant 0 : i32
    %c0_i32_0 = arith.constant 0 : i32
    return %arg0, %c0_i32 : i32, i32
  }
  func.func @transform_4(%arg0: i32) -> (i32, i32) {
    %c0_i32 = arith.constant 0 : i32
    %c0_i32_0 = arith.constant 0 : i32
    return %arg0, %c0_i32 : i32, i32
  }
}

</mosaic_0001>

<bundles_post_ra>
// kernel: bottleneck_forward.4
= control target key start
LH: loop header
LB: loop body
LE: loop exit
PB: predicated region body
PF: predicated region fallthrough
CT: control target
= control target key end

     0   :  { %s1787_s1 = inlined_call_operand.vmem [shape: bf16[128,128], index: 1, kind: input, shape index: {}]   ;;  %s1788_s0 = inlined_call_operand.vmem [shape: bf16[512,128], index: 0, kind: input, shape index: {}]   ;;  %s1789_s2 = inlined_call_operand.vmem [shape: bf16[512,128], index: 2, kind: output, shape index: {0}]   ;;  %s1790_s3 = inlined_call_operand.vmem [shape: f32[1,2,128], index: 3, kind: output, shape index: {1}]  }
   0x1   :  { %v1041_v0 = vld [vmem:[%s1787_s1 + $0x38] sm:$0xff]  ;;  %v1040_v1 = vld [vmem:[%s1787_s1 + $0x30] sm:$0xff]  ;;  %v1039_v2 = vld [vmem:[%s1787_s1 + $0x28] sm:$0xff] }
   0x2   :  { %333 = vmatpush.bf16.msra.mxu0 %v1041_v0  ;;  %1233 = vmatpush.bf16.msra.mxu1 %v1041_v0  ;;  %v1038_v3 = vld [vmem:[%s1787_s1 + $0x20] sm:$0xff]  ;;  %v1037_v4 = vld [vmem:[%s1787_s1 + $0x18] sm:$0xff]  ;;  %v1036_v5 = vld [vmem:[%s1787_s1 + $0x10] sm:$0xff] }
   0x3   :  { %1234 = vmatpush.bf16.msra.mxu2 %v1041_v0  ;;  %1235 = vmatpush.bf16.msra.mxu3 %v1041_v0  ;;  %v1035_v6 = vld [vmem:[%s1787_s1 + $0x8] sm:$0xff]  ;;  %v1034_v7 = vld [vmem:[%s1787_s1] sm:$0xff]  ;;  %v1004_v13 = vld [vmem:[%s1788_s0 + $0x10] sm:$0xff] }
   0x4   :  { %v1002_v8 = vld [vmem:[%s1788_s0] sm:$0xff]  ;;  %v1003_v10 = vld [vmem:[%s1788_s0 + $0x8] sm:$0xff]  ;;  %v1012_v14 = vld [vmem:[%s1788_s0 + $0x50] sm:$0xff] }
   0x5   :  { %v1010_v9 = vld [vmem:[%s1788_s0 + $0x40] sm:$0xff]  ;;  %v1011_v11 = vld [vmem:[%s1788_s0 + $0x48] sm:$0xff]  ;;  %v1005_v16 = vld [vmem:[%s1788_s0 + $0x18] sm:$0xff] }
   0x6   :  { %334 = vmatpush.bf16.msra.mxu0 %v1040_v1  ;;  %1236 = vmatpush.bf16.msra.mxu1 %v1040_v1  ;;  %v1018_v12 = vld [vmem:[%s1788_s0 + $0x80] sm:$0xff]  ;;  %v1019_v15 = vld [vmem:[%s1788_s0 + $0x88] sm:$0xff]  ;;  %v1013_v17 = vld [vmem:[%s1788_s0 + $0x58] sm:$0xff] }
   0x7   :  { %1237 = vmatpush.bf16.msra.mxu2 %v1040_v1  ;;  %1238 = vmatpush.bf16.msra.mxu3 %v1040_v1  ;;  %v1020_v18 = vld [vmem:[%s1788_s0 + $0x90] sm:$0xff]  ;;  %v1026_v19 = vld [vmem:[%s1788_s0 + $0xc0] sm:$0xff]  ;;  %v1021_v22 = vld [vmem:[%s1788_s0 + $0x98] sm:$0xff] }
   0x8   :  { %v1006_v20 = vld [vmem:[%s1788_s0 + $0x20] sm:$0xff]  ;;  %v1027_v23 = vld [vmem:[%s1788_s0 + $0xc8] sm:$0xff]  ;;  %v1028_v27 = vld [vmem:[%s1788_s0 + $0xd0] sm:$0xff] }
   0x9   :  { %v1014_v21 = vld [vmem:[%s1788_s0 + $0x60] sm:$0xff]  ;;  %v1007_v24 = vld [vmem:[%s1788_s0 + $0x28] sm:$0xff]  ;;  %v1008_v28 = vld [vmem:[%s1788_s0 + $0x30] sm:$0xff] }
   0xa   :  { %335 = vmatpush.bf16.msra.mxu0 %v1039_v2  ;;  %1239 = vmatpush.bf16.msra.mxu1 %v1039_v2  ;;  %v1015_v25 = vld [vmem:[%s1788_s0 + $0x68] sm:$0xff]  ;;  %v1022_v26 = vld [vmem:[%s1788_s0 + $0xa0] sm:$0xff]  ;;  %v1016_v29 = vld [vmem:[%s1788_s0 + $0x70] sm:$0xff] }
   0xb   :  { %1240 = vmatpush.bf16.msra.mxu2 %v1039_v2  ;;  %1241 = vmatpush.bf16.msra.mxu3 %v1039_v2  ;;  %v1023_v30 = vld [vmem:[%s1788_s0 + $0xa8] sm:$0xff]  ;;  %v1029_v31 = vld [vmem:[%s1788_s0 + $0xd8] sm:$0xff]  ;;  %v1024_v34 = vld [vmem:[%s1788_s0 + $0xb0] sm:$0xff] }
   0xc   :  { %v1009_v32 = vld [vmem:[%s1788_s0 + $0x38] sm:$0xff]  ;;  %v1030_v35 = vld [vmem:[%s1788_s0 + $0xe0] sm:$0xff]  ;;  %v1031_v39 = vld [vmem:[%s1788_s0 + $0xe8] sm:$0xff] }
   0xd   :  { %v1017_v33 = vld [vmem:[%s1788_s0 + $0x78] sm:$0xff]  ;;  %v1032_v53 = vld [vmem:[%s1788_s0 + $0xf0] sm:$0xff] }
   0xe   :  { %336 = vmatpush.bf16.msra.mxu0 %v1038_v3  ;;  %1242 = vmatpush.bf16.msra.mxu1 %v1038_v3  ;;  %v1025_v38 = vld [vmem:[%s1788_s0 + $0xb8] sm:$0xff] }
   0xf   :  { %1243 = vmatpush.bf16.msra.mxu2 %v1038_v3  ;;  %1244 = vmatpush.bf16.msra.mxu3 %v1038_v3 }
  0x12   :  { %337 = vmatpush.bf16.msra.mxu0 %v1037_v4  ;;  %1245 = vmatpush.bf16.msra.mxu1 %v1037_v4 }
  0x13   :  { %1246 = vmatpush.bf16.msra.mxu2 %v1037_v4  ;;  %1247 = vmatpush.bf16.msra.mxu3 %v1037_v4 }
  0x16   :  { %338 = vmatpush.bf16.msra.mxu0 %v1036_v5  ;;  %1248 = vmatpush.bf16.msra.mxu1 %v1036_v5 }
  0x17   :  { %1249 = vmatpush.bf16.msra.mxu2 %v1036_v5  ;;  %1250 = vmatpush.bf16.msra.mxu3 %v1036_v5  ;;  %v1033_v5 = vld [vmem:[%s1788_s0 + $0xf8] sm:$0xff] }
  0x1a   :  { %339 = vmatpush.bf16.msra.mxu0 %v1035_v6  ;;  %1251 = vmatpush.bf16.msra.mxu1 %v1035_v6 }
  0x1b   :  { %1252 = vmatpush.bf16.msra.mxu2 %v1035_v6  ;;  %1253 = vmatpush.bf16.msra.mxu3 %v1035_v6 }
  0x1e   :  { %340 = vmatpush.bf16.msra.mxu0 %v1034_v7  ;;  %1254 = vmatpush.bf16.msra.mxu1 %v1034_v7 }
  0x1f   :  { %1255 = vmatpush.bf16.msra.mxu2 %v1034_v7  ;;  %1256 = vmatpush.bf16.msra.mxu3 %v1034_v7 }
  0x21   :  { %341 = vmatmul.bf16.vlgmr.msra.gmra.mxu0 %v1002_v8  ;;  %381 = vmatmul.bf16.vlgmr.msra.gmra.mxu1 %v1010_v9 }
  0x22   :  { %421 = vmatmul.bf16.vlgmr.msra.gmra.mxu2 %v1018_v12  ;;  %461 = vmatmul.bf16.vlgmr.msra.gmra.mxu3 %v1026_v19 }
  0x31   :  { %346 = vmatmul.bf16.gmra.mxu0 %v1003_v10  ;;  %386 = vmatmul.bf16.gmra.mxu1 %v1011_v11 }
  0x32   :  { %426 = vmatmul.bf16.gmra.mxu2 %v1019_v15  ;;  %466 = vmatmul.bf16.gmra.mxu3 %v1027_v23 }
  0x41   :  { %351 = vmatmul.bf16.gmra.mxu0 %v1004_v13  ;;  %391 = vmatmul.bf16.gmra.mxu1 %v1012_v14 }
  0x42   :  { %431 = vmatmul.bf16.gmra.mxu2 %v1020_v18  ;;  %471 = vmatmul.bf16.gmra.mxu3 %v1028_v27 }
  0x51   :  { %356 = vmatmul.bf16.gmra.mxu0 %v1005_v16  ;;  %396 = vmatmul.bf16.gmra.mxu1 %v1013_v17 }
  0x52   :  { %436 = vmatmul.bf16.gmra.mxu2 %v1021_v22  ;;  %476 = vmatmul.bf16.gmra.mxu3 %v1029_v31 }
  0x61   :  { %361 = vmatmul.bf16.gmra.mxu0 %v1006_v20  ;;  %401 = vmatmul.bf16.gmra.mxu1 %v1014_v21 }
  0x62   :  { %441 = vmatmul.bf16.gmra.mxu2 %v1022_v26  ;;  %481 = vmatmul.bf16.gmra.mxu3 %v1030_v35 }
  0x71   :  { %366 = vmatmul.bf16.gmra.mxu0 %v1007_v24  ;;  %406 = vmatmul.bf16.gmra.mxu1 %v1015_v25 }
  0x72   :  { %446 = vmatmul.bf16.gmra.mxu2 %v1023_v30  ;;  %486 = vmatmul.bf16.gmra.mxu3 %v1031_v39 }
  0x81   :  { %371 = vmatmul.bf16.gmra.mxu0 %v1008_v28  ;;  %411 = vmatmul.bf16.gmra.mxu1 %v1016_v29 }
  0x82   :  { %451 = vmatmul.bf16.gmra.mxu2 %v1024_v34  ;;  %491 = vmatmul.bf16.gmra.mxu3 %v1032_v53 }
  0x91   :  { %376 = vmatmul.bf16.gmra.mxu0 %v1009_v32  ;;  %416 = vmatmul.bf16.gmra.mxu1 %v1017_v33 }
  0x92   :  { %456 = vmatmul.bf16.gmra.mxu2 %v1025_v38  ;;  %496 = vmatmul.bf16.gmra.mxu3 %v1033_v5 }
  0x9e   :  { %v342_v36 = vpop.f32.mrf.mxu0  ;;  %v1385_v37 = vpop.f32.mrf.mxu1 }
  0x9f   :  { %v700_v40 = vmul.f32 %v342_v36, %v342_v36 }
  0xa5   :  { %v1412_v60 = vpop.f32.mrf.mxu2  ;;  %v1463_v20 = vpop.f32.mrf.mxu3 }
  0xa6   :  { %v344_v41 = vpop.f32.mrf.mxu0  ;;  %v1393_v42 = vpop.f32.mrf.mxu1 }
  0xa7   :  { %v1045_v43 = vpack.c.bf16 %v344_v41, %v342_v36  ;;  %v630_v44 = vadd.f32 %v344_v41, %v342_v36  ;;  %v701_v45 = vmul.f32 %v344_v41, %v344_v41  ;;  %v1085_v46 = vpack.c.bf16 %v1393_v42, %v1385_v37 }
  0xa9   :  { %1046 = vst [vmem:[%s1789_s2] sm:$0xff] %v1045_v43   ;;  %v764_v47 = vadd.f32 %v701_v45, %v700_v40 }
  0xaa   :  { %1209 = vst [vmem:[%s1789_s2 + $0x40] sm:$0xff] %v1085_v46  }
  0xad   :  { %v1424_v2 = vpop.f32.mrf.mxu2  ;;  %v1475_v24 = vpop.f32.mrf.mxu3 }
  0xae   :  { %v347_v48 = vpop.f32.mrf.mxu0  ;;  %v1403_v49 = vpop.f32.mrf.mxu1  ;;  %v1125_v3 = vpack.c.bf16 %v1424_v2, %v1412_v60  ;;  %v1165_v26 = vpack.c.bf16 %v1475_v24, %v1463_v20 }
  0xaf   :  { %v631_v50 = vadd.f32 %v630_v44, %v347_v48  ;;  %v702_v51 = vmul.f32 %v347_v48, %v347_v48 }
  0xb0   :  { %1217 = vst [vmem:[%s1789_s2 + $0x80] sm:$0xff] %v1125_v3  }
  0xb1   :  { %v765_v52 = vadd.f32 %v764_v47, %v702_v51  ;;  %1225 = vst [vmem:[%s1789_s2 + $0xc0] sm:$0xff] %v1165_v26  }
  0xb5   :  { %v1440_v10 = vpop.f32.mrf.mxu2  ;;  %v1493_v32 = vpop.f32.mrf.mxu3 }
  0xb6   :  { %v349_v54 = vpop.f32.mrf.mxu0  ;;  %v1408_v55 = vpop.f32.mrf.mxu1 }
  0xb7   :  { %v1050_v56 = vpack.c.bf16 %v349_v54, %v347_v48  ;;  %v632_v57 = vadd.f32 %v631_v50, %v349_v54  ;;  %v703_v58 = vmul.f32 %v349_v54, %v349_v54  ;;  %v1090_v59 = vpack.c.bf16 %v1408_v55, %v1403_v49 }
  0xb9   :  { %1202 = vst [vmem:[%s1789_s2 + $0x8] sm:$0xff] %v1050_v56   ;;  %v766_v61 = vadd.f32 %v765_v52, %v703_v58 }
  0xba   :  { %1210 = vst [vmem:[%s1789_s2 + $0x48] sm:$0xff] %v1090_v59  }
  0xbd   :  { %v1450_v13 = vpop.f32.mrf.mxu2  ;;  %v1505_v36 = vpop.f32.mrf.mxu3 }
  0xbe   :  { %v352_v62 = vpop.f32.mrf.mxu0  ;;  %v1420_v63 = vpop.f32.mrf.mxu1  ;;  %v1130_v14 = vpack.c.bf16 %v1450_v13, %v1440_v10  ;;  %v1170_v39 = vpack.c.bf16 %v1505_v36, %v1493_v32 }
  0xbf   :  { %v1422_v0 = vadd.f32 %v632_v57, %v352_v62  ;;  %v704_v1 = vmul.f32 %v352_v62, %v352_v62 }
  0xc0   :  { %1218 = vst [vmem:[%s1789_s2 + $0x88] sm:$0xff] %v1130_v14  }
  0xc1   :  { %v1428_v4 = vadd.f32 %v766_v61, %v704_v1  ;;  %1226 = vst [vmem:[%s1789_s2 + $0xc8] sm:$0xff] %v1170_v39  }
  0xc5   :  { %v1461_v19 = vpop.f32.mrf.mxu2  ;;  %v1523_v46 = vpop.f32.mrf.mxu3 }
  0xc6   :  { %v354_v6 = vpop.f32.mrf.mxu0  ;;  %v1436_v7 = vpop.f32.mrf.mxu1 }
  0xc7   :  { %v1055_v8 = vpack.c.bf16 %v354_v6, %v352_v62  ;;  %v1095_v9 = vpack.c.bf16 %v1436_v7, %v1420_v63  ;;  %v705_v52 = vmul.f32 %v354_v6, %v354_v6  ;;  %v634_v57 = vadd.f32 %v1422_v0, %v354_v6 }
  0xc9   :  { %1203 = vst [vmem:[%s1789_s2 + $0x10] sm:$0xff] %v1055_v8   ;;  %v768_v58 = vadd.f32 %v1428_v4, %v705_v52 }
  0xca   :  { %1211 = vst [vmem:[%s1789_s2 + $0x50] sm:$0xff] %v1095_v9  }
  0xcd   :  { %v1473_v23 = vpop.f32.mrf.mxu2  ;;  %v1535_v51 = vpop.f32.mrf.mxu3 }
  0xce   :  { %v357_v11 = vpop.f32.mrf.mxu0  ;;  %v1448_v12 = vpop.f32.mrf.mxu1  ;;  %v1135_v25 = vpack.c.bf16 %v1473_v23, %v1461_v19  ;;  %v1175_v54 = vpack.c.bf16 %v1535_v51, %v1523_v46 }
  0xcf   :  { %v706_v56 = vmul.f32 %v357_v11, %v357_v11  ;;  %v635_v61 = vadd.f32 %v634_v57, %v357_v11 }
  0xd0   :  { %1219 = vst [vmem:[%s1789_s2 + $0x90] sm:$0xff] %v1135_v25  }
  0xd1   :  { %1227 = vst [vmem:[%s1789_s2 + $0xd0] sm:$0xff] %v1175_v54   ;;  %v769_v62 = vadd.f32 %v768_v58, %v706_v56 }
  0xd5   :  { %v1491_v31 = vpop.f32.mrf.mxu2  ;;  %v1555_v0 = vpop.f32.mrf.mxu3 }
  0xd6   :  { %v359_v15 = vpop.f32.mrf.mxu0  ;;  %v1457_v16 = vpop.f32.mrf.mxu1 }
  0xd7   :  { %v1060_v17 = vpack.c.bf16 %v359_v15, %v357_v11  ;;  %v1100_v18 = vpack.c.bf16 %v1457_v16, %v1448_v12  ;;  %v707_v59 = vmul.f32 %v359_v15, %v359_v15  ;;  %v636_v8 = vadd.f32 %v635_v61, %v359_v15 }
  0xd9   :  { %1204 = vst [vmem:[%s1789_s2 + $0x18] sm:$0xff] %v1060_v17   ;;  %v770_v6 = vadd.f32 %v769_v62, %v707_v59 }
  0xda   :  { %1212 = vst [vmem:[%s1789_s2 + $0x58] sm:$0xff] %v1100_v18  }
  0xdd   :  { %v1503_v35 = vpop.f32.mrf.mxu2 }
  0xde   :  { %v362_v21 = vpop.f32.mrf.mxu0  ;;  %v1471_v22 = vpop.f32.mrf.mxu1  ;;  %v1140_v38 = vpack.c.bf16 %v1503_v35, %v1491_v31 }
  0xdf   :  { %v708_v1 = vmul.f32 %v362_v21, %v362_v21  ;;  %v637_v25 = vadd.f32 %v636_v8, %v362_v21 }
  0xe0   :  { %1220 = vst [vmem:[%s1789_s2 + $0x98] sm:$0xff] %v1140_v38  }
  0xe1   :  { %v771_v4 = vadd.f32 %v770_v6, %v708_v1 }
  0xe5   :  { %v1521_v45 = vpop.f32.mrf.mxu2 }
  0xe6   :  { %v364_v27 = vpop.f32.mrf.mxu0  ;;  %v1487_v28 = vpop.f32.mrf.mxu1 }
  0xe7   :  { %v1065_v29 = vpack.c.bf16 %v364_v27, %v362_v21  ;;  %v1105_v30 = vpack.c.bf16 %v1487_v28, %v1471_v22  ;;  %v709_v18 = vmul.f32 %v364_v27, %v364_v27  ;;  %v638_v15 = vadd.f32 %v637_v25, %v364_v27 }
  0xe9   :  { %1205 = vst [vmem:[%s1789_s2 + $0x20] sm:$0xff] %v1065_v29   ;;  %v772_v26 = vadd.f32 %v771_v4, %v709_v18 }
  0xea   :  { %1213 = vst [vmem:[%s1789_s2 + $0x60] sm:$0xff] %v1105_v30  }
  0xed   :  { %v1533_v50 = vpop.f32.mrf.mxu2 }
  0xee   :  { %v367_v33 = vpop.f32.mrf.mxu0  ;;  %v1501_v34 = vpop.f32.mrf.mxu1  ;;  %v1145_v53 = vpack.c.bf16 %v1533_v50, %v1521_v45 }
  0xef   :  { %v710_v11 = vmul.f32 %v367_v33, %v367_v33  ;;  %v639_v30 = vadd.f32 %v638_v15, %v367_v33 }
  0xf0   :  { %1221 = vst [vmem:[%s1789_s2 + $0xa0] sm:$0xff] %v1145_v53   ;;  %v1567_v53 = vpop.f32.mrf.mxu3 }
  0xf1   :  { %v773_v38 = vadd.f32 %v772_v26, %v710_v11  ;;  %v1180_v27 = vpack.c.bf16 %v1567_v53, %v1555_v0  ;;  %v717_v26 = vmul.f32 %v1393_v42, %v1393_v42 }
  0xf3   :  { %1228 = vst [vmem:[%s1789_s2 + $0xd8] sm:$0xff] %v1180_v27  }
  0xf5   :  { %v1553_v17 = vpop.f32.mrf.mxu2 }
  0xf6   :  { %v369_v40 = vpop.f32.mrf.mxu0  ;;  %v1517_v41 = vpop.f32.mrf.mxu1 }
  0xf7   :  { %v1070_v43 = vpack.c.bf16 %v369_v40, %v367_v33  ;;  %v1110_v44 = vpack.c.bf16 %v1517_v41, %v1501_v34  ;;  %v711_v29 = vmul.f32 %v369_v40, %v369_v40  ;;  %v640_v21 = vadd.f32 %v639_v30, %v369_v40 }
  0xf8   :  { %v1585_v4 = vpop.f32.mrf.mxu3 }
  0xf9   :  { %1206 = vst [vmem:[%s1789_s2 + $0x28] sm:$0xff] %v1070_v43   ;;  %v774_v54 = vadd.f32 %v773_v38, %v711_v29  ;;  %v718_v38 = vmul.f32 %v1403_v49, %v1403_v49 }
  0xfa   :  { %1214 = vst [vmem:[%s1789_s2 + $0x68] sm:$0xff] %v1110_v44  }
  0xfd   :  { %v1565_v52 = vpop.f32.mrf.mxu2 }
  0xfe   :  { %v372_v47 = vpop.f32.mrf.mxu0  ;;  %v1531_v48 = vpop.f32.mrf.mxu1  ;;  %v1150_v57 = vpack.c.bf16 %v1565_v52, %v1553_v17 }
  0xff   :  { %v712_v39 = vmul.f32 %v372_v47, %v372_v47  ;;  %v641_v58 = vadd.f32 %v640_v21, %v372_v47 }
 0x100   :  { %1222 = vst [vmem:[%s1789_s2 + $0xa8] sm:$0xff] %v1150_v57   ;;  %v1607_v57 = vpop.f32.mrf.mxu3 }
 0x101   :  { %v775_v33 = vadd.f32 %v774_v54, %v712_v39  ;;  %v1185_v27 = vpack.c.bf16 %v1607_v57, %v1585_v4 }
 0x103   :  { %1229 = vst [vmem:[%s1789_s2 + $0xe0] sm:$0xff] %v1185_v27  }
 0x105   :  { %v1583_v25 = vpop.f32.mrf.mxu2 }
 0x106   :  { %v374_v3 = vpop.f32.mrf.mxu0  ;;  %v1549_v5 = vpop.f32.mrf.mxu1 }
 0x107   :  { %v1075_v9 = vpack.c.bf16 %v374_v3, %v372_v47  ;;  %v1115_v14 = vpack.c.bf16 %v1549_v5, %v1531_v48  ;;  %v713_v56 = vmul.f32 %v374_v3, %v374_v3  ;;  %v642_v40 = vadd.f32 %v641_v58, %v374_v3 }
 0x108   :  { %v716_v3 = vmul.f32 %v1385_v37, %v1385_v37  ;;  %v729_v27 = vmul.f32 %v1549_v5, %v1549_v5 }
 0x109   :  { %1207 = vst [vmem:[%s1789_s2 + $0x30] sm:$0xff] %v1075_v9   ;;  %v776_v61 = vadd.f32 %v775_v33, %v713_v56 }
 0x10a   :  { %1215 = vst [vmem:[%s1789_s2 + $0x70] sm:$0xff] %v1115_v14  }
 0x10d   :  { %v1605_v56 = vpop.f32.mrf.mxu2 }
 0x10e   :  { %v377_v43 = vpop.f32.mrf.mxu0  ;;  %v1563_v44 = vpop.f32.mrf.mxu1 }
 0x10f   :  { %v714_v59 = vmul.f32 %v377_v43, %v377_v43  ;;  %v643_v62 = vadd.f32 %v642_v40, %v377_v43 }
 0x111   :  { %v777_v1 = vadd.f32 %v776_v61, %v714_v59  ;;  %v722_v61 = vmul.f32 %v1448_v12, %v1448_v12 }
 0x116   :  { %v379_v8 = vpop.f32.mrf.mxu0  ;;  %v1579_v9 = vpop.f32.mrf.mxu1 }
 0x117   :  { %v1080_v14 = vpack.c.bf16 %v379_v8, %v377_v43  ;;  %v644_v6 = vadd.f32 %v643_v62, %v379_v8  ;;  %v715_v47 = vmul.f32 %v379_v8, %v379_v8  ;;  %v1120_v18 = vpack.c.bf16 %v1579_v9, %v1563_v44 }
 0x119   :  { %1208 = vst [vmem:[%s1789_s2 + $0x38] sm:$0xff] %v1080_v14   ;;  %v645_v11 = vadd.f32 %v644_v6, %v1385_v37  ;;  %v778_v15 = vadd.f32 %v777_v1, %v715_v47  ;;  %v719_v37 = vmul.f32 %v1408_v55, %v1408_v55  ;;  %v723_v1 = vmul.f32 %v1457_v16, %v1457_v16  ;;  %v1631_v6 = vpop.f32.mrf.mxu2 }
 0x11a   :  { %1216 = vst [vmem:[%s1789_s2 + $0x78] sm:$0xff] %v1120_v18   ;;  %v724_v47 = vmul.f32 %v1471_v22, %v1471_v22 }
 0x11b   :  { %v646_v29 = vadd.f32 %v645_v11, %v1393_v42  ;;  %v779_v30 = vadd.f32 %v778_v15, %v716_v3  ;;  %v1155_v42 = vpack.c.bf16 %v1605_v56, %v1583_v25  ;;  %v725_v11 = vmul.f32 %v1487_v28, %v1487_v28 }
 0x11d   :  { %v647_v39 = vadd.f32 %v646_v29, %v1403_v49  ;;  %v780_v43 = vadd.f32 %v779_v30, %v717_v26  ;;  %v720_v49 = vmul.f32 %v1420_v63, %v1420_v63  ;;  %1223 = vst [vmem:[%s1789_s2 + $0xb0] sm:$0xff] %v1155_v42   ;;  %v727_v30 = vmul.f32 %v1517_v41, %v1517_v41 }
 0x11f   :  { %v648_v21 = vadd.f32 %v647_v39, %v1408_v55  ;;  %v781_v54 = vadd.f32 %v780_v43, %v718_v38  ;;  %v721_v55 = vmul.f32 %v1436_v7, %v1436_v7 }
 0x121   :  { %v649_v58 = vadd.f32 %v648_v21, %v1420_v63  ;;  %v782_v33 = vadd.f32 %v781_v54, %v719_v37 }
 0x123   :  { %v650_v59 = vadd.f32 %v649_v58, %v1436_v7  ;;  %v783_v40 = vadd.f32 %v782_v33, %v720_v49  ;;  %v1633_v7 = vpop.f32.mrf.mxu3 }
 0x125   :  { %v784_v62 = vadd.f32 %v783_v40, %v721_v55  ;;  %v651_v63 = vadd.f32 %v650_v59, %v1448_v12  ;;  %v731_v59 = vmul.f32 %v1579_v9, %v1579_v9 }
 0x127   :  { %v652_v8 = vadd.f32 %v651_v63, %v1457_v16  ;;  %v785_v14 = vadd.f32 %v784_v62, %v722_v61  ;;  %v726_v16 = vmul.f32 %v1501_v34, %v1501_v34  ;;  %v733_v63 = vmul.f32 %v1424_v2, %v1424_v2 }
 0x129   :  { %v653_v18 = vadd.f32 %v652_v8, %v1471_v22  ;;  %v786_v3 = vadd.f32 %v785_v14, %v723_v1  ;;  %v1647_v22 = vpop.f32.mrf.mxu2  ;;  %v734_v8 = vmul.f32 %v1440_v10, %v1440_v10 }
 0x12b   :  { %v654_v12 = vadd.f32 %v653_v18, %v1487_v28  ;;  %v787_v15 = vadd.f32 %v786_v3, %v724_v47  ;;  %v1649_v43 = vpop.f32.mrf.mxu3  ;;  %v1160_v28 = vpack.c.bf16 %v1647_v22, %v1631_v6  ;;  %v735_v47 = vmul.f32 %v1450_v13, %v1450_v13 }
 0x12c   :  { %v1190_v37 = vpack.c.bf16 %v1649_v43, %v1633_v7 }
 0x12d   :  { %v655_v26 = vadd.f32 %v654_v12, %v1501_v34  ;;  %v788_v29 = vadd.f32 %v787_v15, %v725_v11  ;;  %v728_v34 = vmul.f32 %v1531_v48, %v1531_v48  ;;  %1224 = vst [vmem:[%s1789_s2 + $0xb8] sm:$0xff] %v1160_v28  }
 0x12e   :  { %1230 = vst [vmem:[%s1789_s2 + $0xe8] sm:$0xff] %v1190_v37   ;;  %v740_v37 = vmul.f32 %v1521_v45, %v1521_v45 }
 0x12f   :  { %v656_v38 = vadd.f32 %v655_v26, %v1517_v41  ;;  %v789_v39 = vadd.f32 %v788_v29, %v726_v16  ;;  %v738_v26 = vmul.f32 %v1491_v31, %v1491_v31 }
 0x131   :  { %v657_v21 = vadd.f32 %v656_v38, %v1531_v48  ;;  %v790_v54 = vadd.f32 %v789_v39, %v727_v30  ;;  %v730_v48 = vmul.f32 %v1563_v44, %v1563_v44 }
 0x133   :  { %v791_v41 = vadd.f32 %v790_v54, %v728_v34  ;;  %v658_v42 = vadd.f32 %v657_v21, %v1549_v5  ;;  %v1673_v40 = vpop.f32.mrf.mxu3  ;;  %v732_v5 = vmul.f32 %v1412_v60, %v1412_v60  ;;  %v741_v34 = vmul.f32 %v1533_v50, %v1533_v50 }
 0x135   :  { %v792_v49 = vadd.f32 %v791_v41, %v729_v27  ;;  %v659_v58 = vadd.f32 %v658_v42, %v1563_v44  ;;  %v742_v41 = vmul.f32 %v1553_v17, %v1553_v17 }
 0x137   :  { %v793_v33 = vadd.f32 %v792_v49, %v730_v48  ;;  %v660_v55 = vadd.f32 %v659_v58, %v1579_v9  ;;  %v743_v49 = vmul.f32 %v1565_v52, %v1565_v52 }
 0x139   :  { %v661_v61 = vadd.f32 %v660_v55, %v1412_v60  ;;  %v794_v62 = vadd.f32 %v793_v33, %v731_v59 }
 0x13b   :  { %v662_v1 = vadd.f32 %v661_v61, %v1424_v2  ;;  %v795_v44 = vadd.f32 %v794_v62, %v732_v5  ;;  %v1687_v60 = vpop.f32.mrf.mxu3  ;;  %v736_v2 = vmul.f32 %v1461_v19, %v1461_v19  ;;  %v746_v62 = vmul.f32 %v1631_v6, %v1631_v6 }
 0x13c   :  { %v1195_v11 = vpack.c.bf16 %v1687_v60, %v1673_v40 }
 0x13d   :  { %v663_v14 = vadd.f32 %v662_v1, %v1440_v10  ;;  %v796_v9 = vadd.f32 %v795_v44, %v733_v63  ;;  %v737_v10 = vmul.f32 %v1473_v23, %v1473_v23  ;;  %v748_v44 = vmul.f32 %v1463_v20, %v1463_v20 }
 0x13e   :  { %1231 = vst [vmem:[%s1789_s2 + $0xf0] sm:$0xff] %v1195_v11  }
 0x13f   :  { %v664_v18 = vadd.f32 %v663_v14, %v1450_v13  ;;  %v797_v3 = vadd.f32 %v796_v9, %v734_v8 }
 0x141   :  { %v665_v12 = vadd.f32 %v664_v18, %v1461_v19  ;;  %v798_v15 = vadd.f32 %v797_v3, %v735_v47  ;;  %v739_v19 = vmul.f32 %v1503_v35, %v1503_v35 }
 0x143   :  { %v666_v13 = vadd.f32 %v665_v12, %v1473_v23  ;;  %v799_v16 = vadd.f32 %v798_v15, %v736_v2  ;;  %v1706_v28 = vpop.f32.mrf.mxu3 }
 0x145   :  { %v800_v29 = vadd.f32 %v799_v16, %v737_v10  ;;  %v667_v30 = vadd.f32 %v666_v13, %v1491_v31 }
 0x147   :  { %v668_v38 = vadd.f32 %v667_v30, %v1503_v35  ;;  %v801_v39 = vadd.f32 %v800_v29, %v738_v26 }
 0x149   :  { %v669_v23 = vadd.f32 %v668_v38, %v1521_v45  ;;  %v802_v21 = vadd.f32 %v801_v39, %v739_v19 }
 0x14b   :  { %v670_v54 = vadd.f32 %v669_v23, %v1533_v50  ;;  %v803_v31 = vadd.f32 %v802_v21, %v740_v37  ;;  %v499_v45 = vpop.f32.mrf.mxu3  ;;  %v744_v50 = vmul.f32 %v1583_v25, %v1583_v25 }
 0x14c   :  { %v1200_v48 = vpack.c.bf16 %v499_v45, %v1706_v28 }
 0x14d   :  { %v671_v35 = vadd.f32 %v670_v54, %v1553_v17  ;;  %v804_v42 = vadd.f32 %v803_v31, %v741_v34  ;;  %v759_v34 = vmul.f32 %v1649_v43, %v1649_v43 }
 0x14e   :  { %1232 = vst [vmem:[%s1789_s2 + $0xf8] sm:$0xff] %v1200_v48   ;;  %v763_v48 = vmul.f32 %v499_v45, %v499_v45 }
 0x14f   :  { %v672_v27 = vadd.f32 %v671_v35, %v1565_v52  ;;  %v805_v58 = vadd.f32 %v804_v42, %v742_v41  ;;  %v745_v52 = vmul.f32 %v1605_v56, %v1605_v56  ;;  %v760_v41 = vmul.f32 %v1673_v40, %v1673_v40 }
 0x150   :  { %v761_v42 = vmul.f32 %v1687_v60, %v1687_v60 }
 0x151   :  { %v806_v33 = vadd.f32 %v805_v58, %v743_v49  ;;  %v673_v55 = vadd.f32 %v672_v27, %v1583_v25  ;;  %v747_v25 = vmul.f32 %v1647_v22, %v1647_v22  ;;  %v762_v49 = vmul.f32 %v1706_v28, %v1706_v28 }
 0x153   :  { %v807_v17 = vadd.f32 %v806_v33, %v744_v50  ;;  %v674_v59 = vadd.f32 %v673_v55, %v1605_v56  ;;  %v749_v56 = vmul.f32 %v1475_v24, %v1475_v24 }
 0x155   :  { %v808_v5 = vadd.f32 %v807_v17, %v745_v52  ;;  %v675_v61 = vadd.f32 %v674_v59, %v1631_v6  ;;  %v750_v6 = vmul.f32 %v1493_v32, %v1493_v32 }
 0x157   :  { %v809_v63 = vadd.f32 %v808_v5, %v746_v62  ;;  %v676_v1 = vadd.f32 %v675_v61, %v1647_v22  ;;  %v751_v22 = vmul.f32 %v1505_v36, %v1505_v36 }
 0x159   :  { %v677_v8 = vadd.f32 %v676_v1, %v1463_v20  ;;  %v810_v14 = vadd.f32 %v809_v63, %v747_v25  ;;  %v752_v20 = vmul.f32 %v1523_v46, %v1523_v46 }
 0x15b   :  { %v678_v9 = vadd.f32 %v677_v8, %v1475_v24  ;;  %v811_v47 = vadd.f32 %v810_v14, %v748_v44  ;;  %v753_v24 = vmul.f32 %v1535_v51, %v1535_v51 }
 0x15d   :  { %v679_v18 = vadd.f32 %v678_v9, %v1493_v32  ;;  %v812_v3 = vadd.f32 %v811_v47, %v749_v56  ;;  %v754_v32 = vmul.f32 %v1555_v0, %v1555_v0 }
 0x15f   :  { %v680_v11 = vadd.f32 %v679_v18, %v1505_v36  ;;  %v813_v2 = vadd.f32 %v812_v3, %v750_v6  ;;  %v755_v36 = vmul.f32 %v1567_v53, %v1567_v53 }
 0x161   :  { %v681_v12 = vadd.f32 %v680_v11, %v1523_v46  ;;  %v814_v15 = vadd.f32 %v813_v2, %v751_v22  ;;  %v756_v46 = vmul.f32 %v1585_v4, %v1585_v4 }
 0x163   :  { %v682_v10 = vadd.f32 %v681_v12, %v1535_v51  ;;  %v815_v13 = vadd.f32 %v814_v15, %v752_v20  ;;  %v757_v51 = vmul.f32 %v1607_v57, %v1607_v57 }
 0x165   :  { %v816_v16 = vadd.f32 %v815_v13, %v753_v24  ;;  %v683_v26 = vadd.f32 %v682_v10, %v1555_v0  ;;  %v758_v0 = vmul.f32 %v1633_v7, %v1633_v7 }
 0x167   :  { %v684_v29 = vadd.f32 %v683_v26, %v1567_v53  ;;  %v817_v30 = vadd.f32 %v816_v16, %v754_v32 }
 0x169   :  { %v685_v19 = vadd.f32 %v684_v29, %v1585_v4  ;;  %v818_v38 = vadd.f32 %v817_v30, %v755_v36 }
 0x16b   :  { %v686_v39 = vadd.f32 %v685_v19, %v1607_v57  ;;  %v819_v37 = vadd.f32 %v818_v38, %v756_v46 }
 0x16d   :  { %v687_v23 = vadd.f32 %v686_v39, %v1633_v7  ;;  %v820_v21 = vadd.f32 %v819_v37, %v757_v51 }
 0x16f   :  { %v688_v53 = vadd.f32 %v687_v23, %v1649_v43  ;;  %v821_v54 = vadd.f32 %v820_v21, %v758_v0 }
 0x171   :  { %v822_v4 = vadd.f32 %v821_v54, %v759_v34  ;;  %v689_v31 = vadd.f32 %v688_v53, %v1673_v40 }
 0x173   :  { %v823_v57 = vadd.f32 %v822_v4, %v760_v41  ;;  %v690_v35 = vadd.f32 %v689_v31, %v1687_v60 }
 0x175   :  { %v824_v7 = vadd.f32 %v823_v57, %v761_v42  ;;  %v691_v27 = vadd.f32 %v690_v35, %v1706_v28 }
 0x177   :  { %v825_v43 = vadd.f32 %v824_v7, %v762_v49  ;;  %v692_v58 = vadd.f32 %v691_v27, %v499_v45 }
 0x179   :  { %v693_v33 = vrot.slane %v692_v58, 4  ;;  %v826_v55 = vadd.f32 %v825_v43, %v763_v48 }
 0x17b   :  { %v694_v50 = vadd.f32 %v693_v33, %v692_v58  ;;  %v827_v17 = vrot.slane %v826_v55, 4 }
 0x17d   :  { %v695_v40 = vrot.slane %v694_v50, 2  ;;  %v828_v59 = vadd.f32 %v827_v17, %v826_v55 }
 0x17f   :  { %v696_v52 = vadd.f32 %v695_v40, %v694_v50  ;;  %v829_v5 = vrot.slane %v828_v59, 2 }
 0x181   :  { %v697_v61 = vrot.slane %v696_v52, 1  ;;  %v830_v62 = vadd.f32 %v829_v5, %v828_v59 }
 0x183   :  { %v698_v60 = vadd.f32 %v697_v61, %v696_v52  ;;  %v831_v63 = vrot.slane %v830_v62, 1 }
 0x185   :  { %699 = vst [vmem:[%s1790_s3] sm:$0x1] %v698_v60  ;;  %v832_v28 = vadd.f32 %v831_v63, %v830_v62 }
 0x187   :  { %833 = vst [vmem:[%s1790_s3 + $0x1] sm:$0x1] %v832_v28 }

// kernel: bottleneck_forward.6
= control target key start
LH: loop header
LB: loop body
LE: loop exit
PB: predicated region body
PF: predicated region fallthrough
CT: control target
= control target key end

     0   :  { %s2046_s3 = inlined_call_operand.vmem [shape: bf16[128,128], index: 3, kind: input, shape index: {}]   ;;  %s2047_s1 = inlined_call_operand.vmem [shape: f32[1,128], index: 1, kind: input, shape index: {}]   ;;  %s2048_s2 = inlined_call_operand.vmem [shape: f32[1,128], index: 2, kind: input, shape index: {}]   ;;  %s2049_s0 = inlined_call_operand.vmem [shape: bf16[512,128], index: 0, kind: input, shape index: {}]   ;;  %s2050_s4 = inlined_call_operand.vmem [shape: bf16[512,128], index: 4, kind: output, shape index: {0}]   ;;  %s2051_s5 = inlined_call_operand.vmem [shape: f32[1,2,128], index: 5, kind: output, shape index: {1}]  }
   0x1   :  { %v991_v0 = vld [vmem:[%s2046_s3 + $0x38] sm:$0xff]  ;;  %v990_v1 = vld [vmem:[%s2046_s3 + $0x30] sm:$0xff]  ;;  %v989_v2 = vld [vmem:[%s2046_s3 + $0x28] sm:$0xff] }
   0x2   :  { %443 = vmatpush.bf16.msra.mxu0 %v991_v0  ;;  %1342 = vmatpush.bf16.msra.mxu1 %v991_v0  ;;  %v988_v3 = vld [vmem:[%s2046_s3 + $0x20] sm:$0xff]  ;;  %v987_v8 = vld [vmem:[%s2046_s3 + $0x18] sm:$0xff]  ;;  %v986_v17 = vld [vmem:[%s2046_s3 + $0x10] sm:$0xff] }
   0x3   :  { %1343 = vmatpush.bf16.msra.mxu2 %v991_v0  ;;  %1344 = vmatpush.bf16.msra.mxu3 %v991_v0  ;;  %v993_v4 = vld [vmem:[%s2049_s0] sm:$0xff]   ;;  %v985_v22 = vld [vmem:[%s2046_s3 + $0x8] sm:$0xff]  ;;  %v1281_v47 = vld [vmem:[%s2049_s0 + $0x10] sm:$0xff]  }
   0x4   :  { %v994_v5 = vunpack.c.l.bf16 %v993_v4  ;;  %v995_v6 = vunpack.c.h.bf16 %v993_v4  ;;  %v1416_v7 = vld [vmem:[%s2047_s1] ss:$0 sm:$0xff]  ;;  %v1280_v25 = vld [vmem:[%s2049_s0 + $0x8] sm:$0xff]   ;;  %v1002_v54 = vunpack.c.l.bf16 %v1281_v47  ;;  %v1003_v55 = vunpack.c.h.bf16 %v1281_v47  ;;  %v1289_v60 = vld [vmem:[%s2049_s0 + $0x50] sm:$0xff]  }
   0x5   :  { %v1287_v9 = vld [vmem:[%s2049_s0 + $0x40] sm:$0xff]   ;;  %v998_v29 = vunpack.c.l.bf16 %v1280_v25  ;;  %v999_v30 = vunpack.c.h.bf16 %v1280_v25  ;;  %v1288_v33 = vld [vmem:[%s2049_s0 + $0x48] sm:$0xff]   ;;  %v1034_v63 = vunpack.c.l.bf16 %v1289_v60  ;;  %v1035_v0 = vunpack.c.h.bf16 %v1289_v60 }
   0x6   :  { %444 = vmatpush.bf16.msra.mxu0 %v990_v1  ;;  %1345 = vmatpush.bf16.msra.mxu1 %v990_v1  ;;  %v1026_v10 = vunpack.c.l.bf16 %v1287_v9  ;;  %v1027_v11 = vunpack.c.h.bf16 %v1287_v9  ;;  %v151_v12 = vmul.f32 %v1416_v7, %v994_v5  ;;  %v152_v13 = vmul.f32 %v1416_v7, %v995_v6  ;;  %v1429_v14 = vld [vmem:[%s2048_s2] ss:$0 sm:$0xff] }
   0x7   :  { %1346 = vmatpush.bf16.msra.mxu2 %v990_v1  ;;  %1347 = vmatpush.bf16.msra.mxu3 %v990_v1  ;;  %v984_v28 = vld [vmem:[%s2046_s3] sm:$0xff]  ;;  %v1030_v34 = vunpack.c.l.bf16 %v1288_v33  ;;  %v1031_v35 = vunpack.c.h.bf16 %v1288_v33  ;;  %v153_v36 = vmul.f32 %v1416_v7, %v998_v29  ;;  %v154_v37 = vmul.f32 %v1416_v7, %v999_v30 }
   0x8   :  { %v167_v15 = vmul.f32 %v1416_v7, %v1026_v10  ;;  %v168_v16 = vmul.f32 %v1416_v7, %v1027_v11  ;;  %v219_v18 = vadd.f32 %v1429_v14, %v151_v12  ;;  %v220_v19 = vadd.f32 %v1429_v14, %v152_v13  ;;  %v1295_v46 = vld [vmem:[%s2049_s0 + $0x80] sm:$0xff]   ;;  %v1296_v13 = vld [vmem:[%s2049_s0 + $0x88] sm:$0xff]  }
   0x9   :  { %v169_v38 = vmul.f32 %v1416_v7, %v1030_v34  ;;  %v170_v39 = vmul.f32 %v1416_v7, %v1031_v35  ;;  %v221_v40 = vadd.f32 %v1429_v14, %v153_v36  ;;  %v222_v41 = vadd.f32 %v1429_v14, %v154_v37  ;;  %v1303_v47 = vld [vmem:[%s2049_s0 + $0xc0] sm:$0xff]  }
   0xa   :  { %445 = vmatpush.bf16.msra.mxu0 %v989_v2  ;;  %1348 = vmatpush.bf16.msra.mxu1 %v989_v2  ;;  %v235_v20 = vadd.f32 %v1429_v14, %v167_v15  ;;  %v236_v21 = vadd.f32 %v1429_v14, %v168_v16  ;;  %v283_v23 = vmax.f32 %v219_v18, 0.0  ;;  %v284_v24 = vmax.f32 %v220_v19, 0.0  ;;  %v1282_v15 = vld [vmem:[%s2049_s0 + $0x18] sm:$0xff]  }
   0xb   :  { %1349 = vmatpush.bf16.msra.mxu2 %v989_v2  ;;  %1350 = vmatpush.bf16.msra.mxu3 %v989_v2  ;;  %v237_v42 = vadd.f32 %v1429_v14, %v169_v38  ;;  %v238_v43 = vadd.f32 %v1429_v14, %v170_v39  ;;  %v285_v44 = vmax.f32 %v221_v40, 0.0  ;;  %v286_v45 = vmax.f32 %v222_v41, 0.0 }
   0xc   :  { %v299_v26 = vmax.f32 %v235_v20, 0.0  ;;  %v300_v27 = vmax.f32 %v236_v21, 0.0  ;;  %v347_v31 = vpack.c.bf16 %v284_v24, %v283_v23  ;;  %v1058_v50 = vunpack.c.l.bf16 %v1295_v46 }
   0xd   :  { %v301_v48 = vmax.f32 %v237_v42, 0.0  ;;  %v302_v49 = vmax.f32 %v238_v43, 0.0  ;;  %v1059_v51 = vunpack.c.h.bf16 %v1295_v46  ;;  %v348_v56 = vpack.c.bf16 %v286_v45, %v285_v44  ;;  %v1297_v46 = vld [vmem:[%s2049_s0 + $0x90] sm:$0xff]  }
   0xe   :  { %446 = vmatpush.bf16.msra.mxu0 %v988_v3  ;;  %1351 = vmatpush.bf16.msra.mxu1 %v988_v3  ;;  %v355_v32 = vpack.c.bf16 %v300_v27, %v299_v26  ;;  %v183_v52 = vmul.f32 %v1416_v7, %v1058_v50  ;;  %v155_v1 = vmul.f32 %v1416_v7, %v1002_v54  ;;  %v1062_v18 = vunpack.c.l.bf16 %v1296_v13 }
   0xf   :  { %1352 = vmatpush.bf16.msra.mxu2 %v988_v3  ;;  %1353 = vmatpush.bf16.msra.mxu3 %v988_v3  ;;  %v184_v53 = vmul.f32 %v1416_v7, %v1059_v51  ;;  %v356_v57 = vpack.c.bf16 %v302_v49, %v301_v48  ;;  %v156_v2 = vmul.f32 %v1416_v7, %v1003_v55  ;;  %v1063_v19 = vunpack.c.h.bf16 %v1296_v13  ;;  %v1283_v48 = vld [vmem:[%s2049_s0 + $0x20] sm:$0xff]  }
  0x10   :  { %v251_v58 = vadd.f32 %v1429_v14, %v183_v52  ;;  %v171_v4 = vmul.f32 %v1416_v7, %v1034_v63  ;;  %v172_v5 = vmul.f32 %v1416_v7, %v1035_v0  ;;  %v223_v6 = vadd.f32 %v1429_v14, %v155_v1  ;;  %v1291_v1 = vld [vmem:[%s2049_s0 + $0x60] sm:$0xff]  }
  0x11   :  { %v252_v59 = vadd.f32 %v1429_v14, %v184_v53  ;;  %v185_v20 = vmul.f32 %v1416_v7, %v1062_v18  ;;  %v186_v21 = vmul.f32 %v1416_v7, %v1063_v19  ;;  %v1007_v23 = vunpack.c.h.bf16 %v1282_v15 }
  0x12   :  { %447 = vmatpush.bf16.msra.mxu0 %v987_v8  ;;  %1354 = vmatpush.bf16.msra.mxu1 %v987_v8  ;;  %v315_v61 = vmax.f32 %v251_v58, 0.0  ;;  %v239_v9 = vadd.f32 %v1429_v14, %v171_v4  ;;  %v240_v10 = vadd.f32 %v1429_v14, %v172_v5  ;;  %v287_v11 = vmax.f32 %v223_v6, 0.0 }
  0x13   :  { %1355 = vmatpush.bf16.msra.mxu2 %v987_v8  ;;  %1356 = vmatpush.bf16.msra.mxu3 %v987_v8  ;;  %v316_v62 = vmax.f32 %v252_v59, 0.0  ;;  %v224_v8 = vadd.f32 %v1429_v14, %v156_v2  ;;  %v253_v26 = vadd.f32 %v1429_v14, %v185_v20  ;;  %v254_v27 = vadd.f32 %v1429_v14, %v186_v21 }
  0x14   :  { %v303_v16 = vmax.f32 %v239_v9, 0.0  ;;  %v158_v34 = vmul.f32 %v1416_v7, %v1007_v23  ;;  %v1066_v49 = vunpack.c.l.bf16 %v1297_v46  ;;  %v1067_v50 = vunpack.c.h.bf16 %v1297_v46 }
  0x15   :  { %v363_v3 = vpack.c.bf16 %v316_v62, %v315_v61  ;;  %v288_v12 = vmax.f32 %v224_v8, 0.0  ;;  %v317_v29 = vmax.f32 %v253_v26, 0.0  ;;  %v318_v30 = vmax.f32 %v254_v27, 0.0  ;;  %v1284_v26 = vld [vmem:[%s2049_s0 + $0x28] sm:$0xff]  }
  0x16   :  { %448 = vmatpush.bf16.msra.mxu0 %v986_v17  ;;  %1357 = vmatpush.bf16.msra.mxu1 %v986_v17  ;;  %v226_v39 = vadd.f32 %v1429_v14, %v158_v34  ;;  %v1090_v51 = vunpack.c.l.bf16 %v1303_v47  ;;  %v1091_v52 = vunpack.c.h.bf16 %v1303_v47  ;;  %v187_v53 = vmul.f32 %v1416_v7, %v1066_v49 }
  0x17   :  { %1358 = vmatpush.bf16.msra.mxu2 %v986_v17  ;;  %1359 = vmatpush.bf16.msra.mxu3 %v986_v17  ;;  %v304_v17 = vmax.f32 %v240_v10, 0.0  ;;  %v349_v24 = vpack.c.bf16 %v288_v12, %v287_v11  ;;  %v364_v35 = vpack.c.bf16 %v318_v30, %v317_v29  ;;  %v188_v54 = vmul.f32 %v1416_v7, %v1067_v50 }
  0x18   :  { %v290_v43 = vmax.f32 %v226_v39, 0.0  ;;  %v199_v55 = vmul.f32 %v1416_v7, %v1090_v51  ;;  %v1010_v58 = vunpack.c.l.bf16 %v1283_v48  ;;  %v1011_v59 = vunpack.c.h.bf16 %v1283_v48 }
  0x19   :  { %v357_v25 = vpack.c.bf16 %v304_v17, %v303_v16  ;;  %v255_v61 = vadd.f32 %v1429_v14, %v187_v53  ;;  %v256_v62 = vadd.f32 %v1429_v14, %v188_v54  ;;  %v1042_v9 = vunpack.c.l.bf16 %v1291_v1 }
  0x1a   :  { %449 = vmatpush.bf16.msra.mxu0 %v985_v22  ;;  %1360 = vmatpush.bf16.msra.mxu1 %v985_v22  ;;  %v267_v63 = vadd.f32 %v1429_v14, %v199_v55  ;;  %v159_v6 = vmul.f32 %v1416_v7, %v1010_v58  ;;  %v160_v8 = vmul.f32 %v1416_v7, %v1011_v59  ;;  %v1043_v10 = vunpack.c.h.bf16 %v1291_v1  ;;  %v1305_v1 = vld [vmem:[%s2049_s0 + $0xd0] sm:$0xff]  }
  0x1b   :  { %1361 = vmatpush.bf16.msra.mxu2 %v985_v22  ;;  %1362 = vmatpush.bf16.msra.mxu3 %v985_v22  ;;  %v1006_v22 = vunpack.c.l.bf16 %v1282_v15  ;;  %v319_v2 = vmax.f32 %v255_v61, 0.0  ;;  %v175_v13 = vmul.f32 %v1416_v7, %v1042_v9 }
  0x1c   :  { %v331_v4 = vmax.f32 %v267_v63, 0.0  ;;  %v176_v15 = vmul.f32 %v1416_v7, %v1043_v10  ;;  %v227_v16 = vadd.f32 %v1429_v14, %v159_v6  ;;  %v228_v17 = vadd.f32 %v1429_v14, %v160_v8 }
  0x1d   :  { %v157_v33 = vmul.f32 %v1416_v7, %v1006_v22  ;;  %v243_v18 = vadd.f32 %v1429_v14, %v175_v13  ;;  %v1099_v6 = vunpack.c.h.bf16 %v1305_v1 }
  0x1e   :  { %450 = vmatpush.bf16.msra.mxu0 %v984_v28  ;;  %1363 = vmatpush.bf16.msra.mxu1 %v984_v28  ;;  %v244_v19 = vadd.f32 %v1429_v14, %v176_v15  ;;  %v291_v20 = vmax.f32 %v227_v16, 0.0  ;;  %v292_v21 = vmax.f32 %v228_v17, 0.0 }
  0x1f   :  { %1364 = vmatpush.bf16.msra.mxu2 %v984_v28  ;;  %1365 = vmatpush.bf16.msra.mxu3 %v984_v28  ;;  %v1290_v28 = vld [vmem:[%s2049_s0 + $0x58] sm:$0xff]   ;;  %v225_v38 = vadd.f32 %v1429_v14, %v157_v33  ;;  %v307_v22 = vmax.f32 %v243_v18, 0.0 }
  0x20   :  { %v308_v23 = vmax.f32 %v244_v19, 0.0 }
  0x21   :  { %451 = vmatmul.bf16.vlgmr.msra.gmra.mxu0 %v347_v31  ;;  %491 = vmatmul.bf16.vlgmr.msra.gmra.mxu1 %v355_v32  ;;  %v1038_v31 = vunpack.c.l.bf16 %v1290_v28  ;;  %v1039_v32 = vunpack.c.h.bf16 %v1290_v28  ;;  %v289_v42 = vmax.f32 %v225_v38, 0.0 }
  0x22   :  { %531 = vmatmul.bf16.vlgmr.msra.gmra.mxu2 %v363_v3  ;;  %v320_v3 = vmax.f32 %v256_v62, 0.0  ;;  %v359_v38 = vpack.c.bf16 %v308_v23, %v307_v22 }
  0x23   :  { %v173_v36 = vmul.f32 %v1416_v7, %v1038_v31  ;;  %v174_v37 = vmul.f32 %v1416_v7, %v1039_v32 }
  0x24   :  { %v365_v11 = vpack.c.bf16 %v320_v3, %v319_v2  ;;  %v1285_v2 = vld [vmem:[%s2049_s0 + $0x30] sm:$0xff]  }
  0x25   :  { %v241_v40 = vadd.f32 %v1429_v14, %v173_v36  ;;  %v242_v41 = vadd.f32 %v1429_v14, %v174_v37  ;;  %v1014_v36 = vunpack.c.l.bf16 %v1284_v26  ;;  %v1015_v37 = vunpack.c.h.bf16 %v1284_v26 }
  0x26   :  { %v1018_v13 = vunpack.c.l.bf16 %v1285_v2  ;;  %v1019_v15 = vunpack.c.h.bf16 %v1285_v2 }
  0x27   :  { %v305_v44 = vmax.f32 %v241_v40, 0.0  ;;  %v306_v45 = vmax.f32 %v242_v41, 0.0  ;;  %v161_v48 = vmul.f32 %v1416_v7, %v1014_v36  ;;  %v162_v49 = vmul.f32 %v1416_v7, %v1015_v37 }
  0x28   :  { %v163_v26 = vmul.f32 %v1416_v7, %v1018_v13 }
  0x29   :  { %v358_v60 = vpack.c.bf16 %v306_v45, %v305_v44 }
  0x31   :  { %456 = vmatmul.bf16.gmra.mxu0 %v348_v56  ;;  %496 = vmatmul.bf16.gmra.mxu1 %v356_v57  ;;  %v200_v56 = vmul.f32 %v1416_v7, %v1091_v52  ;;  %v350_v57 = vpack.c.bf16 %v290_v43, %v289_v42  ;;  %v1292_v43 = vld [vmem:[%s2049_s0 + $0x68] sm:$0xff]  }
  0x32   :  { %536 = vmatmul.bf16.gmra.mxu2 %v364_v35  ;;  %v351_v35 = vpack.c.bf16 %v292_v21, %v291_v20  ;;  %v1046_v50 = vunpack.c.l.bf16 %v1292_v43  ;;  %v1047_v51 = vunpack.c.h.bf16 %v1292_v43  ;;  %v1293_v21 = vld [vmem:[%s2049_s0 + $0x70] sm:$0xff]   ;;  %v1306_v43 = vld [vmem:[%s2049_s0 + $0xd8] sm:$0xff]  }
  0x33   :  { %v268_v0 = vadd.f32 %v1429_v14, %v200_v56  ;;  %v229_v56 = vadd.f32 %v1429_v14, %v161_v48  ;;  %v1103_v48 = vunpack.c.h.bf16 %v1306_v43 }
  0x34   :  { %v177_v54 = vmul.f32 %v1416_v7, %v1046_v50  ;;  %v178_v55 = vmul.f32 %v1416_v7, %v1047_v51 }
  0x35   :  { %v332_v5 = vmax.f32 %v268_v0, 0.0  ;;  %v1299_v0 = vld [vmem:[%s2049_s0 + $0xa0] sm:$0xff]  }
  0x36   :  { %v245_v58 = vadd.f32 %v1429_v14, %v177_v54  ;;  %v246_v59 = vadd.f32 %v1429_v14, %v178_v55  ;;  %v1074_v3 = vunpack.c.l.bf16 %v1299_v0 }
  0x37   :  { %v371_v12 = vpack.c.bf16 %v332_v5, %v331_v4  ;;  %v1075_v4 = vunpack.c.h.bf16 %v1299_v0  ;;  %v1098_v5 = vunpack.c.l.bf16 %v1305_v1 }
  0x38   :  { %v309_v62 = vmax.f32 %v245_v58, 0.0  ;;  %v310_v63 = vmax.f32 %v246_v59, 0.0  ;;  %v191_v8 = vmul.f32 %v1416_v7, %v1074_v3 }
  0x39   :  { %571 = vmatmul.bf16.vlgmr.msra.gmra.mxu3 %v371_v12  ;;  %v192_v9 = vmul.f32 %v1416_v7, %v1075_v4  ;;  %v203_v10 = vmul.f32 %v1416_v7, %v1098_v5 }
  0x3a   :  { %v360_v16 = vpack.c.bf16 %v310_v63, %v309_v62  ;;  %v259_v17 = vadd.f32 %v1429_v14, %v191_v8 }
  0x3b   :  { %v260_v18 = vadd.f32 %v1429_v14, %v192_v9  ;;  %v271_v19 = vadd.f32 %v1429_v14, %v203_v10 }
  0x3c   :  { %v323_v22 = vmax.f32 %v259_v17, 0.0 }
  0x3d   :  { %v324_v23 = vmax.f32 %v260_v18, 0.0 }
  0x41   :  { %461 = vmatmul.bf16.gmra.mxu0 %v349_v24  ;;  %501 = vmatmul.bf16.gmra.mxu1 %v357_v25  ;;  %v1298_v24 = vld [vmem:[%s2049_s0 + $0x98] sm:$0xff]   ;;  %v1304_v25 = vld [vmem:[%s2049_s0 + $0xc8] sm:$0xff]  }
  0x42   :  { %541 = vmatmul.bf16.gmra.mxu2 %v365_v11  ;;  %v1070_v27 = vunpack.c.l.bf16 %v1298_v24  ;;  %v1071_v28 = vunpack.c.h.bf16 %v1298_v24  ;;  %v1094_v29 = vunpack.c.l.bf16 %v1304_v25  ;;  %v1095_v30 = vunpack.c.h.bf16 %v1304_v25 }
  0x43   :  { %v204_v11 = vmul.f32 %v1416_v7, %v1099_v6  ;;  %v335_v24 = vmax.f32 %v271_v19, 0.0 }
  0x44   :  { %v189_v31 = vmul.f32 %v1416_v7, %v1070_v27  ;;  %v190_v32 = vmul.f32 %v1416_v7, %v1071_v28  ;;  %v201_v33 = vmul.f32 %v1416_v7, %v1094_v29  ;;  %v202_v34 = vmul.f32 %v1416_v7, %v1095_v30 }
  0x45   :  { %v272_v20 = vadd.f32 %v1429_v14, %v204_v11  ;;  %v164_v27 = vmul.f32 %v1416_v7, %v1019_v15  ;;  %v1050_v28 = vunpack.c.l.bf16 %v1293_v21  ;;  %v1051_v29 = vunpack.c.h.bf16 %v1293_v21  ;;  %v1307_v21 = vld [vmem:[%s2049_s0 + $0xe0] sm:$0xff]  }
  0x46   :  { %v257_v39 = vadd.f32 %v1429_v14, %v189_v31  ;;  %v258_v40 = vadd.f32 %v1429_v14, %v190_v32  ;;  %v269_v41 = vadd.f32 %v1429_v14, %v201_v33  ;;  %v270_v42 = vadd.f32 %v1429_v14, %v202_v34 }
  0x47   :  { %v336_v25 = vmax.f32 %v272_v20, 0.0  ;;  %v367_v30 = vpack.c.bf16 %v324_v23, %v323_v22  ;;  %v179_v32 = vmul.f32 %v1416_v7, %v1050_v28  ;;  %v180_v33 = vmul.f32 %v1416_v7, %v1051_v29  ;;  %v1301_v20 = vld [vmem:[%s2049_s0 + $0xb0] sm:$0xff]  }
  0x48   :  { %v321_v44 = vmax.f32 %v257_v39, 0.0  ;;  %v322_v45 = vmax.f32 %v258_v40, 0.0  ;;  %v333_v46 = vmax.f32 %v269_v41, 0.0  ;;  %v334_v47 = vmax.f32 %v270_v42, 0.0  ;;  %v1300_v42 = vld [vmem:[%s2049_s0 + $0xa8] sm:$0xff]  }
  0x49   :  { %v373_v31 = vpack.c.bf16 %v336_v25, %v335_v24  ;;  %v231_v34 = vadd.f32 %v1429_v14, %v163_v26  ;;  %v247_v36 = vadd.f32 %v1429_v14, %v179_v32  ;;  %v248_v37 = vadd.f32 %v1429_v14, %v180_v33 }
  0x4a   :  { %v366_v52 = vpack.c.bf16 %v322_v45, %v321_v44  ;;  %v372_v53 = vpack.c.bf16 %v334_v47, %v333_v46  ;;  %v1286_v44 = vld [vmem:[%s2049_s0 + $0x38] sm:$0xff]   ;;  %v1078_v45 = vunpack.c.l.bf16 %v1300_v42  ;;  %v1079_v46 = vunpack.c.h.bf16 %v1300_v42 }
  0x4b   :  { %v311_v40 = vmax.f32 %v247_v36, 0.0  ;;  %v312_v41 = vmax.f32 %v248_v37, 0.0  ;;  %v1102_v47 = vunpack.c.l.bf16 %v1306_v43  ;;  %v1022_v54 = vunpack.c.l.bf16 %v1286_v44  ;;  %v1302_v42 = vld [vmem:[%s2049_s0 + $0xb8] sm:$0xff]   ;;  %v1308_v43 = vld [vmem:[%s2049_s0 + $0xe8] sm:$0xff]  }
  0x4c   :  { %576 = vmatmul.bf16.gmra.mxu3 %v372_v53  ;;  %v194_v50 = vmul.f32 %v1416_v7, %v1079_v46  ;;  %v1023_v55 = vunpack.c.h.bf16 %v1286_v44  ;;  %v1082_v22 = vunpack.c.l.bf16 %v1301_v20  ;;  %v1083_v23 = vunpack.c.h.bf16 %v1301_v20 }
  0x4d   :  { %v205_v51 = vmul.f32 %v1416_v7, %v1102_v47  ;;  %v165_v2 = vmul.f32 %v1416_v7, %v1022_v54  ;;  %v1106_v24 = vunpack.c.l.bf16 %v1307_v21  ;;  %v1107_v25 = vunpack.c.h.bf16 %v1307_v21 }
  0x4e   :  { %v262_v58 = vadd.f32 %v1429_v14, %v194_v50  ;;  %v166_v3 = vmul.f32 %v1416_v7, %v1023_v55  ;;  %v195_v26 = vmul.f32 %v1416_v7, %v1082_v22  ;;  %v1086_v44 = vunpack.c.l.bf16 %v1302_v42 }
  0x4f   :  { %v273_v59 = vadd.f32 %v1429_v14, %v205_v51  ;;  %v233_v11 = vadd.f32 %v1429_v14, %v165_v2  ;;  %v207_v28 = vmul.f32 %v1416_v7, %v1106_v24  ;;  %v208_v29 = vmul.f32 %v1416_v7, %v1107_v25 }
  0x50   :  { %v326_v63 = vmax.f32 %v262_v58, 0.0  ;;  %v263_v32 = vadd.f32 %v1429_v14, %v195_v26  ;;  %v1110_v46 = vunpack.c.l.bf16 %v1308_v43  ;;  %v1111_v47 = vunpack.c.h.bf16 %v1308_v43 }
  0x51   :  { %466 = vmatmul.bf16.gmra.mxu0 %v350_v57  ;;  %506 = vmatmul.bf16.gmra.mxu1 %v358_v60  ;;  %v230_v57 = vadd.f32 %v1429_v14, %v162_v49  ;;  %v293_v60 = vmax.f32 %v229_v56, 0.0  ;;  %v193_v49 = vmul.f32 %v1416_v7, %v1078_v45  ;;  %v361_v56 = vpack.c.bf16 %v312_v41, %v311_v40 }
  0x52   :  { %546 = vmatmul.bf16.gmra.mxu2 %v366_v52  ;;  %v206_v52 = vmul.f32 %v1416_v7, %v1103_v48  ;;  %v337_v0 = vmax.f32 %v273_v59, 0.0  ;;  %v327_v36 = vmax.f32 %v263_v32, 0.0  ;;  %v1087_v45 = vunpack.c.h.bf16 %v1302_v42  ;;  %v1310_v32 = vld [vmem:[%s2049_s0 + $0xf8] sm:$0xff]  }
  0x53   :  { %v294_v61 = vmax.f32 %v230_v57, 0.0  ;;  %v261_v57 = vadd.f32 %v1429_v14, %v193_v49  ;;  %v197_v48 = vmul.f32 %v1416_v7, %v1086_v44  ;;  %v209_v50 = vmul.f32 %v1416_v7, %v1110_v46 }
  0x54   :  { %v198_v49 = vmul.f32 %v1416_v7, %v1087_v45  ;;  %v210_v51 = vmul.f32 %v1416_v7, %v1111_v47 }
  0x55   :  { %v352_v12 = vpack.c.bf16 %v294_v61, %v293_v60  ;;  %v274_v60 = vadd.f32 %v1429_v14, %v206_v52  ;;  %v1294_v61 = vld [vmem:[%s2049_s0 + $0x78] sm:$0xff]   ;;  %v325_v62 = vmax.f32 %v261_v57, 0.0  ;;  %v265_v52 = vadd.f32 %v1429_v14, %v197_v48 }
  0x56   :  { %v1054_v4 = vunpack.c.l.bf16 %v1294_v61  ;;  %v1055_v5 = vunpack.c.h.bf16 %v1294_v61  ;;  %v277_v54 = vadd.f32 %v1429_v14, %v209_v50  ;;  %v278_v55 = vadd.f32 %v1429_v14, %v210_v51 }
  0x57   :  { %v338_v1 = vmax.f32 %v274_v60, 0.0  ;;  %v368_v6 = vpack.c.bf16 %v326_v63, %v325_v62  ;;  %v329_v58 = vmax.f32 %v265_v52, 0.0 }
  0x58   :  { %v181_v9 = vmul.f32 %v1416_v7, %v1054_v4  ;;  %v182_v10 = vmul.f32 %v1416_v7, %v1055_v5  ;;  %v341_v60 = vmax.f32 %v277_v54, 0.0  ;;  %v342_v61 = vmax.f32 %v278_v55, 0.0 }
  0x59   :  { %v374_v8 = vpack.c.bf16 %v338_v1, %v337_v0 }
  0x5a   :  { %v249_v13 = vadd.f32 %v1429_v14, %v181_v9  ;;  %v250_v15 = vadd.f32 %v1429_v14, %v182_v10  ;;  %v376_v63 = vpack.c.bf16 %v342_v61, %v341_v60 }
  0x5c   :  { %581 = vmatmul.bf16.gmra.mxu3 %v373_v31  ;;  %v313_v18 = vmax.f32 %v249_v13, 0.0  ;;  %v314_v19 = vmax.f32 %v250_v15, 0.0 }
  0x5e   :  { %v362_v31 = vpack.c.bf16 %v314_v19, %v313_v18 }
  0x61   :  { %471 = vmatmul.bf16.gmra.mxu0 %v351_v35  ;;  %511 = vmatmul.bf16.gmra.mxu1 %v359_v38  ;;  %v232_v35 = vadd.f32 %v1429_v14, %v164_v27  ;;  %v295_v38 = vmax.f32 %v231_v34, 0.0  ;;  %v196_v27 = vmul.f32 %v1416_v7, %v1083_v23  ;;  %v275_v34 = vadd.f32 %v1429_v14, %v207_v28 }
  0x62   :  { %551 = vmatmul.bf16.gmra.mxu2 %v367_v30 }
  0x63   :  { %v296_v39 = vmax.f32 %v232_v35, 0.0  ;;  %v264_v33 = vadd.f32 %v1429_v14, %v196_v27  ;;  %v276_v35 = vadd.f32 %v1429_v14, %v208_v29 }
  0x65   :  { %v353_v53 = vpack.c.bf16 %v296_v39, %v295_v38  ;;  %v328_v37 = vmax.f32 %v264_v33, 0.0  ;;  %v339_v38 = vmax.f32 %v275_v34, 0.0  ;;  %v340_v39 = vmax.f32 %v276_v35, 0.0 }
  0x66   :  { %v1118_v34 = vunpack.c.l.bf16 %v1310_v32  ;;  %v1119_v35 = vunpack.c.h.bf16 %v1310_v32 }
  0x67   :  { %v369_v40 = vpack.c.bf16 %v328_v37, %v327_v36  ;;  %v375_v41 = vpack.c.bf16 %v340_v39, %v339_v38 }
  0x68   :  { %v213_v36 = vmul.f32 %v1416_v7, %v1118_v34  ;;  %v214_v37 = vmul.f32 %v1416_v7, %v1119_v35 }
  0x6a   :  { %v281_v38 = vadd.f32 %v1429_v14, %v213_v36  ;;  %v282_v39 = vadd.f32 %v1429_v14, %v214_v37 }
  0x6c   :  { %586 = vmatmul.bf16.gmra.mxu3 %v374_v8  ;;  %v1309_v8 = vld [vmem:[%s2049_s0 + $0xf0] sm:$0xff]   ;;  %v345_v45 = vmax.f32 %v281_v38, 0.0  ;;  %v346_v47 = vmax.f32 %v282_v39, 0.0 }
  0x6d   :  { %v1114_v10 = vunpack.c.l.bf16 %v1309_v8 }
  0x71   :  { %476 = vmatmul.bf16.gmra.mxu0 %v352_v12  ;;  %516 = vmatmul.bf16.gmra.mxu1 %v360_v16  ;;  %v234_v12 = vadd.f32 %v1429_v14, %v166_v3  ;;  %v297_v16 = vmax.f32 %v233_v11, 0.0  ;;  %v1115_v11 = vunpack.c.h.bf16 %v1309_v8 }
  0x72   :  { %556 = vmatmul.bf16.gmra.mxu2 %v368_v6 }
  0x73   :  { %v298_v17 = vmax.f32 %v234_v12, 0.0  ;;  %v211_v12 = vmul.f32 %v1416_v7, %v1114_v10  ;;  %v212_v13 = vmul.f32 %v1416_v7, %v1115_v11  ;;  %v378_v7 = vpack.c.bf16 %v346_v47, %v345_v45 }
  0x75   :  { %v354_v30 = vpack.c.bf16 %v298_v17, %v297_v16  ;;  %v279_v15 = vadd.f32 %v1429_v14, %v211_v12  ;;  %v280_v16 = vadd.f32 %v1429_v14, %v212_v13 }
  0x77   :  { %v343_v21 = vmax.f32 %v279_v15, 0.0  ;;  %v344_v22 = vmax.f32 %v280_v16, 0.0 }
  0x79   :  { %v377_v24 = vpack.c.bf16 %v344_v22, %v343_v21 }
  0x7c   :  { %591 = vmatmul.bf16.gmra.mxu3 %v375_v41 }
  0x81   :  { %481 = vmatmul.bf16.gmra.mxu0 %v353_v53  ;;  %521 = vmatmul.bf16.gmra.mxu1 %v361_v56  ;;  %v266_v53 = vadd.f32 %v1429_v14, %v198_v49 }
  0x82   :  { %561 = vmatmul.bf16.gmra.mxu2 %v369_v40 }
  0x83   :  { %v330_v59 = vmax.f32 %v266_v53, 0.0 }
  0x85   :  { %v370_v62 = vpack.c.bf16 %v330_v59, %v329_v58 }
  0x8c   :  { %596 = vmatmul.bf16.gmra.mxu3 %v376_v63 }
  0x91   :  { %486 = vmatmul.bf16.gmra.mxu0 %v354_v30  ;;  %526 = vmatmul.bf16.gmra.mxu1 %v362_v31 }
  0x92   :  { %566 = vmatmul.bf16.gmra.mxu2 %v370_v62 }
  0x9c   :  { %601 = vmatmul.bf16.gmra.mxu3 %v377_v24 }
  0x9e   :  { %v452_v56 = vpop.f32.mrf.mxu0  ;;  %v1642_v57 = vpop.f32.mrf.mxu1 }
  0x9f   :  { %v810_v0 = vmul.f32 %v452_v56, %v452_v56 }
  0xa5   :  { %v1667_v31 = vpop.f32.mrf.mxu2 }
  0xa6   :  { %v454_v1 = vpop.f32.mrf.mxu0  ;;  %v1644_v2 = vpop.f32.mrf.mxu1 }
  0xa7   :  { %v1123_v3 = vpack.c.bf16 %v454_v1, %v452_v56  ;;  %v740_v4 = vadd.f32 %v454_v1, %v452_v56  ;;  %v811_v5 = vmul.f32 %v454_v1, %v454_v1  ;;  %v1163_v6 = vpack.c.bf16 %v1644_v2, %v1642_v57 }
  0xa9   :  { %1124 = vst [vmem:[%s2050_s4] sm:$0xff] %v1123_v3   ;;  %v874_v9 = vadd.f32 %v811_v5, %v810_v0 }
  0xaa   :  { %1318 = vst [vmem:[%s2050_s4 + $0x40] sm:$0xff] %v1163_v6  }
  0xac   :  { %606 = vmatmul.bf16.gmra.mxu3 %v378_v7 }
  0xad   :  { %v1686_v44 = vpop.f32.mrf.mxu2 }
  0xae   :  { %v457_v17 = vpop.f32.mrf.mxu0  ;;  %v1661_v18 = vpop.f32.mrf.mxu1  ;;  %v1203_v46 = vpack.c.bf16 %v1686_v44, %v1667_v31 }
  0xaf   :  { %v741_v19 = vadd.f32 %v740_v4, %v457_v17  ;;  %v812_v20 = vmul.f32 %v457_v17, %v457_v17 }
  0xb0   :  { %1326 = vst [vmem:[%s2050_s4 + $0x80] sm:$0xff] %v1203_v46  }
  0xb1   :  { %v875_v23 = vadd.f32 %v874_v9, %v812_v20 }
  0xb5   :  { %v1699_v52 = vpop.f32.mrf.mxu2 }
  0xb6   :  { %v459_v25 = vpop.f32.mrf.mxu0  ;;  %v1663_v26 = vpop.f32.mrf.mxu1 }
  0xb7   :  { %v1128_v27 = vpack.c.bf16 %v459_v25, %v457_v17  ;;  %v742_v28 = vadd.f32 %v741_v19, %v459_v25  ;;  %v813_v29 = vmul.f32 %v459_v25, %v459_v25  ;;  %v1168_v30 = vpack.c.bf16 %v1663_v26, %v1661_v18 }
  0xb9   :  { %1311 = vst [vmem:[%s2050_s4 + $0x8] sm:$0xff] %v1128_v27   ;;  %v876_v33 = vadd.f32 %v875_v23, %v813_v29 }
  0xba   :  { %1319 = vst [vmem:[%s2050_s4 + $0x48] sm:$0xff] %v1168_v30  }
  0xbc   :  { %v1722_v63 = vpop.f32.mrf.mxu3 }
  0xbd   :  { %v1709_v55 = vpop.f32.mrf.mxu2 }
  0xbe   :  { %v462_v40 = vpop.f32.mrf.mxu0  ;;  %v1682_v41 = vpop.f32.mrf.mxu1  ;;  %v1208_v56 = vpack.c.bf16 %v1709_v55, %v1699_v52 }
  0xbf   :  { %v1684_v42 = vadd.f32 %v742_v28, %v462_v40  ;;  %v814_v43 = vmul.f32 %v462_v40, %v462_v40 }
  0xc0   :  { %1327 = vst [vmem:[%s2050_s4 + $0x88] sm:$0xff] %v1208_v56  }
  0xc1   :  { %v1690_v48 = vadd.f32 %v876_v33, %v814_v43 }
  0xc4   :  { %v1734_v4 = vpop.f32.mrf.mxu3 }
  0xc5   :  { %v1720_v62 = vpop.f32.mrf.mxu2  ;;  %v1243_v6 = vpack.c.bf16 %v1734_v4, %v1722_v63 }
  0xc6   :  { %v464_v14 = vpop.f32.mrf.mxu0  ;;  %v1695_v49 = vpop.f32.mrf.mxu1 }
  0xc7   :  { %v1133_v50 = vpack.c.bf16 %v464_v14, %v462_v40  ;;  %v1173_v51 = vpack.c.bf16 %v1695_v49, %v1682_v41  ;;  %1334 = vst [vmem:[%s2050_s4 + $0xc0] sm:$0xff] %v1243_v6   ;;  %v815_v34 = vmul.f32 %v464_v14, %v464_v14  ;;  %v744_v38 = vadd.f32 %v1684_v42, %v464_v14 }
  0xc9   :  { %1312 = vst [vmem:[%s2050_s4 + $0x10] sm:$0xff] %v1133_v50   ;;  %v878_v39 = vadd.f32 %v1690_v48, %v815_v34 }
  0xca   :  { %1320 = vst [vmem:[%s2050_s4 + $0x50] sm:$0xff] %v1173_v51  }
  0xcd   :  { %v1732_v3 = vpop.f32.mrf.mxu2 }
  0xce   :  { %v467_v53 = vpop.f32.mrf.mxu0  ;;  %v1707_v54 = vpop.f32.mrf.mxu1  ;;  %v1213_v5 = vpack.c.bf16 %v1732_v3, %v1720_v62 }
  0xcf   :  { %v1752_v13 = vpop.f32.mrf.mxu3  ;;  %v816_v37 = vmul.f32 %v467_v53, %v467_v53  ;;  %v745_v43 = vadd.f32 %v744_v38, %v467_v53 }
  0xd0   :  { %1328 = vst [vmem:[%s2050_s4 + $0x90] sm:$0xff] %v1213_v5  }
  0xd1   :  { %v879_v45 = vadd.f32 %v878_v39, %v816_v37 }
  0xd5   :  { %v1750_v12 = vpop.f32.mrf.mxu2 }
  0xd6   :  { %v469_v58 = vpop.f32.mrf.mxu0  ;;  %v1716_v59 = vpop.f32.mrf.mxu1 }
  0xd7   :  { %v1138_v60 = vpack.c.bf16 %v469_v58, %v467_v53  ;;  %v1178_v61 = vpack.c.bf16 %v1716_v59, %v1707_v54  ;;  %v1764_v19 = vpop.f32.mrf.mxu3  ;;  %v817_v40 = vmul.f32 %v469_v58, %v469_v58  ;;  %v746_v50 = vadd.f32 %v745_v43, %v469_v58 }
  0xd8   :  { %v1248_v21 = vpack.c.bf16 %v1764_v19, %v1752_v13 }
  0xd9   :  { %1313 = vst [vmem:[%s2050_s4 + $0x18] sm:$0xff] %v1138_v60   ;;  %v880_v14 = vadd.f32 %v879_v45, %v817_v40 }
  0xda   :  { %1321 = vst [vmem:[%s2050_s4 + $0x58] sm:$0xff] %v1178_v61  }
  0xdb   :  { %1335 = vst [vmem:[%s2050_s4 + $0xc8] sm:$0xff] %v1248_v21  }
  0xdd   :  { %v1762_v17 = vpop.f32.mrf.mxu2 }
  0xde   :  { %v472_v0 = vpop.f32.mrf.mxu0  ;;  %v1730_v1 = vpop.f32.mrf.mxu1  ;;  %v1218_v20 = vpack.c.bf16 %v1762_v17, %v1750_v12 }
  0xdf   :  { %v1782_v28 = vpop.f32.mrf.mxu3  ;;  %v818_v46 = vmul.f32 %v472_v0, %v472_v0  ;;  %v747_v5 = vadd.f32 %v746_v50, %v472_v0 }
  0xe0   :  { %1329 = vst [vmem:[%s2050_s4 + $0x98] sm:$0xff] %v1218_v20  }
  0xe1   :  { %v881_v48 = vadd.f32 %v880_v14, %v818_v46 }
  0xe5   :  { %v1780_v27 = vpop.f32.mrf.mxu2 }
  0xe6   :  { %v474_v8 = vpop.f32.mrf.mxu0  ;;  %v1746_v9 = vpop.f32.mrf.mxu1 }
  0xe7   :  { %v1143_v10 = vpack.c.bf16 %v474_v8, %v472_v0  ;;  %v1183_v11 = vpack.c.bf16 %v1746_v9, %v1730_v1  ;;  %v1794_v33 = vpop.f32.mrf.mxu3  ;;  %v819_v61 = vmul.f32 %v474_v8, %v474_v8  ;;  %v748_v58 = vadd.f32 %v747_v5, %v474_v8 }
  0xe8   :  { %v1253_v36 = vpack.c.bf16 %v1794_v33, %v1782_v28 }
  0xe9   :  { %1314 = vst [vmem:[%s2050_s4 + $0x20] sm:$0xff] %v1143_v10   ;;  %v882_v6 = vadd.f32 %v881_v48, %v819_v61 }
  0xea   :  { %1322 = vst [vmem:[%s2050_s4 + $0x60] sm:$0xff] %v1183_v11  }
  0xeb   :  { %1336 = vst [vmem:[%s2050_s4 + $0xd0] sm:$0xff] %v1253_v36  }
  0xed   :  { %v1792_v32 = vpop.f32.mrf.mxu2 }
  0xee   :  { %v477_v15 = vpop.f32.mrf.mxu0  ;;  %v1760_v16 = vpop.f32.mrf.mxu1  ;;  %v1223_v35 = vpack.c.bf16 %v1792_v32, %v1780_v27 }
  0xef   :  { %v1814_v42 = vpop.f32.mrf.mxu3  ;;  %v820_v53 = vmul.f32 %v477_v15, %v477_v15  ;;  %v749_v11 = vadd.f32 %v748_v58, %v477_v15 }
  0xf0   :  { %1330 = vst [vmem:[%s2050_s4 + $0xa0] sm:$0xff] %v1223_v35  }
  0xf1   :  { %v883_v20 = vadd.f32 %v882_v6, %v820_v53  ;;  %v827_v6 = vmul.f32 %v1644_v2, %v1644_v2 }
  0xf5   :  { %v1812_v60 = vpop.f32.mrf.mxu2 }
  0xf6   :  { %v479_v22 = vpop.f32.mrf.mxu0  ;;  %v1776_v23 = vpop.f32.mrf.mxu1 }
  0xf7   :  { %v1148_v24 = vpack.c.bf16 %v479_v22, %v477_v15  ;;  %v1188_v25 = vpack.c.bf16 %v1776_v23, %v1760_v16  ;;  %v821_v10 = vmul.f32 %v479_v22, %v479_v22  ;;  %v750_v0 = vadd.f32 %v749_v11, %v479_v22  ;;  %v1826_v35 = vpop.f32.mrf.mxu3 }
  0xf8   :  { %v1258_v8 = vpack.c.bf16 %v1826_v35, %v1814_v42 }
  0xf9   :  { %1315 = vst [vmem:[%s2050_s4 + $0x28] sm:$0xff] %v1148_v24   ;;  %v884_v36 = vadd.f32 %v883_v20, %v821_v10  ;;  %v828_v20 = vmul.f32 %v1661_v18, %v1661_v18 }
  0xfa   :  { %1323 = vst [vmem:[%s2050_s4 + $0x68] sm:$0xff] %v1188_v25  }
  0xfb   :  { %1337 = vst [vmem:[%s2050_s4 + $0xd8] sm:$0xff] %v1258_v8  }
  0xfd   :  { %v1824_v34 = vpop.f32.mrf.mxu2 }
  0xfe   :  { %v482_v29 = vpop.f32.mrf.mxu0  ;;  %v1790_v30 = vpop.f32.mrf.mxu1  ;;  %v1228_v38 = vpack.c.bf16 %v1824_v34, %v1812_v60 }
  0xff   :  { %v822_v21 = vmul.f32 %v482_v29, %v482_v29  ;;  %v751_v39 = vadd.f32 %v750_v0, %v482_v29  ;;  %v1844_v48 = vpop.f32.mrf.mxu3 }
 0x100   :  { %1331 = vst [vmem:[%s2050_s4 + $0xa8] sm:$0xff] %v1228_v38  }
 0x101   :  { %v885_v15 = vadd.f32 %v884_v36, %v822_v21 }
 0x105   :  { %v1842_v5 = vpop.f32.mrf.mxu2 }
 0x106   :  { %v484_v47 = vpop.f32.mrf.mxu0  ;;  %v1808_v7 = vpop.f32.mrf.mxu1 }
 0x107   :  { %v1153_v51 = vpack.c.bf16 %v484_v47, %v482_v29  ;;  %v1193_v56 = vpack.c.bf16 %v1808_v7, %v1790_v30  ;;  %v823_v37 = vmul.f32 %v484_v47, %v484_v47  ;;  %v752_v22 = vadd.f32 %v751_v39, %v484_v47  ;;  %v1866_v38 = vpop.f32.mrf.mxu3 }
 0x108   :  { %v826_v47 = vmul.f32 %v1642_v57, %v1642_v57  ;;  %v1263_v8 = vpack.c.bf16 %v1866_v38, %v1844_v48 }
 0x109   :  { %1316 = vst [vmem:[%s2050_s4 + $0x30] sm:$0xff] %v1153_v51   ;;  %v886_v43 = vadd.f32 %v885_v15, %v823_v37 }
 0x10a   :  { %1324 = vst [vmem:[%s2050_s4 + $0x70] sm:$0xff] %v1193_v56  }
 0x10b   :  { %1338 = vst [vmem:[%s2050_s4 + $0xe0] sm:$0xff] %v1263_v8   ;;  %v839_v8 = vmul.f32 %v1808_v7, %v1808_v7 }
 0x10d   :  { %v1864_v37 = vpop.f32.mrf.mxu2 }
 0x10e   :  { %v487_v24 = vpop.f32.mrf.mxu0  ;;  %v1822_v25 = vpop.f32.mrf.mxu1 }
 0x10f   :  { %v824_v40 = vmul.f32 %v487_v24, %v487_v24  ;;  %v753_v45 = vadd.f32 %v752_v22, %v487_v24 }
 0x111   :  { %v887_v46 = vadd.f32 %v886_v43, %v824_v40  ;;  %v832_v43 = vmul.f32 %v1707_v54, %v1707_v54 }
 0x116   :  { %v489_v50 = vpop.f32.mrf.mxu0  ;;  %v1838_v51 = vpop.f32.mrf.mxu1 }
 0x117   :  { %v1158_v56 = vpack.c.bf16 %v489_v50, %v487_v24  ;;  %v754_v14 = vadd.f32 %v753_v45, %v489_v50  ;;  %v825_v29 = vmul.f32 %v489_v50, %v489_v50  ;;  %v1198_v61 = vpack.c.bf16 %v1838_v51, %v1822_v25 }
 0x119   :  { %1317 = vst [vmem:[%s2050_s4 + $0x38] sm:$0xff] %v1158_v56   ;;  %v755_v53 = vadd.f32 %v754_v14, %v1642_v57  ;;  %v888_v58 = vadd.f32 %v887_v46, %v825_v29  ;;  %v829_v57 = vmul.f32 %v1663_v26, %v1663_v26  ;;  %v833_v46 = vmul.f32 %v1716_v59, %v1716_v59  ;;  %v1890_v14 = vpop.f32.mrf.mxu2 }
 0x11a   :  { %1325 = vst [vmem:[%s2050_s4 + $0x78] sm:$0xff] %v1198_v61   ;;  %v834_v29 = vmul.f32 %v1730_v1, %v1730_v1 }
 0x11b   :  { %v756_v10 = vadd.f32 %v755_v53, %v1644_v2  ;;  %v889_v11 = vadd.f32 %v888_v58, %v826_v47  ;;  %v1233_v2 = vpack.c.bf16 %v1864_v37, %v1842_v5  ;;  %v835_v53 = vmul.f32 %v1746_v9, %v1746_v9 }
 0x11d   :  { %v757_v21 = vadd.f32 %v756_v10, %v1661_v18  ;;  %v890_v24 = vadd.f32 %v889_v11, %v827_v6  ;;  %v830_v18 = vmul.f32 %v1682_v41, %v1682_v41  ;;  %1332 = vst [vmem:[%s2050_s4 + $0xb0] sm:$0xff] %v1233_v2   ;;  %v837_v11 = vmul.f32 %v1776_v23, %v1776_v23 }
 0x11f   :  { %v758_v0 = vadd.f32 %v757_v21, %v1663_v26  ;;  %v891_v36 = vadd.f32 %v890_v24, %v828_v20  ;;  %v831_v26 = vmul.f32 %v1695_v49, %v1695_v49 }
 0x121   :  { %v759_v39 = vadd.f32 %v758_v0, %v1682_v41  ;;  %v892_v15 = vadd.f32 %v891_v36, %v829_v57 }
 0x123   :  { %v760_v40 = vadd.f32 %v759_v39, %v1695_v49  ;;  %v893_v22 = vadd.f32 %v892_v15, %v830_v18  ;;  %v1892_v49 = vpop.f32.mrf.mxu3 }
 0x125   :  { %v894_v45 = vadd.f32 %v893_v22, %v831_v26  ;;  %v761_v41 = vadd.f32 %v760_v40, %v1707_v54  ;;  %v841_v40 = vmul.f32 %v1838_v51, %v1838_v51 }
 0x127   :  { %v762_v50 = vadd.f32 %v761_v41, %v1716_v59  ;;  %v895_v56 = vadd.f32 %v894_v45, %v832_v43  ;;  %v836_v59 = vmul.f32 %v1760_v16, %v1760_v16  ;;  %v843_v41 = vmul.f32 %v1686_v44, %v1686_v44 }
 0x129   :  { %v763_v61 = vadd.f32 %v762_v50, %v1730_v1  ;;  %v896_v47 = vadd.f32 %v895_v56, %v833_v46  ;;  %v1906_v1 = vpop.f32.mrf.mxu2  ;;  %v844_v50 = vmul.f32 %v1699_v52, %v1699_v52 }
 0x12b   :  { %v764_v54 = vadd.f32 %v763_v61, %v1746_v9  ;;  %v897_v58 = vadd.f32 %v896_v47, %v834_v29  ;;  %v1908_v24 = vpop.f32.mrf.mxu3  ;;  %v1238_v9 = vpack.c.bf16 %v1906_v1, %v1890_v14  ;;  %v845_v29 = vmul.f32 %v1709_v55, %v1709_v55 }
 0x12c   :  { %v1268_v57 = vpack.c.bf16 %v1908_v24, %v1892_v49 }
 0x12d   :  { %v765_v6 = vadd.f32 %v764_v54, %v1760_v16  ;;  %v898_v10 = vadd.f32 %v897_v58, %v835_v53  ;;  %v838_v16 = vmul.f32 %v1790_v30, %v1790_v30  ;;  %1333 = vst [vmem:[%s2050_s4 + $0xb8] sm:$0xff] %v1238_v9  }
 0x12e   :  { %1339 = vst [vmem:[%s2050_s4 + $0xe8] sm:$0xff] %v1268_v57   ;;  %v850_v57 = vmul.f32 %v1780_v27, %v1780_v27 }
 0x12f   :  { %v766_v20 = vadd.f32 %v765_v6, %v1776_v23  ;;  %v899_v21 = vadd.f32 %v898_v10, %v836_v59  ;;  %v848_v6 = vmul.f32 %v1750_v12, %v1750_v12 }
 0x131   :  { %v767_v0 = vadd.f32 %v766_v20, %v1790_v30  ;;  %v900_v36 = vadd.f32 %v899_v21, %v837_v11  ;;  %v840_v30 = vmul.f32 %v1822_v25, %v1822_v25 }
 0x133   :  { %v901_v23 = vadd.f32 %v900_v36, %v838_v16  ;;  %v768_v2 = vadd.f32 %v767_v0, %v1808_v7  ;;  %v1932_v22 = vpop.f32.mrf.mxu3  ;;  %v842_v7 = vmul.f32 %v1667_v31, %v1667_v31  ;;  %v851_v16 = vmul.f32 %v1792_v32, %v1792_v32 }
 0x135   :  { %v902_v18 = vadd.f32 %v901_v23, %v839_v8  ;;  %v769_v39 = vadd.f32 %v768_v2, %v1822_v25  ;;  %v852_v23 = vmul.f32 %v1812_v60, %v1812_v60 }
 0x137   :  { %v903_v15 = vadd.f32 %v902_v18, %v840_v30  ;;  %v770_v26 = vadd.f32 %v769_v39, %v1838_v51  ;;  %v853_v18 = vmul.f32 %v1824_v34, %v1824_v34 }
 0x139   :  { %v771_v43 = vadd.f32 %v770_v26, %v1667_v31  ;;  %v904_v45 = vadd.f32 %v903_v15, %v841_v40 }
 0x13b   :  { %v772_v46 = vadd.f32 %v771_v43, %v1686_v44  ;;  %v905_v25 = vadd.f32 %v904_v45, %v842_v7  ;;  %v1946_v31 = vpop.f32.mrf.mxu3  ;;  %v846_v44 = vmul.f32 %v1720_v62, %v1720_v62  ;;  %v856_v45 = vmul.f32 %v1890_v14, %v1890_v14 }
 0x13c   :  { %v1273_v53 = vpack.c.bf16 %v1946_v31, %v1932_v22 }
 0x13d   :  { %v773_v56 = vadd.f32 %v772_v46, %v1699_v52  ;;  %v906_v51 = vadd.f32 %v905_v25, %v843_v41  ;;  %v847_v52 = vmul.f32 %v1732_v3, %v1732_v3  ;;  %v858_v25 = vmul.f32 %v1722_v63, %v1722_v63 }
 0x13e   :  { %1340 = vst [vmem:[%s2050_s4 + $0xf0] sm:$0xff] %v1273_v53  }
 0x13f   :  { %v774_v61 = vadd.f32 %v773_v56, %v1709_v55  ;;  %v907_v47 = vadd.f32 %v906_v51, %v844_v50 }
 0x141   :  { %v775_v54 = vadd.f32 %v774_v61, %v1720_v62  ;;  %v908_v58 = vadd.f32 %v907_v47, %v845_v29  ;;  %v849_v62 = vmul.f32 %v1762_v17, %v1762_v17 }
 0x143   :  { %v776_v55 = vadd.f32 %v775_v54, %v1732_v3  ;;  %v909_v59 = vadd.f32 %v908_v58, %v846_v44  ;;  %v1965_v9 = vpop.f32.mrf.mxu3 }
 0x145   :  { %v910_v10 = vadd.f32 %v909_v59, %v847_v52  ;;  %v777_v11 = vadd.f32 %v776_v55, %v1750_v12 }
 0x147   :  { %v778_v20 = vadd.f32 %v777_v11, %v1762_v17  ;;  %v911_v21 = vadd.f32 %v910_v10, %v848_v6 }
 0x149   :  { %v779_v3 = vadd.f32 %v778_v20, %v1780_v27  ;;  %v912_v0 = vadd.f32 %v911_v21, %v849_v62 }
 0x14b   :  { %v780_v36 = vadd.f32 %v779_v3, %v1792_v32  ;;  %v913_v12 = vadd.f32 %v912_v0, %v850_v57  ;;  %v609_v27 = vpop.f32.mrf.mxu3  ;;  %v854_v32 = vmul.f32 %v1842_v5, %v1842_v5 }
 0x14c   :  { %v1278_v30 = vpack.c.bf16 %v609_v27, %v1965_v9 }
 0x14d   :  { %v781_v17 = vadd.f32 %v780_v36, %v1812_v60  ;;  %v914_v2 = vadd.f32 %v913_v12, %v851_v16  ;;  %v869_v16 = vmul.f32 %v1908_v24, %v1908_v24 }
 0x14e   :  { %1341 = vst [vmem:[%s2050_s4 + $0xf8] sm:$0xff] %v1278_v30   ;;  %v873_v30 = vmul.f32 %v609_v27, %v609_v27 }
 0x14f   :  { %v782_v8 = vadd.f32 %v781_v17, %v1824_v34  ;;  %v915_v39 = vadd.f32 %v914_v2, %v852_v23  ;;  %v855_v34 = vmul.f32 %v1864_v37, %v1864_v37  ;;  %v870_v23 = vmul.f32 %v1932_v22, %v1932_v22 }
 0x150   :  { %v871_v2 = vmul.f32 %v1946_v31, %v1946_v31 }
 0x151   :  { %v916_v15 = vadd.f32 %v915_v39, %v853_v18  ;;  %v783_v26 = vadd.f32 %v782_v8, %v1842_v5  ;;  %v857_v5 = vmul.f32 %v1906_v1, %v1906_v1  ;;  %v872_v18 = vmul.f32 %v1965_v9, %v1965_v9 }
 0x153   :  { %v917_v60 = vadd.f32 %v916_v15, %v854_v32  ;;  %v784_v40 = vadd.f32 %v783_v26, %v1864_v37  ;;  %v859_v37 = vmul.f32 %v1734_v4, %v1734_v4 }
 0x155   :  { %v918_v7 = vadd.f32 %v917_v60, %v855_v34  ;;  %v785_v43 = vadd.f32 %v784_v40, %v1890_v14  ;;  %v860_v14 = vmul.f32 %v1752_v13, %v1752_v13 }
 0x157   :  { %v919_v41 = vadd.f32 %v918_v7, %v856_v45  ;;  %v786_v46 = vadd.f32 %v785_v43, %v1906_v1  ;;  %v861_v1 = vmul.f32 %v1764_v19, %v1764_v19 }
 0x159   :  { %v787_v50 = vadd.f32 %v786_v46, %v1722_v63  ;;  %v920_v56 = vadd.f32 %v919_v41, %v857_v5  ;;  %v862_v63 = vmul.f32 %v1782_v28, %v1782_v28 }
 0x15b   :  { %v788_v51 = vadd.f32 %v787_v50, %v1734_v4  ;;  %v921_v29 = vadd.f32 %v920_v56, %v858_v25  ;;  %v863_v4 = vmul.f32 %v1794_v33, %v1794_v33 }
 0x15d   :  { %v789_v61 = vadd.f32 %v788_v51, %v1752_v13  ;;  %v922_v47 = vadd.f32 %v921_v29, %v859_v37  ;;  %v864_v13 = vmul.f32 %v1814_v42, %v1814_v42 }
 0x15f   :  { %v790_v53 = vadd.f32 %v789_v61, %v1764_v19  ;;  %v923_v44 = vadd.f32 %v922_v47, %v860_v14  ;;  %v865_v19 = vmul.f32 %v1826_v35, %v1826_v35 }
 0x161   :  { %v791_v54 = vadd.f32 %v790_v53, %v1782_v28  ;;  %v924_v58 = vadd.f32 %v923_v44, %v861_v1  ;;  %v866_v28 = vmul.f32 %v1844_v48, %v1844_v48 }
 0x163   :  { %v792_v52 = vadd.f32 %v791_v54, %v1794_v33  ;;  %v925_v55 = vadd.f32 %v924_v58, %v862_v63  ;;  %v867_v33 = vmul.f32 %v1866_v38, %v1866_v38 }
 0x165   :  { %v926_v59 = vadd.f32 %v925_v55, %v863_v4  ;;  %v793_v6 = vadd.f32 %v792_v52, %v1814_v42  ;;  %v868_v42 = vmul.f32 %v1892_v49, %v1892_v49 }
 0x167   :  { %v794_v10 = vadd.f32 %v793_v6, %v1826_v35  ;;  %v927_v11 = vadd.f32 %v926_v59, %v864_v13 }
 0x169   :  { %v795_v62 = vadd.f32 %v794_v10, %v1844_v48  ;;  %v928_v20 = vadd.f32 %v927_v11, %v865_v19 }
 0x16b   :  { %v796_v21 = vadd.f32 %v795_v62, %v1866_v38  ;;  %v929_v57 = vadd.f32 %v928_v20, %v866_v28 }
 0x16d   :  { %v797_v3 = vadd.f32 %v796_v21, %v1892_v49  ;;  %v930_v0 = vadd.f32 %v929_v57, %v867_v33 }
 0x16f   :  { %v798_v35 = vadd.f32 %v797_v3, %v1908_v24  ;;  %v931_v36 = vadd.f32 %v930_v0, %v868_v42 }
 0x171   :  { %v932_v48 = vadd.f32 %v931_v36, %v869_v16  ;;  %v799_v12 = vadd.f32 %v798_v35, %v1932_v22 }
 0x173   :  { %v933_v38 = vadd.f32 %v932_v48, %v870_v23  ;;  %v800_v17 = vadd.f32 %v799_v12, %v1946_v31 }
 0x175   :  { %v934_v49 = vadd.f32 %v933_v38, %v871_v2  ;;  %v801_v8 = vadd.f32 %v800_v17, %v1965_v9 }
 0x177   :  { %v935_v24 = vadd.f32 %v934_v49, %v872_v18  ;;  %v802_v39 = vadd.f32 %v801_v8, %v609_v27 }
 0x179   :  { %v803_v15 = vrot.slane %v802_v39, 4  ;;  %v936_v26 = vadd.f32 %v935_v24, %v873_v30 }
 0x17b   :  { %v804_v32 = vadd.f32 %v803_v15, %v802_v39  ;;  %v937_v60 = vrot.slane %v936_v26, 4 }
 0x17d   :  { %v805_v22 = vrot.slane %v804_v32, 2  ;;  %v938_v40 = vadd.f32 %v937_v60, %v936_v26 }
 0x17f   :  { %v806_v34 = vadd.f32 %v805_v22, %v804_v32  ;;  %v939_v7 = vrot.slane %v938_v40, 2 }
 0x181   :  { %v807_v43 = vrot.slane %v806_v34, 1  ;;  %v940_v45 = vadd.f32 %v939_v7, %v938_v40 }
 0x183   :  { %v808_v31 = vadd.f32 %v807_v43, %v806_v34  ;;  %v941_v41 = vrot.slane %v940_v45, 1 }
 0x185   :  { %809 = vst [vmem:[%s2051_s5] sm:$0x1] %v808_v31  ;;  %v942_v9 = vadd.f32 %v941_v41, %v940_v45 }
 0x187   :  { %943 = vst [vmem:[%s2051_s5 + $0x1] sm:$0x1] %v942_v9 }

// kernel: bottleneck_forward.7
= control target key start
LH: loop header
LB: loop body
LE: loop exit
PB: predicated region body
PF: predicated region fallthrough
CT: control target
= control target key end

     0   :  { %s1345_s0 = inlined_call_operand.vmem [shape: bf16[512,128], index: 0, kind: input, shape index: {}]   ;;  %s1346_s1 = inlined_call_operand.vmem [shape: f32[1,128], index: 1, kind: input, shape index: {}]   ;;  %s1347_s2 = inlined_call_operand.vmem [shape: f32[1,128], index: 2, kind: input, shape index: {}]   ;;  %s1348_s3 = inlined_call_operand.vmem [shape: f32[512,128], index: 3, kind: input, shape index: {}]   ;;  %s1349_s4 = inlined_call_operand.vmem [shape: f32[512,128], index: 4, kind: output, shape index: {}]  }
   0x1   :  { %v542_v0 = vld [vmem:[%s1345_s0] sm:$0xff]   ;;  %v669_v5 = vld [vmem:[%s1345_s0 + $0x8] sm:$0xff]   ;;  %v670_v10 = vld [vmem:[%s1345_s0 + $0x10] sm:$0xff]  }
   0x2   :  { %v733_v1 = vld [vmem:[%s1346_s1] ss:$0 sm:$0xff]  ;;  %v543_v2 = vunpack.c.l.bf16 %v542_v0  ;;  %v544_v4 = vunpack.c.h.bf16 %v542_v0  ;;  %v547_v8 = vunpack.c.l.bf16 %v669_v5  ;;  %v548_v9 = vunpack.c.h.bf16 %v669_v5  ;;  %v282_v12 = vld [vmem:[%s1348_s3 + $0x8] sm:$0xff]  ;;  %v671_v15 = vld [vmem:[%s1345_s0 + $0x18] sm:$0xff]  }
   0x3   :  { %v738_v3 = vld [vmem:[%s1347_s2] ss:$0 sm:$0xff]  ;;  %v551_v13 = vunpack.c.l.bf16 %v670_v10  ;;  %v552_v14 = vunpack.c.h.bf16 %v670_v10  ;;  %v283_v20 = vld [vmem:[%s1348_s3 + $0x10] sm:$0xff]  ;;  %v284_v21 = vld [vmem:[%s1348_s3 + $0x18] sm:$0xff]  ;;  %v555_v24 = vunpack.c.l.bf16 %v671_v15  ;;  %v556_v25 = vunpack.c.h.bf16 %v671_v15 }
   0x4   :  { %v149_v6 = vmul.f32 %v733_v1, %v543_v2  ;;  %v150_v7 = vmul.f32 %v733_v1, %v544_v4  ;;  %v281_v11 = vld [vmem:[%s1348_s3] sm:$0xff]  ;;  %v151_v18 = vmul.f32 %v733_v1, %v547_v8  ;;  %v152_v19 = vmul.f32 %v733_v1, %v548_v9  ;;  %v286_v31 = vld [vmem:[%s1348_s3 + $0x28] sm:$0xff]  ;;  %v287_v41 = vld [vmem:[%s1348_s3 + $0x30] sm:$0xff] }
   0x5   :  { %v153_v22 = vmul.f32 %v733_v1, %v551_v13  ;;  %v154_v23 = vmul.f32 %v733_v1, %v552_v14  ;;  %v285_v30 = vld [vmem:[%s1348_s3 + $0x20] sm:$0xff]  ;;  %v155_v34 = vmul.f32 %v733_v1, %v555_v24  ;;  %v156_v35 = vmul.f32 %v733_v1, %v556_v25  ;;  %v288_v42 = vld [vmem:[%s1348_s3 + $0x38] sm:$0xff]  ;;  %v673_v47 = vld [vmem:[%s1345_s0 + $0x28] sm:$0xff]  }
   0x6   :  { %v217_v16 = vadd.f32 %v738_v3, %v149_v6  ;;  %v218_v17 = vadd.f32 %v738_v3, %v150_v7  ;;  %v219_v28 = vadd.f32 %v738_v3, %v151_v18  ;;  %v220_v29 = vadd.f32 %v738_v3, %v152_v19  ;;  %v672_v36 = vld [vmem:[%s1345_s0 + $0x20] sm:$0xff]   ;;  %v674_v52 = vld [vmem:[%s1345_s0 + $0x30] sm:$0xff]   ;;  %v675_v61 = vld [vmem:[%s1345_s0 + $0x38] sm:$0xff]  }
   0x7   :  { %v221_v32 = vadd.f32 %v738_v3, %v153_v22  ;;  %v222_v33 = vadd.f32 %v738_v3, %v154_v23  ;;  %v223_v45 = vadd.f32 %v738_v3, %v155_v34  ;;  %v224_v46 = vadd.f32 %v738_v3, %v156_v35  ;;  %v289_v0 = vld [vmem:[%s1348_s3 + $0x40] sm:$0xff]  ;;  %v290_v2 = vld [vmem:[%s1348_s3 + $0x48] sm:$0xff]  ;;  %v291_v10 = vld [vmem:[%s1348_s3 + $0x50] sm:$0xff] }
   0x8   :  { %v345_v26 = vadd.f32 %v281_v11, %v217_v16  ;;  %v346_v27 = vadd.f32 %v282_v12, %v218_v17  ;;  %v347_v39 = vadd.f32 %v283_v20, %v219_v28  ;;  %v348_v40 = vadd.f32 %v284_v21, %v220_v29  ;;  %v292_v11 = vld [vmem:[%s1348_s3 + $0x58] sm:$0xff]  ;;  %v293_v20 = vld [vmem:[%s1348_s3 + $0x60] sm:$0xff]  ;;  %v294_v21 = vld [vmem:[%s1348_s3 + $0x68] sm:$0xff] }
   0x9   :  { %v349_v43 = vadd.f32 %v285_v30, %v221_v32  ;;  %v350_v44 = vadd.f32 %v286_v31, %v222_v33  ;;  %v559_v50 = vunpack.c.l.bf16 %v672_v36  ;;  %v560_v51 = vunpack.c.h.bf16 %v672_v36  ;;  %v295_v31 = vld [vmem:[%s1348_s3 + $0x70] sm:$0xff]  ;;  %v296_v32 = vld [vmem:[%s1348_s3 + $0x78] sm:$0xff] }
   0xa   :  { %v409_v37 = vmax.f32 %v345_v26, 0.0  ;;  %v410_v38 = vmax.f32 %v346_v27, 0.0  ;;  %v411_v48 = vmax.f32 %v347_v39, 0.0  ;;  %v412_v49 = vmax.f32 %v348_v40, 0.0  ;;  %v676_v26 = vld [vmem:[%s1345_s0 + $0x40] sm:$0xff]  }
   0xb   :  { %v413_v53 = vmax.f32 %v349_v43, 0.0  ;;  %v414_v54 = vmax.f32 %v350_v44, 0.0  ;;  %v351_v55 = vadd.f32 %v287_v41, %v223_v45  ;;  %v352_v56 = vadd.f32 %v288_v42, %v224_v46  ;;  %v678_v42 = vld [vmem:[%s1345_s0 + $0x50] sm:$0xff]  }
   0xc   :  { %473 = vst [vmem:[%s1349_s4] sm:$0xff] %v409_v37  ;;  %v157_v57 = vmul.f32 %v733_v1, %v559_v50  ;;  %v158_v58 = vmul.f32 %v733_v1, %v560_v51  ;;  %v563_v59 = vunpack.c.l.bf16 %v673_v47  ;;  %v564_v60 = vunpack.c.h.bf16 %v673_v47  ;;  %v677_v37 = vld [vmem:[%s1345_s0 + $0x48] sm:$0xff]   ;;  %v679_v51 = vld [vmem:[%s1345_s0 + $0x58] sm:$0xff]  }
   0xd   :  { %474 = vst [vmem:[%s1349_s4 + $0x8] sm:$0xff] %v410_v38  ;;  %v415_v62 = vmax.f32 %v351_v55, 0.0  ;;  %v416_v63 = vmax.f32 %v352_v56, 0.0  ;;  %v567_v4 = vunpack.c.l.bf16 %v674_v52  ;;  %v568_v5 = vunpack.c.h.bf16 %v674_v52  ;;  %v298_v55 = vld [vmem:[%s1348_s3 + $0x88] sm:$0xff] }
   0xe   :  { %475 = vst [vmem:[%s1349_s4 + $0x10] sm:$0xff] %v411_v48  ;;  %v225_v6 = vadd.f32 %v738_v3, %v157_v57  ;;  %v226_v7 = vadd.f32 %v738_v3, %v158_v58  ;;  %v159_v8 = vmul.f32 %v733_v1, %v563_v59  ;;  %v160_v9 = vmul.f32 %v733_v1, %v564_v60 }
   0xf   :  { %476 = vst [vmem:[%s1349_s4 + $0x18] sm:$0xff] %v412_v49  ;;  %v161_v12 = vmul.f32 %v733_v1, %v567_v4  ;;  %v162_v13 = vmul.f32 %v733_v1, %v568_v5  ;;  %v571_v14 = vunpack.c.l.bf16 %v675_v61  ;;  %v572_v15 = vunpack.c.h.bf16 %v675_v61 }
  0x10   :  { %477 = vst [vmem:[%s1349_s4 + $0x20] sm:$0xff] %v413_v53  ;;  %v353_v16 = vadd.f32 %v289_v0, %v225_v6  ;;  %v354_v17 = vadd.f32 %v290_v2, %v226_v7  ;;  %v227_v18 = vadd.f32 %v738_v3, %v159_v8  ;;  %v228_v19 = vadd.f32 %v738_v3, %v160_v9 }
  0x11   :  { %478 = vst [vmem:[%s1349_s4 + $0x28] sm:$0xff] %v414_v54  ;;  %v229_v22 = vadd.f32 %v738_v3, %v161_v12  ;;  %v230_v23 = vadd.f32 %v738_v3, %v162_v13  ;;  %v163_v24 = vmul.f32 %v733_v1, %v571_v14  ;;  %v164_v25 = vmul.f32 %v733_v1, %v572_v15  ;;  %v297_v54 = vld [vmem:[%s1348_s3 + $0x80] sm:$0xff] }
  0x12   :  { %479 = vst [vmem:[%s1349_s4 + $0x30] sm:$0xff] %v415_v62  ;;  %v417_v27 = vmax.f32 %v353_v16, 0.0  ;;  %v418_v28 = vmax.f32 %v354_v17, 0.0  ;;  %v355_v29 = vadd.f32 %v291_v10, %v227_v18  ;;  %v356_v30 = vadd.f32 %v292_v11, %v228_v19  ;;  %v299_v62 = vld [vmem:[%s1348_s3 + $0x90] sm:$0xff]  ;;  %v301_v10 = vld [vmem:[%s1348_s3 + $0xa0] sm:$0xff]  ;;  %v302_v11 = vld [vmem:[%s1348_s3 + $0xa8] sm:$0xff] }
  0x13   :  { %480 = vst [vmem:[%s1349_s4 + $0x38] sm:$0xff] %v416_v63  ;;  %v357_v33 = vadd.f32 %v293_v20, %v229_v22  ;;  %v358_v34 = vadd.f32 %v294_v21, %v230_v23  ;;  %v231_v35 = vadd.f32 %v738_v3, %v163_v24  ;;  %v232_v36 = vadd.f32 %v738_v3, %v164_v25  ;;  %v300_v63 = vld [vmem:[%s1348_s3 + $0x98] sm:$0xff]  ;;  %v680_v16 = vld [vmem:[%s1345_s0 + $0x60] sm:$0xff]   ;;  %v303_v21 = vld [vmem:[%s1348_s3 + $0xb0] sm:$0xff] }
  0x14   :  { %481 = vst [vmem:[%s1349_s4 + $0x40] sm:$0xff] %v417_v27  ;;  %v419_v38 = vmax.f32 %v355_v29, 0.0  ;;  %v420_v39 = vmax.f32 %v356_v30, 0.0  ;;  %v575_v40 = vunpack.c.l.bf16 %v676_v26  ;;  %v576_v41 = vunpack.c.h.bf16 %v676_v26  ;;  %v304_v22 = vld [vmem:[%s1348_s3 + $0xb8] sm:$0xff]  ;;  %v681_v27 = vld [vmem:[%s1345_s0 + $0x68] sm:$0xff]  }
  0x15   :  { %482 = vst [vmem:[%s1349_s4 + $0x48] sm:$0xff] %v418_v28  ;;  %v421_v43 = vmax.f32 %v357_v33, 0.0  ;;  %v422_v44 = vmax.f32 %v358_v34, 0.0  ;;  %v359_v45 = vadd.f32 %v295_v31, %v231_v35  ;;  %v360_v46 = vadd.f32 %v296_v32, %v232_v36  ;;  %v682_v32 = vld [vmem:[%s1345_s0 + $0x70] sm:$0xff]  }
  0x16   :  { %483 = vst [vmem:[%s1349_s4 + $0x50] sm:$0xff] %v419_v38  ;;  %v165_v47 = vmul.f32 %v733_v1, %v575_v40  ;;  %v166_v48 = vmul.f32 %v733_v1, %v576_v41  ;;  %v579_v49 = vunpack.c.l.bf16 %v677_v37  ;;  %v580_v50 = vunpack.c.h.bf16 %v677_v37  ;;  %v683_v41 = vld [vmem:[%s1345_s0 + $0x78] sm:$0xff]  }
  0x17   :  { %484 = vst [vmem:[%s1349_s4 + $0x58] sm:$0xff] %v420_v39  ;;  %v423_v52 = vmax.f32 %v359_v45, 0.0  ;;  %v424_v53 = vmax.f32 %v360_v46, 0.0  ;;  %v583_v56 = vunpack.c.l.bf16 %v678_v42  ;;  %v584_v57 = vunpack.c.h.bf16 %v678_v42  ;;  %v306_v45 = vld [vmem:[%s1348_s3 + $0xc8] sm:$0xff] }
  0x18   :  { %485 = vst [vmem:[%s1349_s4 + $0x60] sm:$0xff] %v421_v43  ;;  %v233_v58 = vadd.f32 %v738_v3, %v165_v47  ;;  %v234_v59 = vadd.f32 %v738_v3, %v166_v48  ;;  %v167_v60 = vmul.f32 %v733_v1, %v579_v49  ;;  %v168_v61 = vmul.f32 %v733_v1, %v580_v50 }
  0x19   :  { %486 = vst [vmem:[%s1349_s4 + $0x68] sm:$0xff] %v422_v44  ;;  %v169_v0 = vmul.f32 %v733_v1, %v583_v56  ;;  %v170_v2 = vmul.f32 %v733_v1, %v584_v57  ;;  %v587_v4 = vunpack.c.l.bf16 %v679_v51  ;;  %v588_v5 = vunpack.c.h.bf16 %v679_v51  ;;  %v305_v44 = vld [vmem:[%s1348_s3 + $0xc0] sm:$0xff] }
  0x1a   :  { %487 = vst [vmem:[%s1349_s4 + $0x70] sm:$0xff] %v423_v52  ;;  %v361_v6 = vadd.f32 %v297_v54, %v233_v58  ;;  %v362_v7 = vadd.f32 %v298_v55, %v234_v59  ;;  %v235_v8 = vadd.f32 %v738_v3, %v167_v60  ;;  %v236_v9 = vadd.f32 %v738_v3, %v168_v61  ;;  %v307_v52 = vld [vmem:[%s1348_s3 + $0xd0] sm:$0xff] }
  0x1b   :  { %488 = vst [vmem:[%s1349_s4 + $0x78] sm:$0xff] %v424_v53  ;;  %v237_v12 = vadd.f32 %v738_v3, %v169_v0  ;;  %v238_v13 = vadd.f32 %v738_v3, %v170_v2  ;;  %v171_v14 = vmul.f32 %v733_v1, %v587_v4  ;;  %v172_v15 = vmul.f32 %v733_v1, %v588_v5  ;;  %v308_v53 = vld [vmem:[%s1348_s3 + $0xd8] sm:$0xff] }
  0x1c   :  { %v425_v17 = vmax.f32 %v361_v6, 0.0  ;;  %v426_v18 = vmax.f32 %v362_v7, 0.0  ;;  %v363_v19 = vadd.f32 %v299_v62, %v235_v8  ;;  %v364_v20 = vadd.f32 %v300_v63, %v236_v9  ;;  %v309_v62 = vld [vmem:[%s1348_s3 + $0xe0] sm:$0xff]  ;;  %v310_v63 = vld [vmem:[%s1348_s3 + $0xe8] sm:$0xff] }
  0x1d   :  { %v365_v23 = vadd.f32 %v301_v10, %v237_v12  ;;  %v366_v24 = vadd.f32 %v302_v11, %v238_v13  ;;  %v239_v25 = vadd.f32 %v738_v3, %v171_v14  ;;  %v240_v26 = vadd.f32 %v738_v3, %v172_v15  ;;  %v684_v6 = vld [vmem:[%s1345_s0 + $0x80] sm:$0xff]   ;;  %v311_v11 = vld [vmem:[%s1348_s3 + $0xf0] sm:$0xff]  ;;  %v312_v12 = vld [vmem:[%s1348_s3 + $0xf8] sm:$0xff] }
  0x1e   :  { %489 = vst [vmem:[%s1349_s4 + $0x80] sm:$0xff] %v425_v17  ;;  %v427_v28 = vmax.f32 %v363_v19, 0.0  ;;  %v428_v29 = vmax.f32 %v364_v20, 0.0  ;;  %v591_v30 = vunpack.c.l.bf16 %v680_v16  ;;  %v592_v31 = vunpack.c.h.bf16 %v680_v16  ;;  %v685_v17 = vld [vmem:[%s1345_s0 + $0x88] sm:$0xff]  }
  0x1f   :  { %490 = vst [vmem:[%s1349_s4 + $0x88] sm:$0xff] %v426_v18  ;;  %v429_v33 = vmax.f32 %v365_v23, 0.0  ;;  %v430_v34 = vmax.f32 %v366_v24, 0.0  ;;  %v367_v35 = vadd.f32 %v303_v21, %v239_v25  ;;  %v368_v36 = vadd.f32 %v304_v22, %v240_v26  ;;  %v686_v22 = vld [vmem:[%s1345_s0 + $0x90] sm:$0xff]  }
  0x20   :  { %491 = vst [vmem:[%s1349_s4 + $0x90] sm:$0xff] %v427_v28  ;;  %v173_v37 = vmul.f32 %v733_v1, %v591_v30  ;;  %v174_v38 = vmul.f32 %v733_v1, %v592_v31  ;;  %v595_v39 = vunpack.c.l.bf16 %v681_v27  ;;  %v596_v40 = vunpack.c.h.bf16 %v681_v27  ;;  %v687_v31 = vld [vmem:[%s1345_s0 + $0x98] sm:$0xff]  }
  0x21   :  { %492 = vst [vmem:[%s1349_s4 + $0x98] sm:$0xff] %v428_v29  ;;  %v431_v42 = vmax.f32 %v367_v35, 0.0  ;;  %v432_v43 = vmax.f32 %v368_v36, 0.0  ;;  %v599_v46 = vunpack.c.l.bf16 %v682_v32  ;;  %v600_v47 = vunpack.c.h.bf16 %v682_v32  ;;  %v314_v35 = vld [vmem:[%s1348_s3 + $0x108] sm:$0xff] }
  0x22   :  { %493 = vst [vmem:[%s1349_s4 + $0xa0] sm:$0xff] %v429_v33  ;;  %v241_v48 = vadd.f32 %v738_v3, %v173_v37  ;;  %v242_v49 = vadd.f32 %v738_v3, %v174_v38  ;;  %v175_v50 = vmul.f32 %v733_v1, %v595_v39  ;;  %v176_v51 = vmul.f32 %v733_v1, %v596_v40 }
  0x23   :  { %494 = vst [vmem:[%s1349_s4 + $0xa8] sm:$0xff] %v430_v34  ;;  %v177_v54 = vmul.f32 %v733_v1, %v599_v46  ;;  %v178_v55 = vmul.f32 %v733_v1, %v600_v47  ;;  %v603_v56 = vunpack.c.l.bf16 %v683_v41  ;;  %v604_v57 = vunpack.c.h.bf16 %v683_v41  ;;  %v313_v34 = vld [vmem:[%s1348_s3 + $0x100] sm:$0xff] }
  0x24   :  { %495 = vst [vmem:[%s1349_s4 + $0xb0] sm:$0xff] %v431_v42  ;;  %v369_v58 = vadd.f32 %v305_v44, %v241_v48  ;;  %v370_v59 = vadd.f32 %v306_v45, %v242_v49  ;;  %v243_v60 = vadd.f32 %v738_v3, %v175_v50  ;;  %v244_v61 = vadd.f32 %v738_v3, %v176_v51  ;;  %v315_v42 = vld [vmem:[%s1348_s3 + $0x110] sm:$0xff] }
  0x25   :  { %496 = vst [vmem:[%s1349_s4 + $0xb8] sm:$0xff] %v432_v43  ;;  %v245_v0 = vadd.f32 %v738_v3, %v177_v54  ;;  %v246_v2 = vadd.f32 %v738_v3, %v178_v55  ;;  %v179_v4 = vmul.f32 %v733_v1, %v603_v56  ;;  %v180_v5 = vmul.f32 %v733_v1, %v604_v57  ;;  %v316_v43 = vld [vmem:[%s1348_s3 + $0x118] sm:$0xff] }
  0x26   :  { %v433_v7 = vmax.f32 %v369_v58, 0.0  ;;  %v434_v8 = vmax.f32 %v370_v59, 0.0  ;;  %v371_v9 = vadd.f32 %v307_v52, %v243_v60  ;;  %v372_v10 = vadd.f32 %v308_v53, %v244_v61  ;;  %v317_v52 = vld [vmem:[%s1348_s3 + $0x120] sm:$0xff]  ;;  %v318_v53 = vld [vmem:[%s1348_s3 + $0x128] sm:$0xff] }
  0x27   :  { %v373_v13 = vadd.f32 %v309_v62, %v245_v0  ;;  %v374_v14 = vadd.f32 %v310_v63, %v246_v2  ;;  %v247_v15 = vadd.f32 %v738_v3, %v179_v4  ;;  %v248_v16 = vadd.f32 %v738_v3, %v180_v5  ;;  %v688_v58 = vld [vmem:[%s1345_s0 + $0xa0] sm:$0xff]   ;;  %v319_v63 = vld [vmem:[%s1348_s3 + $0x130] sm:$0xff]  ;;  %v320_v0 = vld [vmem:[%s1348_s3 + $0x138] sm:$0xff] }
  0x28   :  { %497 = vst [vmem:[%s1349_s4 + $0xc0] sm:$0xff] %v433_v7  ;;  %v435_v18 = vmax.f32 %v371_v9, 0.0  ;;  %v436_v19 = vmax.f32 %v372_v10, 0.0  ;;  %v607_v20 = vunpack.c.l.bf16 %v684_v6  ;;  %v608_v21 = vunpack.c.h.bf16 %v684_v6  ;;  %v689_v7 = vld [vmem:[%s1345_s0 + $0xa8] sm:$0xff]  }
  0x29   :  { %498 = vst [vmem:[%s1349_s4 + $0xc8] sm:$0xff] %v434_v8  ;;  %v437_v23 = vmax.f32 %v373_v13, 0.0  ;;  %v438_v24 = vmax.f32 %v374_v14, 0.0  ;;  %v375_v25 = vadd.f32 %v311_v11, %v247_v15  ;;  %v376_v26 = vadd.f32 %v312_v12, %v248_v16  ;;  %v690_v12 = vld [vmem:[%s1345_s0 + $0xb0] sm:$0xff]  }
  0x2a   :  { %499 = vst [vmem:[%s1349_s4 + $0xd0] sm:$0xff] %v435_v18  ;;  %v181_v27 = vmul.f32 %v733_v1, %v607_v20  ;;  %v182_v28 = vmul.f32 %v733_v1, %v608_v21  ;;  %v611_v29 = vunpack.c.l.bf16 %v685_v17  ;;  %v612_v30 = vunpack.c.h.bf16 %v685_v17  ;;  %v691_v21 = vld [vmem:[%s1345_s0 + $0xb8] sm:$0xff]  }
  0x2b   :  { %500 = vst [vmem:[%s1349_s4 + $0xd8] sm:$0xff] %v436_v19  ;;  %v439_v32 = vmax.f32 %v375_v25, 0.0  ;;  %v440_v33 = vmax.f32 %v376_v26, 0.0  ;;  %v615_v36 = vunpack.c.l.bf16 %v686_v22  ;;  %v616_v37 = vunpack.c.h.bf16 %v686_v22  ;;  %v322_v25 = vld [vmem:[%s1348_s3 + $0x148] sm:$0xff] }
  0x2c   :  { %501 = vst [vmem:[%s1349_s4 + $0xe0] sm:$0xff] %v437_v23  ;;  %v249_v38 = vadd.f32 %v738_v3, %v181_v27  ;;  %v250_v39 = vadd.f32 %v738_v3, %v182_v28  ;;  %v183_v40 = vmul.f32 %v733_v1, %v611_v29  ;;  %v184_v41 = vmul.f32 %v733_v1, %v612_v30 }
  0x2d   :  { %502 = vst [vmem:[%s1349_s4 + $0xe8] sm:$0xff] %v438_v24  ;;  %v185_v44 = vmul.f32 %v733_v1, %v615_v36  ;;  %v186_v45 = vmul.f32 %v733_v1, %v616_v37  ;;  %v619_v46 = vunpack.c.l.bf16 %v687_v31  ;;  %v620_v47 = vunpack.c.h.bf16 %v687_v31  ;;  %v321_v24 = vld [vmem:[%s1348_s3 + $0x140] sm:$0xff] }
  0x2e   :  { %503 = vst [vmem:[%s1349_s4 + $0xf0] sm:$0xff] %v439_v32  ;;  %v377_v48 = vadd.f32 %v313_v34, %v249_v38  ;;  %v378_v49 = vadd.f32 %v314_v35, %v250_v39  ;;  %v251_v50 = vadd.f32 %v738_v3, %v183_v40  ;;  %v252_v51 = vadd.f32 %v738_v3, %v184_v41  ;;  %v323_v32 = vld [vmem:[%s1348_s3 + $0x150] sm:$0xff] }
  0x2f   :  { %504 = vst [vmem:[%s1349_s4 + $0xf8] sm:$0xff] %v440_v33  ;;  %v253_v54 = vadd.f32 %v738_v3, %v185_v44  ;;  %v254_v55 = vadd.f32 %v738_v3, %v186_v45  ;;  %v187_v56 = vmul.f32 %v733_v1, %v619_v46  ;;  %v188_v57 = vmul.f32 %v733_v1, %v620_v47  ;;  %v324_v33 = vld [vmem:[%s1348_s3 + $0x158] sm:$0xff] }
  0x30   :  { %v441_v59 = vmax.f32 %v377_v48, 0.0  ;;  %v442_v60 = vmax.f32 %v378_v49, 0.0  ;;  %v379_v61 = vadd.f32 %v315_v42, %v251_v50  ;;  %v380_v62 = vadd.f32 %v316_v43, %v252_v51  ;;  %v325_v42 = vld [vmem:[%s1348_s3 + $0x160] sm:$0xff]  ;;  %v326_v43 = vld [vmem:[%s1348_s3 + $0x168] sm:$0xff] }
  0x31   :  { %v381_v2 = vadd.f32 %v317_v52, %v253_v54  ;;  %v382_v4 = vadd.f32 %v318_v53, %v254_v55  ;;  %v255_v5 = vadd.f32 %v738_v3, %v187_v56  ;;  %v256_v6 = vadd.f32 %v738_v3, %v188_v57  ;;  %v692_v48 = vld [vmem:[%s1345_s0 + $0xc0] sm:$0xff]   ;;  %v327_v53 = vld [vmem:[%s1348_s3 + $0x170] sm:$0xff]  ;;  %v328_v54 = vld [vmem:[%s1348_s3 + $0x178] sm:$0xff] }
  0x32   :  { %505 = vst [vmem:[%s1349_s4 + $0x100] sm:$0xff] %v441_v59  ;;  %v443_v8 = vmax.f32 %v379_v61, 0.0  ;;  %v444_v9 = vmax.f32 %v380_v62, 0.0  ;;  %v623_v10 = vunpack.c.l.bf16 %v688_v58  ;;  %v624_v11 = vunpack.c.h.bf16 %v688_v58  ;;  %v693_v59 = vld [vmem:[%s1345_s0 + $0xc8] sm:$0xff]  }
  0x33   :  { %506 = vst [vmem:[%s1349_s4 + $0x108] sm:$0xff] %v442_v60  ;;  %v445_v13 = vmax.f32 %v381_v2, 0.0  ;;  %v446_v14 = vmax.f32 %v382_v4, 0.0  ;;  %v383_v15 = vadd.f32 %v319_v63, %v255_v5  ;;  %v384_v16 = vadd.f32 %v320_v0, %v256_v6  ;;  %v694_v0 = vld [vmem:[%s1345_s0 + $0xd0] sm:$0xff]  }
  0x34   :  { %507 = vst [vmem:[%s1349_s4 + $0x110] sm:$0xff] %v443_v8  ;;  %v189_v17 = vmul.f32 %v733_v1, %v623_v10  ;;  %v190_v18 = vmul.f32 %v733_v1, %v624_v11  ;;  %v627_v19 = vunpack.c.l.bf16 %v689_v7  ;;  %v628_v20 = vunpack.c.h.bf16 %v689_v7  ;;  %v695_v11 = vld [vmem:[%s1345_s0 + $0xd8] sm:$0xff]  }
  0x35   :  { %508 = vst [vmem:[%s1349_s4 + $0x118] sm:$0xff] %v444_v9  ;;  %v447_v22 = vmax.f32 %v383_v15, 0.0  ;;  %v448_v23 = vmax.f32 %v384_v16, 0.0  ;;  %v631_v26 = vunpack.c.l.bf16 %v690_v12  ;;  %v632_v27 = vunpack.c.h.bf16 %v690_v12  ;;  %v330_v15 = vld [vmem:[%s1348_s3 + $0x188] sm:$0xff] }
  0x36   :  { %509 = vst [vmem:[%s1349_s4 + $0x120] sm:$0xff] %v445_v13  ;;  %v257_v28 = vadd.f32 %v738_v3, %v189_v17  ;;  %v258_v29 = vadd.f32 %v738_v3, %v190_v18  ;;  %v191_v30 = vmul.f32 %v733_v1, %v627_v19  ;;  %v192_v31 = vmul.f32 %v733_v1, %v628_v20 }
  0x37   :  { %510 = vst [vmem:[%s1349_s4 + $0x128] sm:$0xff] %v446_v14  ;;  %v193_v34 = vmul.f32 %v733_v1, %v631_v26  ;;  %v194_v35 = vmul.f32 %v733_v1, %v632_v27  ;;  %v635_v36 = vunpack.c.l.bf16 %v691_v21  ;;  %v636_v37 = vunpack.c.h.bf16 %v691_v21  ;;  %v329_v14 = vld [vmem:[%s1348_s3 + $0x180] sm:$0xff] }
  0x38   :  { %511 = vst [vmem:[%s1349_s4 + $0x130] sm:$0xff] %v447_v22  ;;  %v385_v38 = vadd.f32 %v321_v24, %v257_v28  ;;  %v386_v39 = vadd.f32 %v322_v25, %v258_v29  ;;  %v259_v40 = vadd.f32 %v738_v3, %v191_v30  ;;  %v260_v41 = vadd.f32 %v738_v3, %v192_v31  ;;  %v331_v22 = vld [vmem:[%s1348_s3 + $0x190] sm:$0xff] }
  0x39   :  { %512 = vst [vmem:[%s1349_s4 + $0x138] sm:$0xff] %v448_v23  ;;  %v261_v44 = vadd.f32 %v738_v3, %v193_v34  ;;  %v262_v45 = vadd.f32 %v738_v3, %v194_v35  ;;  %v195_v46 = vmul.f32 %v733_v1, %v635_v36  ;;  %v196_v47 = vmul.f32 %v733_v1, %v636_v37  ;;  %v332_v23 = vld [vmem:[%s1348_s3 + $0x198] sm:$0xff] }
  0x3a   :  { %v449_v49 = vmax.f32 %v385_v38, 0.0  ;;  %v450_v50 = vmax.f32 %v386_v39, 0.0  ;;  %v387_v51 = vadd.f32 %v323_v32, %v259_v40  ;;  %v388_v52 = vadd.f32 %v324_v33, %v260_v41  ;;  %v333_v32 = vld [vmem:[%s1348_s3 + $0x1a0] sm:$0xff]  ;;  %v334_v33 = vld [vmem:[%s1348_s3 + $0x1a8] sm:$0xff] }
  0x3b   :  { %v389_v55 = vadd.f32 %v325_v42, %v261_v44  ;;  %v390_v56 = vadd.f32 %v326_v43, %v262_v45  ;;  %v263_v57 = vadd.f32 %v738_v3, %v195_v46  ;;  %v264_v58 = vadd.f32 %v738_v3, %v196_v47  ;;  %v696_v38 = vld [vmem:[%s1345_s0 + $0xe0] sm:$0xff]   ;;  %v335_v43 = vld [vmem:[%s1348_s3 + $0x1b0] sm:$0xff]  ;;  %v336_v44 = vld [vmem:[%s1348_s3 + $0x1b8] sm:$0xff] }
  0x3c   :  { %513 = vst [vmem:[%s1349_s4 + $0x140] sm:$0xff] %v449_v49  ;;  %v451_v60 = vmax.f32 %v387_v51, 0.0  ;;  %v452_v61 = vmax.f32 %v388_v52, 0.0  ;;  %v639_v62 = vunpack.c.l.bf16 %v692_v48  ;;  %v640_v63 = vunpack.c.h.bf16 %v692_v48  ;;  %v697_v49 = vld [vmem:[%s1345_s0 + $0xe8] sm:$0xff]  }
  0x3d   :  { %514 = vst [vmem:[%s1349_s4 + $0x148] sm:$0xff] %v450_v50  ;;  %v453_v2 = vmax.f32 %v389_v55, 0.0  ;;  %v454_v4 = vmax.f32 %v390_v56, 0.0  ;;  %v391_v5 = vadd.f32 %v327_v53, %v263_v57  ;;  %v392_v6 = vadd.f32 %v328_v54, %v264_v58  ;;  %v698_v54 = vld [vmem:[%s1345_s0 + $0xf0] sm:$0xff]  }
  0x3e   :  { %515 = vst [vmem:[%s1349_s4 + $0x150] sm:$0xff] %v451_v60  ;;  %v197_v7 = vmul.f32 %v733_v1, %v639_v62  ;;  %v198_v8 = vmul.f32 %v733_v1, %v640_v63  ;;  %v643_v9 = vunpack.c.l.bf16 %v693_v59  ;;  %v644_v10 = vunpack.c.h.bf16 %v693_v59  ;;  %v699_v63 = vld [vmem:[%s1345_s0 + $0xf8] sm:$0xff]  }
  0x3f   :  { %516 = vst [vmem:[%s1349_s4 + $0x158] sm:$0xff] %v452_v61  ;;  %v455_v12 = vmax.f32 %v391_v5, 0.0  ;;  %v456_v13 = vmax.f32 %v392_v6, 0.0  ;;  %v647_v16 = vunpack.c.l.bf16 %v694_v0  ;;  %v648_v17 = vunpack.c.h.bf16 %v694_v0  ;;  %v338_v5 = vld [vmem:[%s1348_s3 + $0x1c8] sm:$0xff] }
  0x40   :  { %517 = vst [vmem:[%s1349_s4 + $0x160] sm:$0xff] %v453_v2  ;;  %v265_v18 = vadd.f32 %v738_v3, %v197_v7  ;;  %v266_v19 = vadd.f32 %v738_v3, %v198_v8  ;;  %v199_v20 = vmul.f32 %v733_v1, %v643_v9  ;;  %v200_v21 = vmul.f32 %v733_v1, %v644_v10 }
  0x41   :  { %518 = vst [vmem:[%s1349_s4 + $0x168] sm:$0xff] %v454_v4  ;;  %v201_v24 = vmul.f32 %v733_v1, %v647_v16  ;;  %v202_v25 = vmul.f32 %v733_v1, %v648_v17  ;;  %v651_v26 = vunpack.c.l.bf16 %v695_v11  ;;  %v652_v27 = vunpack.c.h.bf16 %v695_v11  ;;  %v337_v4 = vld [vmem:[%s1348_s3 + $0x1c0] sm:$0xff] }
  0x42   :  { %519 = vst [vmem:[%s1349_s4 + $0x170] sm:$0xff] %v455_v12  ;;  %v393_v28 = vadd.f32 %v329_v14, %v265_v18  ;;  %v394_v29 = vadd.f32 %v330_v15, %v266_v19  ;;  %v267_v30 = vadd.f32 %v738_v3, %v199_v20  ;;  %v268_v31 = vadd.f32 %v738_v3, %v200_v21  ;;  %v339_v12 = vld [vmem:[%s1348_s3 + $0x1d0] sm:$0xff] }
  0x43   :  { %520 = vst [vmem:[%s1349_s4 + $0x178] sm:$0xff] %v456_v13  ;;  %v269_v34 = vadd.f32 %v738_v3, %v201_v24  ;;  %v270_v35 = vadd.f32 %v738_v3, %v202_v25  ;;  %v203_v36 = vmul.f32 %v733_v1, %v651_v26  ;;  %v204_v37 = vmul.f32 %v733_v1, %v652_v27  ;;  %v340_v13 = vld [vmem:[%s1348_s3 + $0x1d8] sm:$0xff] }
  0x44   :  { %v457_v39 = vmax.f32 %v393_v28, 0.0  ;;  %v458_v40 = vmax.f32 %v394_v29, 0.0  ;;  %v395_v41 = vadd.f32 %v331_v22, %v267_v30  ;;  %v396_v42 = vadd.f32 %v332_v23, %v268_v31  ;;  %v341_v22 = vld [vmem:[%s1348_s3 + $0x1e0] sm:$0xff]  ;;  %v342_v23 = vld [vmem:[%s1348_s3 + $0x1e8] sm:$0xff] }
  0x45   :  { %v397_v45 = vadd.f32 %v333_v32, %v269_v34  ;;  %v398_v46 = vadd.f32 %v334_v33, %v270_v35  ;;  %v271_v47 = vadd.f32 %v738_v3, %v203_v36  ;;  %v272_v48 = vadd.f32 %v738_v3, %v204_v37  ;;  %v343_v32 = vld [vmem:[%s1348_s3 + $0x1f0] sm:$0xff]  ;;  %v344_v33 = vld [vmem:[%s1348_s3 + $0x1f8] sm:$0xff] }
  0x46   :  { %521 = vst [vmem:[%s1349_s4 + $0x180] sm:$0xff] %v457_v39  ;;  %v459_v50 = vmax.f32 %v395_v41, 0.0  ;;  %v460_v51 = vmax.f32 %v396_v42, 0.0  ;;  %v655_v52 = vunpack.c.l.bf16 %v696_v38  ;;  %v656_v53 = vunpack.c.h.bf16 %v696_v38 }
  0x47   :  { %522 = vst [vmem:[%s1349_s4 + $0x188] sm:$0xff] %v458_v40  ;;  %v461_v55 = vmax.f32 %v397_v45, 0.0  ;;  %v462_v56 = vmax.f32 %v398_v46, 0.0  ;;  %v399_v57 = vadd.f32 %v335_v43, %v271_v47  ;;  %v400_v58 = vadd.f32 %v336_v44, %v272_v48 }
  0x48   :  { %523 = vst [vmem:[%s1349_s4 + $0x190] sm:$0xff] %v459_v50  ;;  %v205_v59 = vmul.f32 %v733_v1, %v655_v52  ;;  %v206_v60 = vmul.f32 %v733_v1, %v656_v53  ;;  %v659_v61 = vunpack.c.l.bf16 %v697_v49  ;;  %v660_v62 = vunpack.c.h.bf16 %v697_v49 }
  0x49   :  { %524 = vst [vmem:[%s1349_s4 + $0x198] sm:$0xff] %v460_v51  ;;  %v463_v0 = vmax.f32 %v399_v57, 0.0  ;;  %v464_v2 = vmax.f32 %v400_v58, 0.0  ;;  %v663_v6 = vunpack.c.l.bf16 %v698_v54  ;;  %v664_v7 = vunpack.c.h.bf16 %v698_v54 }
  0x4a   :  { %525 = vst [vmem:[%s1349_s4 + $0x1a0] sm:$0xff] %v461_v55  ;;  %v273_v8 = vadd.f32 %v738_v3, %v205_v59  ;;  %v274_v9 = vadd.f32 %v738_v3, %v206_v60  ;;  %v207_v10 = vmul.f32 %v733_v1, %v659_v61  ;;  %v208_v11 = vmul.f32 %v733_v1, %v660_v62 }
  0x4b   :  { %526 = vst [vmem:[%s1349_s4 + $0x1a8] sm:$0xff] %v462_v56  ;;  %v209_v14 = vmul.f32 %v733_v1, %v663_v6  ;;  %v210_v15 = vmul.f32 %v733_v1, %v664_v7  ;;  %v667_v16 = vunpack.c.l.bf16 %v699_v63  ;;  %v668_v17 = vunpack.c.h.bf16 %v699_v63 }
  0x4c   :  { %527 = vst [vmem:[%s1349_s4 + $0x1b0] sm:$0xff] %v463_v0  ;;  %v401_v18 = vadd.f32 %v337_v4, %v273_v8  ;;  %v402_v19 = vadd.f32 %v338_v5, %v274_v9  ;;  %v275_v20 = vadd.f32 %v738_v3, %v207_v10  ;;  %v276_v21 = vadd.f32 %v738_v3, %v208_v11 }
  0x4d   :  { %528 = vst [vmem:[%s1349_s4 + $0x1b8] sm:$0xff] %v464_v2  ;;  %v277_v24 = vadd.f32 %v738_v3, %v209_v14  ;;  %v278_v25 = vadd.f32 %v738_v3, %v210_v15  ;;  %v211_v26 = vmul.f32 %v733_v1, %v667_v16  ;;  %v212_v27 = vmul.f32 %v733_v1, %v668_v17 }
  0x4e   :  { %v465_v28 = vmax.f32 %v401_v18, 0.0  ;;  %v466_v29 = vmax.f32 %v402_v19, 0.0  ;;  %v403_v30 = vadd.f32 %v339_v12, %v275_v20  ;;  %v404_v31 = vadd.f32 %v340_v13, %v276_v21 }
  0x4f   :  { %v405_v34 = vadd.f32 %v341_v22, %v277_v24  ;;  %v406_v35 = vadd.f32 %v342_v23, %v278_v25  ;;  %v279_v36 = vadd.f32 %v738_v3, %v211_v26  ;;  %v280_v37 = vadd.f32 %v738_v3, %v212_v27 }
  0x50   :  { %529 = vst [vmem:[%s1349_s4 + $0x1c0] sm:$0xff] %v465_v28  ;;  %v467_v1 = vmax.f32 %v403_v30, 0.0  ;;  %v468_v38 = vmax.f32 %v404_v31, 0.0 }
  0x51   :  { %530 = vst [vmem:[%s1349_s4 + $0x1c8] sm:$0xff] %v466_v29  ;;  %v469_v39 = vmax.f32 %v405_v34, 0.0  ;;  %v470_v40 = vmax.f32 %v406_v35, 0.0  ;;  %v407_v41 = vadd.f32 %v343_v32, %v279_v36  ;;  %v408_v42 = vadd.f32 %v344_v33, %v280_v37 }
  0x52   :  { %531 = vst [vmem:[%s1349_s4 + $0x1d0] sm:$0xff] %v467_v1 }
  0x53   :  { %532 = vst [vmem:[%s1349_s4 + $0x1d8] sm:$0xff] %v468_v38  ;;  %v471_v3 = vmax.f32 %v407_v41, 0.0  ;;  %v472_v43 = vmax.f32 %v408_v42, 0.0 }
  0x54   :  { %533 = vst [vmem:[%s1349_s4 + $0x1e0] sm:$0xff] %v469_v39 }
  0x55   :  { %534 = vst [vmem:[%s1349_s4 + $0x1e8] sm:$0xff] %v470_v40 }
  0x56   :  { %535 = vst [vmem:[%s1349_s4 + $0x1f0] sm:$0xff] %v471_v3 }
  0x57   :  { %536 = vst [vmem:[%s1349_s4 + $0x1f8] sm:$0xff] %v472_v43 }

// kernel: bottleneck_forward.5
= control target key start
LH: loop header
LB: loop body
LE: loop exit
PB: predicated region body
PF: predicated region fallthrough
CT: control target
= control target key end

     0   :  { %s3545_s18 = smov 0   ;;  %s4414_s0 = inlined_call_operand.vmem [shape: bf16[2,16,16,128], index: 0, kind: input, shape index: {}]   ;;  %s4415_s1 = inlined_call_operand.vmem [shape: f32[1,128], index: 1, kind: input, shape index: {}]   ;;  %s4416_s2 = inlined_call_operand.vmem [shape: f32[1,128], index: 2, kind: input, shape index: {}]   ;;  %s4417_s3 = inlined_call_operand.vmem [shape: bf16[9,128,128], index: 3, kind: input, shape index: {}]   ;;  %s4418_s4 = inlined_call_operand.vmem [shape: bf16[2,16,16,128], index: 4, kind: output, shape index: {0}]   ;;  %s4419_s5 = inlined_call_operand.vmem [shape: f32[2,2,128], index: 5, kind: output, shape index: {1}]  }
   0x1 LB: > { %s2791_s19 = sadd.s32 4294967295, %s3511_s18   ;;  %p2795_p0 = scmp.ge.s32.totalorder %s3511_s18, 1  ;;  %s3511_s18 = sphi %s3545_s18, %s16_s18  }
   0x2   : > { %p190_p1 = scmp.lt.s32.totalorder %s3511_s18, 3 }
   0x4   : > { %p191_p2 = pnand %p2795_p0, %p190_p1 }
   0x6   : > { %194 = sbr.rel (%p191_p2) target bundleno = 766 (0x2fe), region = 36 }
   0xb   : > { %v3236_v0 = vld [vmem:[%s4417_s3 + $0x78] sm:$0xff]  ;;  %p222_p3 = scmp.lt.s32.totalorder %s2791_s19, 1  ;;  %v3513_v1 = vmov 0.0   ;;  %v3235_v2 = vld [vmem:[%s4417_s3 + $0x70] sm:$0xff]  ;;  %v3575_v3 = vld [vmem:[%s4415_s1] ss:$0 sm:$0xff] }
   0xc   : > { %416 = vst [vmem:[#allocation2 + $0x60] sm:$0xff] %v3513_v1  ;;  %3467 = vmatpush.bf16.msra.mxu1 %v3236_v0  ;;  %3468 = vmatpush.bf16.msra.mxu2 %v3236_v0  ;;  %v3234_v4 = vld [vmem:[%s4417_s3 + $0x68] sm:$0xff]  ;;  %v3586_v8 = vld [vmem:[%s4416_s2] ss:$0 sm:$0xff]  ;;  %v3232_v19 = vld [vmem:[%s4417_s3 + $0x58] sm:$0xff] }
   0xd   : > { %s4440_s19 = smov (!%p222_p3, %s2791_s19), 1  ;;  %417 = vst [vmem:[#allocation2 + $0x68] sm:$0xff] %v3513_v1  ;;  %3469 = vmatpush.bf16.msra.mxu3 %v3236_v0  ;;  %668 = vmatpush.bf16.msra.mxu0 %v3236_v0  ;;  %v3233_v11 = vld [vmem:[%s4417_s3 + $0x60] sm:$0xff]  ;;  %v3231_v25 = vld [vmem:[%s4417_s3 + $0x50] sm:$0xff]  ;;  %v3230_v30 = vld [vmem:[%s4417_s3 + $0x48] sm:$0xff] }
   0xe   : > { %s3219_s24 = sshll.u32 %s4440_s19, 7  ;;  %418 = vst [vmem:[#allocation2 + $0x70] sm:$0x3] %v3513_v1  ;;  %v3229_v38 = vld [vmem:[%s4417_s3 + $0x40] sm:$0xff]  ;;  %v3244_v49 = vld [vmem:[%s4417_s3 + $0xb8] sm:$0xff]  ;;  %v3243_v60 = vld [vmem:[%s4417_s3 + $0xb0] sm:$0xff] }
   0xf   : > { %s3570_s27 = scalar_lea.vmem %s4414_s0, %s3219_s24  ;;  %404 = vst [vmem:[#allocation2] sm:$0xff] %v3513_v1  ;;  %v3252_v50 = vld [vmem:[%s4417_s3 + $0xf8] sm:$0xff]  ;;  %v3251_v61 = vld [vmem:[%s4417_s3 + $0xf0] sm:$0xff]  ;;  %s4354_s30 = scalar_lea.vmem %s4418_s4, %s3219_s24 }
  0x10   : > { %3470 = vmatpush.bf16.msra.mxu1 %v3235_v2  ;;  %3471 = vmatpush.bf16.msra.mxu2 %v3235_v2  ;;  %v3439_v5 = vld [vmem:[%s3570_s27 + $0x18] sm:$0xff]   ;;  %405 = vst [vmem:[#allocation2 + $0x8] sm:$0xff] %v3513_v1  ;;  %v3440_v37 = vld [vmem:[%s3570_s27 + $0x20] sm:$0xff]   ;;  %s2800_s24 = sshll.u32 %s4440_s19, 1 }
  0x11   : > { %3472 = vmatpush.bf16.msra.mxu3 %v3235_v2  ;;  %669 = vmatpush.bf16.msra.mxu0 %v3235_v2  ;;  %v3307_v6 = vunpack.c.l.bf16 %v3439_v5  ;;  %v3308_v7 = vunpack.c.h.bf16 %v3439_v5  ;;  %406 = vst [vmem:[#allocation2 + $0x10] sm:$0x3] %v3513_v1  ;;  %v3443_v12 = vld [vmem:[%s3570_s27 + $0x38] sm:$0xff]   ;;  %v3444_v41 = vld [vmem:[%s3570_s27 + $0x40] sm:$0xff]   ;;  %v3311_v46 = vunpack.c.l.bf16 %v3440_v37  ;;  %v3312_v47 = vunpack.c.h.bf16 %v3440_v37  ;;  %v3445_v37 = vld [vmem:[%s3570_s27 + $0x48] sm:$0xff]   ;;  %s235_s8 = scalar_lea.vmem %s4419_s5, %s2800_s24 }
  0x12   : > { %407 = vst [vmem:[#allocation2 + $0x18] sm:$0xff] %v3513_v1  ;;  %v3447_v15 = vld [vmem:[%s3570_s27 + $0x58] sm:$0xff]   ;;  %v3323_v17 = vunpack.c.l.bf16 %v3443_v12  ;;  %v3324_v18 = vunpack.c.h.bf16 %v3443_v12  ;;  %v3448_v42 = vld [vmem:[%s3570_s27 + $0x60] sm:$0xff]   ;;  %v3327_v51 = vunpack.c.l.bf16 %v3444_v41  ;;  %v3328_v52 = vunpack.c.h.bf16 %v3444_v41 }
  0x13   : > { %v311_v9 = vmul.f32 %v3575_v3, %v3307_v6  ;;  %v312_v10 = vmul.f32 %v3575_v3, %v3308_v7  ;;  %408 = vst [vmem:[#allocation2 + $0x20] sm:$0xff] %v3513_v1  ;;  %v3339_v21 = vunpack.c.l.bf16 %v3447_v15  ;;  %v3340_v22 = vunpack.c.h.bf16 %v3447_v15  ;;  %v3294_v43 = vld [vmem:[%s3570_s27] sm:$0xff]   ;;  %v3228_v58 = vld [vmem:[%s4417_s3 + $0x38] sm:$0xff] }
  0x14   : > { %3473 = vmatpush.bf16.msra.mxu1 %v3234_v4  ;;  %3474 = vmatpush.bf16.msra.mxu2 %v3234_v4  ;;  %409 = vst [vmem:[#allocation2 + $0x28] sm:$0x3] %v3513_v1  ;;  %v319_v23 = vmul.f32 %v3575_v3, %v3323_v17  ;;  %v320_v24 = vmul.f32 %v3575_v3, %v3324_v18  ;;  %v3343_v53 = vunpack.c.l.bf16 %v3448_v42  ;;  %v3344_v55 = vunpack.c.h.bf16 %v3448_v42  ;;  %v3260_v59 = vld [vmem:[%s4417_s3 + $0x138] sm:$0xff]  ;;  %v3259_v17 = vld [vmem:[%s4417_s3 + $0x130] sm:$0xff] }
  0x15   : > { %3475 = vmatpush.bf16.msra.mxu3 %v3234_v4  ;;  %670 = vmatpush.bf16.msra.mxu0 %v3234_v4  ;;  %v3599_v13 = vadd.f32 %v3586_v8, %v311_v9  ;;  %v3602_v14 = vadd.f32 %v3586_v8, %v312_v10  ;;  %410 = vst [vmem:[#allocation2 + $0x30] sm:$0xff] %v3513_v1  ;;  %v3295_v56 = vunpack.c.l.bf16 %v3294_v43  ;;  %v3296_v57 = vunpack.c.h.bf16 %v3294_v43  ;;  %v3227_v9 = vld [vmem:[%s4417_s3 + $0x30] sm:$0xff]  ;;  %v3449_v43 = vld [vmem:[%s3570_s27 + $0x68] sm:$0xff]  }
  0x16   : > { %411 = vst [vmem:[#allocation2 + $0x38] sm:$0xff] %v3513_v1  ;;  %v327_v26 = vmul.f32 %v3575_v3, %v3339_v21  ;;  %v328_v27 = vmul.f32 %v3575_v3, %v3340_v22  ;;  %v3627_v28 = vadd.f32 %v3586_v8, %v319_v23  ;;  %v3630_v29 = vadd.f32 %v3586_v8, %v320_v24  ;;  %v3226_v21 = vld [vmem:[%s4417_s3 + $0x28] sm:$0xff]  ;;  %v3241_v24 = vld [vmem:[%s4417_s3 + $0xa0] sm:$0xff] }
  0x17   : > { %v378_v16 = vmax.f32 %v3599_v13, 0.0  ;;  %412 = vst [vmem:[#allocation2 + $0x40] sm:$0x3] %v3513_v1  ;;  %v379_v20 = vmax.f32 %v3602_v14, 0.0  ;;  %v555_v35 = vld [vmem:[#allocation2 + $0x1] sm:$0xff]  ;;  %v313_v62 = vmul.f32 %v3575_v3, %v3311_v46  ;;  %v314_v63 = vmul.f32 %v3575_v3, %v3312_v47 }
  0x18   : > { %3476 = vmatpush.bf16.msra.mxu1 %v3233_v11  ;;  %3477 = vmatpush.bf16.msra.mxu2 %v3233_v11  ;;  %413 = vst [vmem:[#allocation2 + $0x48] sm:$0xff] %v3513_v1  ;;  %v3637_v31 = vadd.f32 %v3586_v8, %v327_v26  ;;  %v3640_v32 = vadd.f32 %v3586_v8, %v328_v27  ;;  %v386_v33 = vmax.f32 %v3627_v28, 0.0  ;;  %v387_v34 = vmax.f32 %v3630_v29, 0.0  ;;  %v556_v36 = vld [vmem:[#allocation2 + $0x9] sm:$0xff]  ;;  %v3253_v28 = vld [vmem:[%s4417_s3 + $0x100] sm:$0xff] }
  0x19   : > { %3478 = vmatpush.bf16.msra.mxu3 %v3233_v11  ;;  %671 = vmatpush.bf16.msra.mxu0 %v3233_v11  ;;  %465 = vst [vmem:[#allocation2 + $0x61] sm:$0xff] %v378_v16  ;;  %v3658_v44 = vpack.c.bf16 %v379_v20, %v378_v16  ;;  %v587_v45 = vpack.c.bf16 %v556_v36, %v555_v35  ;;  %v3242_v11 = vld [vmem:[%s4417_s3 + $0xa8] sm:$0xff] }
  0x1a   : > { %466 = vst [vmem:[#allocation2 + $0x69] sm:$0xff] %v379_v20  ;;  %v394_v39 = vmax.f32 %v3637_v31, 0.0  ;;  %v395_v40 = vmax.f32 %v3640_v32, 0.0  ;;  %v595_v48 = vpack.c.bf16 %v387_v34, %v386_v33  ;;  %v321_v0 = vmul.f32 %v3575_v3, %v3327_v51  ;;  %v3250_v16 = vld [vmem:[%s4417_s3 + $0xe8] sm:$0xff]  ;;  %v3240_v51 = vld [vmem:[%s4417_s3 + $0x98] sm:$0xff] }
  0x1b   : > { %414 = vst [vmem:[#allocation2 + $0x50] sm:$0xff] %v3513_v1  ;;  %v322_v2 = vmul.f32 %v3575_v3, %v3328_v52  ;;  %v329_v4 = vmul.f32 %v3575_v3, %v3343_v53  ;;  %v330_v5 = vmul.f32 %v3575_v3, %v3344_v55  ;;  %v305_v6 = vmul.f32 %v3575_v3, %v3295_v56  ;;  %v3258_v22 = vld [vmem:[%s4417_s3 + $0x128] sm:$0xff]  ;;  %v3248_v56 = vld [vmem:[%s4417_s3 + $0xd8] sm:$0xff] }
  0x1c   : > { %3479 = vmatpush.bf16.msra.mxu1 %v3232_v19  ;;  %3480 = vmatpush.bf16.msra.mxu2 %v3232_v19  ;;  %415 = vst [vmem:[#allocation2 + $0x58] sm:$0x3] %v3513_v1  ;;  %v599_v54 = vpack.c.bf16 %v395_v40, %v394_v39  ;;  %v306_v7 = vmul.f32 %v3575_v3, %v3296_v57  ;;  %v3441_v26 = vld [vmem:[%s3570_s27 + $0x28] sm:$0xff]   ;;  %v3348_v55 = vunpack.c.h.bf16 %v3449_v43  ;;  %v3257_v57 = vld [vmem:[%s4417_s3 + $0x120] sm:$0xff] }
  0x1d   : > { %3481 = vmatpush.bf16.msra.mxu3 %v3232_v19  ;;  %672 = vmatpush.bf16.msra.mxu0 %v3232_v19  ;;  %419 = vst [vmem:[#allocation2 + $0x78] sm:$0xff] %v3513_v1  ;;  %v3708_v10 = vadd.f32 %v3586_v8, %v313_v62  ;;  %v3715_v12 = vadd.f32 %v3586_v8, %v314_v63  ;;  %v3315_v46 = vunpack.c.l.bf16 %v3441_v26  ;;  %v3437_v47 = vld [vmem:[%s3570_s27 + $0x8] sm:$0xff]   ;;  %v3224_v63 = vld [vmem:[%s4417_s3 + $0x18] sm:$0xff] }
  0x1e   : > { %420 = vst [vmem:[#allocation2 + $0x80] sm:$0xff] %v3513_v1  ;;  %v3718_v13 = vadd.f32 %v3586_v8, %v321_v0  ;;  %v3721_v14 = vadd.f32 %v3586_v8, %v322_v2  ;;  %v3724_v15 = vadd.f32 %v3586_v8, %v329_v4  ;;  %v3734_v18 = vadd.f32 %v3586_v8, %v330_v5  ;;  %v3256_v0 = vld [vmem:[%s4417_s3 + $0x118] sm:$0xff] }
  0x1f   : > { %421 = vst [vmem:[#allocation2 + $0x88] sm:$0x3] %v3513_v1  ;;  %v3737_v19 = vadd.f32 %v3586_v8, %v305_v6  ;;  %v3740_v20 = vadd.f32 %v3586_v8, %v306_v7  ;;  %v380_v23 = vmax.f32 %v3708_v10, 0.0  ;;  %v381_v27 = vmax.f32 %v3715_v12, 0.0  ;;  %v3239_v6 = vld [vmem:[%s4417_s3 + $0x90] sm:$0xff] }
  0x20   : > { %3482 = vmatpush.bf16.msra.mxu1 %v3231_v25  ;;  %3483 = vmatpush.bf16.msra.mxu2 %v3231_v25  ;;  %422 = vst [vmem:[#allocation2 + $0x90] sm:$0xff] %v3513_v1  ;;  %v389_v35 = vmax.f32 %v3721_v14, 0.0  ;;  %v396_v36 = vmax.f32 %v3724_v15, 0.0  ;;  %v315_v62 = vmul.f32 %v3575_v3, %v3315_v46  ;;  %v3247_v7 = vld [vmem:[%s4417_s3 + $0xd0] sm:$0xff]  ;;  %v3246_v46 = vld [vmem:[%s4417_s3 + $0xc8] sm:$0xff]  ;;  %v3268_v15 = vld [vmem:[%s4417_s3 + $0x178] sm:$0xff] }
  0x21   : > { %3484 = vmatpush.bf16.msra.mxu3 %v3231_v25  ;;  %673 = vmatpush.bf16.msra.mxu0 %v3231_v25  ;;  %423 = vst [vmem:[#allocation2 + $0x98] sm:$0xff] %v3513_v1  ;;  %v3249_v25 = vld [vmem:[%s4417_s3 + $0xe0] sm:$0xff]  ;;  %v372_v41 = vmax.f32 %v3737_v19, 0.0  ;;  %v373_v42 = vmax.f32 %v3740_v20, 0.0  ;;  %v3783_v52 = vpack.c.bf16 %v381_v27, %v380_v23 }
  0x22   : > { %424 = vst [vmem:[#allocation2 + $0xa0] sm:$0x3] %v3513_v1 }
  0x23   : > { %425 = vst [vmem:[#allocation2 + $0xa8] sm:$0xff] %v3513_v1 }
  0x24   : > { %3485 = vmatpush.bf16.msra.mxu1 %v3230_v30  ;;  %3486 = vmatpush.bf16.msra.mxu2 %v3230_v30  ;;  %426 = vst [vmem:[#allocation2 + $0xb0] sm:$0xff] %v3513_v1 }
  0x25   : > { %3487 = vmatpush.bf16.msra.mxu3 %v3230_v30  ;;  %674 = vmatpush.bf16.msra.mxu0 %v3230_v30  ;;  %427 = vst [vmem:[#allocation2 + $0xb8] sm:$0x3] %v3513_v1  ;;  %v388_v30 = vmax.f32 %v3718_v13, 0.0 }
  0x26   : > { %428 = vst [vmem:[#allocation2 + $0xc0] sm:$0xff] %v3513_v1 }
  0x27   : > { %429 = vst [vmem:[#allocation2 + $0xc8] sm:$0xff] %v3513_v1  ;;  %v3789_v53 = vpack.c.bf16 %v389_v35, %v388_v30 }
  0x28   : > { %3488 = vmatpush.bf16.msra.mxu1 %v3229_v38  ;;  %3489 = vmatpush.bf16.msra.mxu2 %v3229_v38  ;;  %430 = vst [vmem:[#allocation2 + $0xd0] sm:$0x3] %v3513_v1 }
  0x29   : > { %3490 = vmatpush.bf16.msra.mxu3 %v3229_v38  ;;  %675 = vmatpush.bf16.msra.mxu0 %v3229_v38  ;;  %431 = vst [vmem:[#allocation2 + $0xd8] sm:$0xff] %v3513_v1  ;;  %v397_v38 = vmax.f32 %v3734_v18, 0.0 }
  0x2a   : > { %432 = vst [vmem:[#allocation2 + $0xe0] sm:$0xff] %v3513_v1 }
  0x2b   : > { %696 = vmatmul.bf16.vlgmr.msra.gmra.mxu1 %v3658_v44  ;;  %433 = vst [vmem:[#allocation2 + $0xe8] sm:$0x3] %v3513_v1  ;;  %716 = vmatmul.bf16.vlgmr.msra.gmra.mxu2 %v595_v48  ;;  %v3316_v48 = vunpack.c.h.bf16 %v3441_v26 }
  0x2c   : > { %1007 = vmatpush.bf16.msrb.mxu2 %v3244_v49  ;;  %434 = vst [vmem:[#allocation2 + $0xf0] sm:$0xff] %v3513_v1  ;;  %736 = vmatmul.bf16.vlgmr.msra.gmra.mxu3 %v599_v54  ;;  %v3331_v49 = vunpack.c.l.bf16 %v3445_v37  ;;  %v3347_v54 = vunpack.c.l.bf16 %v3449_v43 }
  0x2d   : > { %1241 = vmatpush.bf16.msrb.mxu3 %v3252_v50  ;;  %676 = vmatmul.bf16.vlgmr.msra.gmra.mxu0 %v587_v45  ;;  %435 = vst [vmem:[#allocation2 + $0xf8] sm:$0xff] %v3513_v1  ;;  %v3225_v45 = vld [vmem:[%s4417_s3 + $0x20] sm:$0xff]  ;;  %v3332_v50 = vunpack.c.h.bf16 %v3445_v37  ;;  %v316_v2 = vmul.f32 %v3575_v3, %v3316_v48  ;;  %v3238_v37 = vld [vmem:[%s4417_s3 + $0x88] sm:$0xff] }
  0x2e   : > { %805 = vmatpush.bf16.msrb.mxu1 %v3228_v58  ;;  %1475 = vmatpush.bf16.msrb.mxu0 %v3260_v59  ;;  %436 = vst [vmem:[#allocation2 + $0x100] sm:$0x3] %v3513_v1  ;;  %v600_v58 = vpack.c.bf16 %v397_v38, %v396_v36  ;;  %v3806_v59 = vpack.c.bf16 %v373_v42, %v372_v41 }
  0x2f   : > { %437 = vst [vmem:[#allocation2 + $0x108] sm:$0xff] %v3513_v1  ;;  %v323_v4 = vmul.f32 %v3575_v3, %v3331_v49  ;;  %v324_v5 = vmul.f32 %v3575_v3, %v3332_v50 }
  0x30   : > { %1008 = vmatpush.bf16.msrb.mxu2 %v3243_v60  ;;  %438 = vst [vmem:[#allocation2 + $0x110] sm:$0xff] %v3513_v1  ;;  %v3299_v60 = vunpack.c.l.bf16 %v3437_v47 }
  0x31   : > { %1242 = vmatpush.bf16.msrb.mxu3 %v3251_v61  ;;  %439 = vst [vmem:[#allocation2 + $0x118] sm:$0x3] %v3513_v1  ;;  %v3300_v61 = vunpack.c.h.bf16 %v3437_v47  ;;  %v3850_v26 = vadd.f32 %v3586_v8, %v324_v5  ;;  %v3255_v47 = vld [vmem:[%s4417_s3 + $0x110] sm:$0xff] }
  0x32   : > { %806 = vmatpush.bf16.msrb.mxu1 %v3227_v9  ;;  %1476 = vmatpush.bf16.msrb.mxu0 %v3259_v17  ;;  %440 = vst [vmem:[#allocation2 + $0x120] sm:$0xff] %v3513_v1  ;;  %v331_v9 = vmul.f32 %v3575_v3, %v3347_v54  ;;  %v3254_v54 = vld [vmem:[%s4417_s3 + $0x108] sm:$0xff]  ;;  %v3450_v5 = vld [vmem:[%s3570_s27 + $0x70] sm:$0xff]  }
  0x33   : > { %441 = vst [vmem:[#allocation2 + $0x128] sm:$0xff] %v3513_v1  ;;  %v308_v17 = vmul.f32 %v3575_v3, %v3300_v61 }
  0x34   : > { %1009 = vmatpush.bf16.msrb.mxu2 %v3242_v11  ;;  %442 = vst [vmem:[#allocation2 + $0x130] sm:$0x3] %v3513_v1  ;;  %v332_v11 = vmul.f32 %v3575_v3, %v3348_v55  ;;  %v3857_v43 = vadd.f32 %v3586_v8, %v331_v9 }
  0x35   : > { %1243 = vmatpush.bf16.msrb.mxu3 %v3250_v16  ;;  %443 = vst [vmem:[#allocation2 + $0x138] sm:$0xff] %v3513_v1  ;;  %v307_v16 = vmul.f32 %v3575_v3, %v3299_v60  ;;  %v3873_v49 = vadd.f32 %v3586_v8, %v308_v17  ;;  %v3245_v60 = vld [vmem:[%s4417_s3 + $0xc0] sm:$0xff]  ;;  %v3352_v17 = vunpack.c.h.bf16 %v3450_v5 }
  0x36   : > { %807 = vmatpush.bf16.msrb.mxu1 %v3226_v21  ;;  %1477 = vmatpush.bf16.msrb.mxu0 %v3258_v22  ;;  %444 = vst [vmem:[#allocation2 + $0x140] sm:$0xff] %v3513_v1  ;;  %v3837_v21 = vadd.f32 %v3586_v8, %v315_v62  ;;  %v3223_v22 = vld [vmem:[%s4417_s3 + $0x10] sm:$0xff]  ;;  %v398_v61 = vmax.f32 %v3857_v43, 0.0 }
  0x37   : > { %445 = vst [vmem:[#allocation2 + $0x148] sm:$0x3] %v3513_v1  ;;  %v3870_v48 = vadd.f32 %v3586_v8, %v307_v16  ;;  %v334_v13 = vmul.f32 %v3575_v3, %v3352_v17  ;;  %v3274_v17 = vld [vmem:[%s4417_s3 + $0x1a8] sm:$0xff] }
  0x38   : > { %1010 = vmatpush.bf16.msrb.mxu2 %v3241_v24  ;;  %446 = vst [vmem:[#allocation2 + $0x150] sm:$0xff] %v3513_v1  ;;  %v3844_v24 = vadd.f32 %v3586_v8, %v316_v2  ;;  %v382_v50 = vmax.f32 %v3837_v21, 0.0  ;;  %v375_v2 = vmax.f32 %v3873_v49, 0.0 }
  0x39   : > { %1244 = vmatpush.bf16.msrb.mxu3 %v3249_v25  ;;  %447 = vst [vmem:[#allocation2 + $0x158] sm:$0xff] %v3513_v1  ;;  %v3847_v25 = vadd.f32 %v3586_v8, %v323_v4  ;;  %v3446_v4 = vld [vmem:[%s3570_s27 + $0x50] sm:$0xff]  }
  0x3a   : > { %808 = vmatpush.bf16.msrb.mxu1 %v3225_v45  ;;  %1478 = vmatpush.bf16.msrb.mxu0 %v3257_v57  ;;  %448 = vst [vmem:[#allocation2 + $0x160] sm:$0x3] %v3513_v1  ;;  %v3860_v45 = vadd.f32 %v3586_v8, %v332_v11  ;;  %v383_v55 = vmax.f32 %v3844_v24, 0.0  ;;  %v391_v57 = vmax.f32 %v3850_v26, 0.0  ;;  %v3336_v9 = vunpack.c.h.bf16 %v3446_v4 }
  0x3b   : > { %449 = vst [vmem:[#allocation2 + $0x168] sm:$0xff] %v3513_v1  ;;  %701 = vmatmul.bf16.gmra.mxu1 %v3783_v52  ;;  %721 = vmatmul.bf16.gmra.mxu2 %v3789_v53  ;;  %v3351_v11 = vunpack.c.l.bf16 %v3450_v5 }
  0x3c   : > { %1011 = vmatpush.bf16.msrb.mxu2 %v3240_v51  ;;  %450 = vst [vmem:[#allocation2 + $0x170] sm:$0xff] %v3513_v1  ;;  %741 = vmatmul.bf16.gmra.mxu3 %v600_v58  ;;  %v3222_v51 = vld [vmem:[%s4417_s3 + $0x8] sm:$0xff]  ;;  %v3237_v58 = vld [vmem:[%s4417_s3 + $0x80] sm:$0xff]  ;;  %v399_v62 = vmax.f32 %v3860_v45, 0.0  ;;  %v3918_v29 = vpack.c.bf16 %v383_v55, %v382_v50  ;;  %v326_v12 = vmul.f32 %v3575_v3, %v3336_v9 }
  0x3d   : > { %1245 = vmatpush.bf16.msrb.mxu3 %v3248_v56  ;;  %681 = vmatmul.bf16.gmra.mxu0 %v3806_v59  ;;  %451 = vst [vmem:[#allocation2 + $0x178] sm:$0x3] %v3513_v1  ;;  %v390_v56 = vmax.f32 %v3847_v25, 0.0  ;;  %v894_v45 = vld [vmem:[#allocation2 + $0x2] sm:$0xff] }
  0x3e   : > { %809 = vmatpush.bf16.msrb.mxu1 %v3224_v63  ;;  %1479 = vmatpush.bf16.msrb.mxu0 %v3256_v0  ;;  %452 = vst [vmem:[#allocation2 + $0x180] sm:$0xff] %v3513_v1  ;;  %v3442_v63 = vld [vmem:[%s3570_s27 + $0x30] sm:$0xff]   ;;  %v374_v0 = vmax.f32 %v3870_v48, 0.0  ;;  %v601_v31 = vpack.c.bf16 %v399_v62, %v398_v61  ;;  %v361_v18 = vadd.f32 %v3586_v8, %v326_v12  ;;  %v1135_v12 = vld [vmem:[#allocation2 + $0x68] sm:$0xff] }
  0x3f   : > { %453 = vst [vmem:[#allocation2 + $0x188] sm:$0xff] %v3513_v1  ;;  %v895_v48 = vld [vmem:[#allocation2 + $0xa] sm:$0xff] }
  0x40   : > { %1012 = vmatpush.bf16.msrb.mxu2 %v3239_v6  ;;  %454 = vst [vmem:[#allocation2 + $0x190] sm:$0x3] %v3513_v1  ;;  %v3438_v6 = vld [vmem:[%s3570_s27 + $0x10] sm:$0xff]   ;;  %v3938_v16 = vpack.c.bf16 %v375_v2, %v374_v0 }
  0x41   : > { %1246 = vmatpush.bf16.msrb.mxu3 %v3247_v7  ;;  %455 = vst [vmem:[#allocation2 + $0x198] sm:$0xff] %v3513_v1  ;;  %v3320_v7 = vunpack.c.h.bf16 %v3442_v63  ;;  %v3303_v32 = vunpack.c.l.bf16 %v3438_v6 }
  0x42   : > { %810 = vmatpush.bf16.msrb.mxu1 %v3223_v22  ;;  %1480 = vmatpush.bf16.msrb.mxu0 %v3255_v47  ;;  %456 = vst [vmem:[#allocation2 + $0x1a0] sm:$0xff] %v3513_v1 }
  0x43   : > { %457 = vst [vmem:[#allocation2 + $0x1a8] sm:$0x3] %v3513_v1  ;;  %v3221_v1 = vld [vmem:[%s4417_s3] sm:$0xff]  ;;  %v309_v14 = vmul.f32 %v3575_v3, %v3303_v32  ;;  %v3266_v32 = vld [vmem:[%s4417_s3 + $0x168] sm:$0xff] }
  0x44   : > { %1013 = vmatpush.bf16.msrb.mxu2 %v3238_v37  ;;  %473 = vst [vmem:[#allocation2 + $0xc1] sm:$0xff] %v386_v33  ;;  %v3924_v33 = vpack.c.bf16 %v391_v57, %v390_v56  ;;  %v3284_v37 = vld [vmem:[%s4417_s3 + $0x1f8] sm:$0xff] }
  0x45   : > { %1247 = vmatpush.bf16.msrb.mxu3 %v3246_v46  ;;  %474 = vst [vmem:[#allocation2 + $0xc9] sm:$0xff] %v387_v34  ;;  %v3319_v34 = vunpack.c.l.bf16 %v3442_v63  ;;  %v3283_v63 = vld [vmem:[%s4417_s3 + $0x1f0] sm:$0xff] }
  0x46   : > { %811 = vmatpush.bf16.msrb.mxu1 %v3222_v51  ;;  %1481 = vmatpush.bf16.msrb.mxu0 %v3254_v54  ;;  %481 = vst [vmem:[#allocation2 + $0x121] sm:$0xff] %v394_v39  ;;  %v3335_v39 = vunpack.c.l.bf16 %v3446_v4  ;;  %v393_v51 = vmax.f32 %v361_v18, 0.0 }
  0x47   : > { %482 = vst [vmem:[#allocation2 + $0x129] sm:$0xff] %v395_v40  ;;  %v3304_v40 = vunpack.c.h.bf16 %v3438_v6  ;;  %v317_v10 = vmul.f32 %v3575_v3, %v3319_v34 }
  0x48   : > { %1014 = vmatpush.bf16.msrb.mxu2 %v3237_v58  ;;  %467 = vst [vmem:[#allocation2 + $0x79] sm:$0xff] %v380_v23  ;;  %v318_v23 = vmul.f32 %v3575_v3, %v3320_v7  ;;  %v325_v22 = vmul.f32 %v3575_v3, %v3335_v39 }
  0x49   : > { %1248 = vmatpush.bf16.msrb.mxu3 %v3245_v60  ;;  %468 = vst [vmem:[#allocation2 + $0x81] sm:$0xff] %v381_v27  ;;  %v333_v27 = vmul.f32 %v3575_v3, %v3351_v11 }
  0x4a   : > { %812 = vmatpush.bf16.msrb.mxu1 %v3221_v1  ;;  %1482 = vmatpush.bf16.msrb.mxu0 %v3253_v28  ;;  %475 = vst [vmem:[#allocation2 + $0xd9] sm:$0xff] %v388_v30  ;;  %v310_v30 = vmul.f32 %v3575_v3, %v3304_v40  ;;  %v352_v3 = vadd.f32 %v3586_v8, %v317_v10  ;;  %v3290_v40 = vld [vmem:[%s4417_s3 + $0x228] sm:$0xff] }
  0x4b   : > { %476 = vst [vmem:[#allocation2 + $0xe1] sm:$0xff] %v389_v35  ;;  %706 = vmatmul.bf16.gmra.mxu1 %v3918_v29  ;;  %726 = vmatmul.bf16.gmra.mxu2 %v3924_v33  ;;  %v3276_v35 = vld [vmem:[%s4417_s3 + $0x1b8] sm:$0xff]  ;;  %v353_v46 = vadd.f32 %v3586_v8, %v318_v23  ;;  %v360_v47 = vadd.f32 %v3586_v8, %v325_v22  ;;  %v1134_v22 = vld [vmem:[#allocation2 + $0x60] sm:$0xff] }
  0x4c   : > { %483 = vst [vmem:[#allocation2 + $0x139] sm:$0xff] %v396_v36  ;;  %746 = vmatmul.bf16.gmra.mxu3 %v601_v31  ;;  %v3292_v36 = vld [vmem:[%s4417_s3 + $0x238] sm:$0xff]  ;;  %1944 = vmatpush.bf16.msra.mxu2 %v3276_v35  ;;  %v368_v19 = vadd.f32 %v3586_v8, %v333_v27  ;;  %v345_v20 = vadd.f32 %v3586_v8, %v310_v30  ;;  %v903_v30 = vld [vmem:[#allocation2 + $0x6a] sm:$0xff] }
  0x4d   : > { %686 = vmatmul.bf16.gmra.mxu0 %v3938_v16  ;;  %484 = vst [vmem:[#allocation2 + $0x141] sm:$0xff] %v397_v38  ;;  %2178 = vmatpush.bf16.msra.mxu3 %v3284_v37  ;;  %v369_v38 = vadd.f32 %v3586_v8, %v334_v13  ;;  %v385_v21 = vmax.f32 %v353_v46, 0.0  ;;  %v1163_v13 = vpack.c.bf16 %v1135_v12, %v1134_v22 }
  0x4e   : > { %459 = vst [vmem:[#allocation2 + $0x19] sm:$0xff] %v372_v41  ;;  %1709 = vmatpush.bf16.msra.mxu1 %v3268_v15  ;;  %2412 = vmatpush.bf16.msra.mxu0 %v3292_v36  ;;  %v344_v41 = vadd.f32 %v3586_v8, %v309_v14  ;;  %v400_v54 = vmax.f32 %v368_v19, 0.0  ;;  %v377_v8 = vmax.f32 %v345_v20, 0.0  ;;  %v902_v14 = vld [vmem:[#allocation2 + $0x62] sm:$0xff] }
  0x4f   : > { %460 = vst [vmem:[#allocation2 + $0x21] sm:$0xff] %v373_v42  ;;  %v384_v42 = vmax.f32 %v352_v3, 0.0  ;;  %v401_v58 = vmax.f32 %v369_v38, 0.0  ;;  %v1136_v35 = vld [vmem:[#allocation2 + $0x78] sm:$0xff]  ;;  %v4047_v15 = vpack.c.bf16 %v903_v30, %v902_v14  ;;  %v3265_v38 = vld [vmem:[%s4417_s3 + $0x160] sm:$0xff] }
  0x50   : > { %469 = vst [vmem:[#allocation2 + $0x91] sm:$0xff] %v382_v50  ;;  %v392_v50 = vmax.f32 %v360_v47, 0.0  ;;  %v376_v60 = vmax.f32 %v344_v41, 0.0  ;;  %v1137_v37 = vld [vmem:[#allocation2 + $0x80] sm:$0xff] }
  0x51   : > { %470 = vst [vmem:[#allocation2 + $0x99] sm:$0xff] %v383_v55  ;;  %v4001_v24 = vpack.c.bf16 %v385_v21, %v384_v42  ;;  %v602_v26 = vpack.c.bf16 %v401_v58, %v400_v54  ;;  %2179 = vmatpush.bf16.msra.mxu3 %v3283_v63  ;;  %v1164_v3 = vpack.c.bf16 %v1137_v37, %v1136_v35  ;;  %v3281_v47 = vld [vmem:[%s4417_s3 + $0x1e0] sm:$0xff] }
  0x52   : > { %477 = vst [vmem:[#allocation2 + $0xf1] sm:$0xff] %v390_v56  ;;  %v4003_v25 = vpack.c.bf16 %v393_v51, %v392_v50  ;;  %v590_v43 = vpack.c.bf16 %v377_v8, %v376_v60  ;;  %v926_v56 = vpack.c.bf16 %v895_v48, %v894_v45  ;;  %v3289_v20 = vld [vmem:[%s4417_s3 + $0x220] sm:$0xff] }
  0x53   : > { %478 = vst [vmem:[#allocation2 + $0xf9] sm:$0xff] %v391_v57 }
  0x54   : > { %485 = vst [vmem:[#allocation2 + $0x151] sm:$0xff] %v398_v61  ;;  %v3514_v61 = vmov 0.0|0.0  }
  0x55   : > { %486 = vst [vmem:[#allocation2 + $0x159] sm:$0xff] %v399_v62  ;;  %v1128_v49 = vld [vmem:[#allocation2 + $0x18] sm:$0xff]  ;;  %v3275_v62 = vld [vmem:[%s4417_s3 + $0x1b0] sm:$0xff] }
  0x56   : > { %461 = vst [vmem:[#allocation2 + $0x31] sm:$0xff] %v374_v0  ;;  %v1129_v55 = vld [vmem:[#allocation2 + $0x20] sm:$0xff]  ;;  %v3267_v0 = vld [vmem:[%s4417_s3 + $0x170] sm:$0xff]  ;;  %1945 = vmatpush.bf16.msra.mxu2 %v3275_v62 }
  0x57   : > { %462 = vst [vmem:[#allocation2 + $0x39] sm:$0xff] %v375_v2  ;;  %v1160_v57 = vpack.c.bf16 %v1129_v55, %v1128_v49  ;;  %v3291_v2 = vld [vmem:[%s4417_s3 + $0x230] sm:$0xff]  ;;  %1710 = vmatpush.bf16.msra.mxu1 %v3267_v0  ;;  %v897_v4 = vld [vmem:[#allocation2 + $0x22] sm:$0xff] }
  0x58   : > { %471 = vst [vmem:[#allocation2 + $0xa9] sm:$0xff] %v384_v42  ;;  %2413 = vmatpush.bf16.msra.mxu0 %v3291_v2  ;;  %v904_v42 = vld [vmem:[#allocation2 + $0x7a] sm:$0xff] }
  0x59   : > { %472 = vst [vmem:[#allocation2 + $0xb1] sm:$0xff] %v385_v21  ;;  %v905_v21 = vld [vmem:[#allocation2 + $0x82] sm:$0xff] }
  0x5a   : > { %479 = vst [vmem:[#allocation2 + $0x109] sm:$0xff] %v392_v50  ;;  %1946 = vmatpush.bf16.msra.mxu2 %v3274_v17  ;;  %v1138_v50 = vld [vmem:[#allocation2 + $0x90] sm:$0xff] }
  0x5b   : > { %711 = vmatmul.bf16.gmra.mxu1 %v4001_v24  ;;  %480 = vst [vmem:[#allocation2 + $0x111] sm:$0xff] %v393_v51  ;;  %731 = vmatmul.bf16.gmra.mxu2 %v4003_v25  ;;  %v1139_v51 = vld [vmem:[#allocation2 + $0x98] sm:$0xff] }
  0x5c   : > { %487 = vst [vmem:[#allocation2 + $0x169] sm:$0xff] %v400_v54  ;;  %751 = vmatmul.bf16.gmra.mxu3 %v602_v26  ;;  %1711 = vmatpush.bf16.msra.mxu1 %v3266_v32  ;;  %v1165_v26 = vpack.c.bf16 %v1139_v51, %v1138_v50  ;;  %v1142_v32 = vld [vmem:[#allocation2 + $0xc0] sm:$0xff] }
  0x5d   : > { %691 = vmatmul.bf16.gmra.mxu0 %v590_v43  ;;  %488 = vst [vmem:[#allocation2 + $0x171] sm:$0xff] %v401_v58  ;;  %v1130_v5 = vld [vmem:[#allocation2 + $0x30] sm:$0xff]  ;;  %v1145_v50 = vld [vmem:[#allocation2 + $0xe0] sm:$0xff] }
  0x5e   : > { %463 = vst [vmem:[#allocation2 + $0x49] sm:$0xff] %v376_v60  ;;  %v1131_v6 = vld [vmem:[#allocation2 + $0x38] sm:$0xff]  ;;  %2414 = vmatpush.bf16.msra.mxu0 %v3290_v40  ;;  %v4079_v60 = vpack.c.bf16 %v905_v21, %v904_v42  ;;  %v1143_v40 = vld [vmem:[#allocation2 + $0xc8] sm:$0xff] }
  0x5f   : > { %464 = vst [vmem:[#allocation2 + $0x51] sm:$0xff] %v377_v8  ;;  %v4022_v28 = vpack.c.bf16 %v1131_v6, %v1130_v5  ;;  %v898_v34 = vld [vmem:[#allocation2 + $0x32] sm:$0xff]  ;;  %v899_v7 = vld [vmem:[#allocation2 + $0x3a] sm:$0xff]  ;;  %v1167_v30 = vpack.c.bf16 %v1143_v40, %v1142_v32  ;;  %v911_v42 = vld [vmem:[#allocation2 + $0xca] sm:$0xff] }
  0x60   : > { %v4027_v9 = vpack.c.bf16 %v899_v7, %v898_v34  ;;  %1712 = vmatpush.bf16.msra.mxu1 %v3265_v38  ;;  %v1141_v62 = vld [vmem:[#allocation2 + $0xb0] sm:$0xff]  ;;  %v3272_v5 = vld [vmem:[%s4417_s3 + $0x198] sm:$0xff] }
  0x61   : > { %v3280_v6 = vld [vmem:[%s4417_s3 + $0x1d8] sm:$0xff]  ;;  %v908_v17 = vld [vmem:[#allocation2 + $0xaa] sm:$0xff] }
  0x62   : > { %2415 = vmatpush.bf16.msra.mxu0 %v3289_v20  ;;  %v910_v20 = vld [vmem:[#allocation2 + $0xc2] sm:$0xff]  ;;  %v1144_v21 = vld [vmem:[#allocation2 + $0xd8] sm:$0xff] }
  0x65   : > { %v1132_v31 = vld [vmem:[#allocation2 + $0x48] sm:$0xff] }
  0x66   : > { %v1133_v39 = vld [vmem:[#allocation2 + $0x50] sm:$0xff] }
  0x67   : > { %v1162_v11 = vpack.c.bf16 %v1133_v39, %v1132_v31  ;;  %v900_v10 = vld [vmem:[#allocation2 + $0x4a] sm:$0xff]  ;;  %v901_v23 = vld [vmem:[#allocation2 + $0x52] sm:$0xff] }
  0x68   : > { %v4043_v27 = vpack.c.bf16 %v901_v23, %v900_v10  ;;  %v1376_v10 = vld [vmem:[#allocation2 + $0xc1] sm:$0xff]  ;;  %v1377_v23 = vld [vmem:[#allocation2 + $0xc9] sm:$0xff] }
  0x69   : > { %v1401_v35 = vpack.c.bf16 %v1377_v23, %v1376_v10  ;;  %v3287_v10 = vld [vmem:[%s4417_s3 + $0x210] sm:$0xff] }
  0x6b   : > { %813 = vmatmul.bf16.vlgmr.msrb.gmra.mxu1 %v3514_v61  ;;  %1015 = vmatmul.bf16.vlgmr.msrb.gmra.mxu2 %v926_v56  ;;  %v906_v56 = vld [vmem:[#allocation2 + $0x92] sm:$0xff]  ;;  %v1140_v61 = vld [vmem:[#allocation2 + $0xa8] sm:$0xff] }
  0x6c   : > { %1249 = vmatmul.bf16.vlgmr.msrb.gmra.mxu3 %v1160_v57 }
  0x6d   : > { %1483 = vmatmul.bf16.vlgmr.msrb.gmra.mxu0 %v3806_v59  ;;  %v896_v59 = vld [vmem:[#allocation2 + $0x1a] sm:$0xff] }
  0x6e   : > { %v4020_v1 = vpack.c.bf16 %v897_v4, %v896_v59 }
  0x7b   : > { %818 = vmatmul.bf16.gmra.mxu1 %v1160_v57  ;;  %1020 = vmatmul.bf16.gmra.mxu2 %v4020_v1  ;;  %v907_v57 = vld [vmem:[#allocation2 + $0x9a] sm:$0xff] }
  0x7c   : > { %1254 = vmatmul.bf16.gmra.mxu3 %v4022_v28  ;;  %v4099_v2 = vpack.c.bf16 %v907_v57, %v906_v56  ;;  %v4150_v56 = vpack.c.bf16 %v911_v42, %v910_v20  ;;  %v1146_v20 = vld [vmem:[#allocation2 + $0xf0] sm:$0xff]  ;;  %v1147_v42 = vld [vmem:[#allocation2 + $0xf8] sm:$0xff] }
  0x7d   : > { %1488 = vmatmul.bf16.gmra.mxu0 %v3938_v16  ;;  %v3282_v16 = vld [vmem:[%s4417_s3 + $0x1e8] sm:$0xff] }
  0x7e   : > { %2180 = vmatpush.bf16.msra.mxu3 %v3282_v16  ;;  %v909_v16 = vld [vmem:[#allocation2 + $0xb2] sm:$0xff] }
  0x82   : > { %2181 = vmatpush.bf16.msra.mxu3 %v3281_v47 }
  0x86   : > { %2182 = vmatpush.bf16.msra.mxu3 %v3280_v6  ;;  %v3279_v6 = vld [vmem:[%s4417_s3 + $0x1d0] sm:$0xff] }
  0x8a   : > { %2183 = vmatpush.bf16.msra.mxu3 %v3279_v6 }
  0x8b   : > { %823 = vmatmul.bf16.gmra.mxu1 %v4022_v28  ;;  %1025 = vmatmul.bf16.gmra.mxu2 %v4027_v9 }
  0x8c   : > { %1259 = vmatmul.bf16.gmra.mxu3 %v1162_v11 }
  0x8d   : > { %1493 = vmatmul.bf16.gmra.mxu0 %v590_v43 }
  0x9b   : > { %828 = vmatmul.bf16.gmra.mxu1 %v1162_v11  ;;  %1030 = vmatmul.bf16.gmra.mxu2 %v4043_v27  ;;  %v3288_v11 = vld [vmem:[%s4417_s3 + $0x218] sm:$0xff] }
  0x9c   : > { %1264 = vmatmul.bf16.gmra.mxu3 %v1163_v13  ;;  %2416 = vmatpush.bf16.msra.mxu0 %v3288_v11 }
  0x9d   : > { %1498 = vmatmul.bf16.gmra.mxu0 %v3658_v44  ;;  %v3273_v44 = vld [vmem:[%s4417_s3 + $0x1a0] sm:$0xff] }
  0x9e   : > { %1947 = vmatpush.bf16.msra.mxu2 %v3273_v44 }
  0xa0   : > { %2417 = vmatpush.bf16.msra.mxu0 %v3287_v10 }
  0xa2   : > { %1948 = vmatpush.bf16.msra.mxu2 %v3272_v5  ;;  %v3271_v5 = vld [vmem:[%s4417_s3 + $0x190] sm:$0xff] }
  0xa6   : > { %1949 = vmatpush.bf16.msra.mxu2 %v3271_v5  ;;  %v4172_v5 = vpack.c.bf16 %v1147_v42, %v1146_v20  ;;  %v1148_v20 = vld [vmem:[#allocation2 + $0x108] sm:$0xff]  ;;  %v1149_v42 = vld [vmem:[#allocation2 + $0x110] sm:$0xff] }
  0xa8   : > { %v4049_v36 = vpop.f32.mrf.mxu1 }
  0xaa   : > { %v4051_v46 = vpop.f32.mrf.mxu0 }
  0xab   : > { %833 = vmatmul.bf16.gmra.mxu1 %v1163_v13  ;;  %1035 = vmatmul.bf16.gmra.mxu2 %v4047_v15  ;;  %v4131_v13 = vpack.c.bf16 %v909_v16, %v908_v17 }
  0xac   : > { %1269 = vmatmul.bf16.gmra.mxu3 %v1164_v3 }
  0xad   : > { %1503 = vmatmul.bf16.gmra.mxu0 %v3783_v52 }
  0xae   : > { %v4061_v18 = vpop.f32.mrf.mxu2 }
  0xaf   : > { %v4063_v19 = vpop.f32.mrf.mxu3 }
  0xb0   : > { %v4068_v41 = vpop.f32.mrf.mxu1 }
  0xb2   : > { %v4070_v52 = vpop.f32.mrf.mxu0 }
  0xb6   : > { %v4075_v54 = vpop.f32.mrf.mxu2 }
  0xb7   : > { %v4077_v58 = vpop.f32.mrf.mxu3 }
  0xb8   : > { %v4081_v8 = vpop.f32.mrf.mxu1 }
  0xba   : > { %v4083_v43 = vpop.f32.mrf.mxu0 }
  0xbb   : > { %838 = vmatmul.bf16.gmra.mxu1 %v1164_v3  ;;  %1040 = vmatmul.bf16.gmra.mxu2 %v4079_v60 }
  0xbc   : > { %1274 = vmatmul.bf16.gmra.mxu3 %v1165_v26 }
  0xbd   : > { %1508 = vmatmul.bf16.gmra.mxu0 %v3918_v29  ;;  %v1166_v29 = vpack.c.bf16 %v1141_v62, %v1140_v61  ;;  %v1168_v61 = vpack.c.bf16 %v1145_v50, %v1144_v21 }
  0xbe   : > { %v4087_v45 = vpop.f32.mrf.mxu2 }
  0xbf   : > { %v4089_v48 = vpop.f32.mrf.mxu3 }
  0xc0   : > { %v4091_v49 = vpop.f32.mrf.mxu1 }
  0xc2   : > { %v4093_v55 = vpop.f32.mrf.mxu0 }
  0xc6   : > { %v4095_v63 = vpop.f32.mrf.mxu2 }
  0xc7   : > { %v4097_v0 = vpop.f32.mrf.mxu3 }
  0xc8   : > { %v4101_v59 = vpop.f32.mrf.mxu1 }
  0xca   : > { %v4103_v4 = vpop.f32.mrf.mxu0 }
  0xcb   : > { %843 = vmatmul.bf16.gmra.mxu1 %v1165_v26  ;;  %1045 = vmatmul.bf16.gmra.mxu2 %v4099_v2 }
  0xcc   : > { %1279 = vmatmul.bf16.gmra.mxu3 %v1166_v29 }
  0xcd   : > { %1513 = vmatmul.bf16.gmra.mxu0 %v4001_v24  ;;  %v3264_v24 = vld [vmem:[%s4417_s3 + $0x158] sm:$0xff] }
  0xce   : > { %v4113_v34 = vpop.f32.mrf.mxu2  ;;  %1713 = vmatpush.bf16.msra.mxu1 %v3264_v24 }
  0xcf   : > { %v4115_v7 = vpop.f32.mrf.mxu3 }
  0xd0   : > { %v4117_v31 = vpop.f32.mrf.mxu1 }
  0xd2   : > { %v4119_v39 = vpop.f32.mrf.mxu0 }
  0xd6   : > { %v4127_v22 = vpop.f32.mrf.mxu2 }
  0xd7   : > { %v4129_v12 = vpop.f32.mrf.mxu3 }
  0xd8   : > { %v4133_v14 = vpop.f32.mrf.mxu1 }
  0xda   : > { %v4135_v37 = vpop.f32.mrf.mxu0 }
  0xdb   : > { %848 = vmatmul.bf16.gmra.mxu1 %v1166_v29  ;;  %1050 = vmatmul.bf16.gmra.mxu2 %v4131_v13 }
  0xdc   : > { %1284 = vmatmul.bf16.gmra.mxu3 %v1167_v30 }
  0xdd   : > { %1518 = vmatmul.bf16.gmra.mxu0 %v1401_v35  ;;  %v913_v35 = vld [vmem:[#allocation2 + $0xe2] sm:$0xff] }
  0xde   : > { %v4138_v3 = vpop.f32.mrf.mxu2 }
  0xdf   : > { %v4140_v44 = vpop.f32.mrf.mxu3 }
  0xe0   : > { %v4142_v47 = vpop.f32.mrf.mxu1 }
  0xe2   : > { %v4144_v38 = vpop.f32.mrf.mxu0 }
  0xe6   : > { %v4146_v51 = vpop.f32.mrf.mxu2 }
  0xe7   : > { %v4148_v26 = vpop.f32.mrf.mxu3 }
  0xe8   : > { %v814_v57 = vpop.f32.mrf.mxu1 }
  0xe9   : > { %v815_v62 = vadd.f32 %v814_v57, %v4051_v46 }
  0xea   : > { %v1484_v29 = vpop.f32.mrf.mxu0 }
  0xeb   : > { %853 = vmatmul.bf16.gmra.mxu1 %v1167_v30  ;;  %1055 = vmatmul.bf16.gmra.mxu2 %v4150_v56  ;;  %v912_v30 = vld [vmem:[#allocation2 + $0xda] sm:$0xff] }
  0xec   : > { %1289 = vmatmul.bf16.gmra.mxu3 %v1168_v61  ;;  %v4170_v57 = vpack.c.bf16 %v913_v35, %v912_v30 }
  0xed   : > { %1523 = vmatmul.bf16.gmra.mxu0 %v3789_v53  ;;  %v3263_v53 = vld [vmem:[%s4417_s3 + $0x150] sm:$0xff] }
  0xee   : > { %v1016_v24 = vpop.f32.mrf.mxu2  ;;  %1714 = vmatpush.bf16.msra.mxu1 %v3263_v53 }
  0xef   : > { %v1096_v11 = vadd.f32 %v1016_v24, %v815_v62  ;;  %v1250_v46 = vpop.f32.mrf.mxu3 }
  0xf0   : > { %v816_v17 = vpop.f32.mrf.mxu1 }
  0xf1   : > { %v1330_v16 = vadd.f32 %v1250_v46, %v1096_v11  ;;  %v817_v32 = vadd.f32 %v816_v17, %v4070_v52 }
  0xf2   : > { %v1486_v40 = vpop.f32.mrf.mxu0 }
  0xf3   : > { %v4168_v23 = vadd.f32 %v1484_v29, %v1330_v16 }
  0xf6   : > { %v1018_v21 = vpop.f32.mrf.mxu2 }
  0xf7   : > { %v1097_v50 = vadd.f32 %v1018_v21, %v817_v32  ;;  %v1252_v52 = vpop.f32.mrf.mxu3 }
  0xf8   : > { %v819_v62 = vpop.f32.mrf.mxu1 }
  0xf9   : > { %v1331_v6 = vadd.f32 %v1252_v52, %v1097_v50  ;;  %v820_v24 = vadd.f32 %v819_v62, %v4083_v43  ;;  %v914_v43 = vld [vmem:[#allocation2 + $0xf2] sm:$0xff]  ;;  %v1170_v62 = vpack.c.bf16 %v1149_v42, %v1148_v20  ;;  %v916_v42 = vld [vmem:[#allocation2 + $0x10a] sm:$0xff] }
  0xfa   : > { %v1489_v11 = vpop.f32.mrf.mxu0 }
  0xfb   : > { %858 = vmatmul.bf16.gmra.mxu1 %v1168_v61  ;;  %1060 = vmatmul.bf16.gmra.mxu2 %v4170_v57  ;;  %v4176_v29 = vadd.f32 %v1486_v40, %v1331_v6  ;;  %v915_v61 = vld [vmem:[#allocation2 + $0xfa] sm:$0xff] }
  0xfc   : > { %1294 = vmatmul.bf16.gmra.mxu3 %v4172_v5  ;;  %v4183_v52 = vpack.c.bf16 %v915_v61, %v914_v43  ;;  %v3286_v61 = vld [vmem:[%s4417_s3 + $0x208] sm:$0xff] }
  0xfd   : > { %1528 = vmatmul.bf16.gmra.mxu0 %v3924_v33 }
  0xfe   : > { %v1021_v46 = vpop.f32.mrf.mxu2  ;;  %2418 = vmatpush.bf16.msra.mxu0 %v3286_v61 }
  0xff   : > { %v1098_v17 = vadd.f32 %v1021_v46, %v820_v24  ;;  %v1255_v16 = vpop.f32.mrf.mxu3 }
 0x100   : > { %v821_v32 = vpop.f32.mrf.mxu1 }
 0x101   : > { %v1332_v53 = vadd.f32 %v1255_v16, %v1098_v17  ;;  %v822_v10 = vadd.f32 %v821_v32, %v4093_v55  ;;  %v3278_v17 = vld [vmem:[%s4417_s3 + $0x1c8] sm:$0xff] }
 0x102   : > { %v1491_v30 = vpop.f32.mrf.mxu0  ;;  %2184 = vmatpush.bf16.msra.mxu3 %v3278_v17 }
 0x103   : > { %v4181_v35 = vadd.f32 %v1489_v11, %v1332_v53  ;;  %v3270_v11 = vld [vmem:[%s4417_s3 + $0x188] sm:$0xff] }
 0x104   : > { %1950 = vmatpush.bf16.msra.mxu2 %v3270_v11 }
 0x106   : > { %v1023_v40 = vpop.f32.mrf.mxu2 }
 0x107   : > { %v1099_v21 = vadd.f32 %v1023_v40, %v822_v10  ;;  %v1257_v50 = vpop.f32.mrf.mxu3  ;;  %v917_v40 = vld [vmem:[#allocation2 + $0x112] sm:$0xff] }
 0x108   : > { %v824_v33 = vpop.f32.mrf.mxu1  ;;  %v4206_v17 = vpack.c.bf16 %v917_v40, %v916_v42 }
 0x109   : > { %v1333_v6 = vadd.f32 %v1257_v50, %v1099_v21  ;;  %v825_v24 = vadd.f32 %v824_v33, %v4103_v4  ;;  %v1150_v21 = vld [vmem:[#allocation2 + $0x120] sm:$0xff]  ;;  %v1151_v50 = vld [vmem:[#allocation2 + $0x128] sm:$0xff] }
 0x10a   : > { %v1494_v46 = vpop.f32.mrf.mxu0  ;;  %v1384_v33 = vld [vmem:[#allocation2 + $0x121] sm:$0xff] }
 0x10b   : > { %863 = vmatmul.bf16.gmra.mxu1 %v4172_v5  ;;  %1065 = vmatmul.bf16.gmra.mxu2 %v4183_v52  ;;  %v4188_v55 = vadd.f32 %v1491_v30, %v1333_v6  ;;  %v1385_v6 = vld [vmem:[#allocation2 + $0x129] sm:$0xff] }
 0x10c   : > { %1299 = vmatmul.bf16.gmra.mxu3 %v1170_v62 }
 0x10d   : > { %1533 = vmatmul.bf16.gmra.mxu0 %v4003_v25  ;;  %v3262_v25 = vld [vmem:[%s4417_s3 + $0x148] sm:$0xff] }
 0x10e   : > { %v1026_v16 = vpop.f32.mrf.mxu2  ;;  %1715 = vmatpush.bf16.msra.mxu1 %v3262_v25 }
 0x10f   : > { %v1100_v4 = vadd.f32 %v1026_v16, %v825_v24  ;;  %v1260_v32 = vpop.f32.mrf.mxu3 }
 0x110   : > { %v826_v53 = vpop.f32.mrf.mxu1 }
 0x111   : > { %v1334_v10 = vadd.f32 %v1260_v32, %v1100_v4  ;;  %v827_v30 = vadd.f32 %v826_v53, %v4119_v39  ;;  %v1171_v4 = vpack.c.bf16 %v1151_v50, %v1150_v21  ;;  %v1405_v32 = vpack.c.bf16 %v1385_v6, %v1384_v33  ;;  %v919_v33 = vld [vmem:[#allocation2 + $0x12a] sm:$0xff]  ;;  %v1153_v6 = vld [vmem:[#allocation2 + $0x140] sm:$0xff] }
 0x112   : > { %v1496_v43 = vpop.f32.mrf.mxu0 }
 0x113   : > { %v4204_v20 = vadd.f32 %v1494_v46, %v1334_v10 }
 0x115   : > { %4423 = vst [vmem:[#allocation3_spill] sm:$0xff] %v4204_v20 }
 0x116   : > { %v1028_v39 = vpop.f32.mrf.mxu2 }
 0x117   : > { %v1101_v24 = vadd.f32 %v1028_v39, %v827_v30  ;;  %v1262_v11 = vpop.f32.mrf.mxu3 }
 0x118   : > { %v829_v16 = vpop.f32.mrf.mxu1 }
 0x119   : > { %v1335_v53 = vadd.f32 %v1262_v11, %v1101_v24  ;;  %v830_v25 = vadd.f32 %v829_v16, %v4135_v37  ;;  %v918_v37 = vld [vmem:[#allocation2 + $0x122] sm:$0xff]  ;;  %v1386_v24 = vld [vmem:[#allocation2 + $0x139] sm:$0xff] }
 0x11a   : > { %v1499_v61 = vpop.f32.mrf.mxu0 }
 0x11b   : > { %868 = vmatmul.bf16.gmra.mxu1 %v1170_v62  ;;  %1070 = vmatmul.bf16.gmra.mxu2 %v4206_v17  ;;  %v4210_v46 = vadd.f32 %v1496_v43, %v1335_v53  ;;  %v1152_v62 = vld [vmem:[#allocation2 + $0x138] sm:$0xff]  ;;  %v1387_v43 = vld [vmem:[#allocation2 + $0x141] sm:$0xff]  ;;  %v4215_v53 = vpack.c.bf16 %v919_v33, %v918_v37 }
 0x11c   : > { %1304 = vmatmul.bf16.gmra.mxu3 %v1171_v4  ;;  %v3277_v37 = vld [vmem:[%s4417_s3 + $0x1c0] sm:$0xff] }
 0x11d   : > { %4424 = vst [vmem:[#allocation4_spill] sm:$0xff] %v4210_v46  ;;  %1538 = vmatmul.bf16.gmra.mxu0 %v1405_v32  ;;  %2185 = vmatpush.bf16.msra.mxu3 %v3277_v37  ;;  %v920_v37 = vld [vmem:[#allocation2 + $0x13a] sm:$0xff] }
 0x11e   : > { %v1031_v10 = vpop.f32.mrf.mxu2  ;;  %4426 = vst [vmem:[#allocation6_spill] sm:$0xff] %v4215_v53 }
 0x11f   : > { %v1102_v20 = vadd.f32 %v1031_v10, %v830_v25  ;;  %v1265_v30 = vpop.f32.mrf.mxu3  ;;  %v1172_v10 = vpack.c.bf16 %v1153_v6, %v1152_v62 }
 0x120   : > { %v831_v39 = vpop.f32.mrf.mxu1 }
 0x121   : > { %v1336_v42 = vadd.f32 %v1265_v30, %v1102_v20  ;;  %v832_v40 = vadd.f32 %v831_v39, %v4144_v38  ;;  %v1406_v20 = vpack.c.bf16 %v1387_v43, %v1386_v24  ;;  %v3451_v39 = vld [vmem:[%s3570_s27 + $0x78] sm:$0xff]  }
 0x122   : > { %v1501_v21 = vpop.f32.mrf.mxu0 }
 0x123   : > { %v4213_v50 = vadd.f32 %v1499_v61, %v1336_v42  ;;  %v3355_v61 = vunpack.c.l.bf16 %v3451_v39  ;;  %v3356_v42 = vunpack.c.h.bf16 %v3451_v39  ;;  %v3285_v39 = vld [vmem:[%s4417_s3 + $0x200] sm:$0xff] }
 0x124   : > { %2419 = vmatpush.bf16.msra.mxu0 %v3285_v39 }
 0x125   : > { %4425 = vst [vmem:[#allocation5_spill] sm:$0xff] %v4213_v50 }
 0x126   : > { %v1033_v11 = vpop.f32.mrf.mxu2 }
 0x127   : > { %v1103_v16 = vadd.f32 %v1033_v11, %v832_v40  ;;  %v1267_v32 = vpop.f32.mrf.mxu3  ;;  %v3269_v40 = vld [vmem:[%s4417_s3 + $0x180] sm:$0xff] }
 0x128   : > { %v834_v25 = vpop.f32.mrf.mxu1  ;;  %1951 = vmatpush.bf16.msra.mxu2 %v3269_v40  ;;  %v3503_v11 = vld [vmem:[%s4416_s2] ss:$0 sm:$0xff] }
 0x129   : > { %v1337_v30 = vadd.f32 %v1267_v32, %v1103_v16  ;;  %v835_v33 = vadd.f32 %v834_v25, %v4049_v36 }
 0x12a   : > { %v1504_v38 = vpop.f32.mrf.mxu0 }
 0x12b   : > { %873 = vmatmul.bf16.gmra.mxu1 %v1171_v4  ;;  %1075 = vmatmul.bf16.gmra.mxu2 %v4215_v53  ;;  %v4219_v50 = vadd.f32 %v1501_v21, %v1337_v30  ;;  %v3502_v4 = vld [vmem:[%s4415_s1] ss:$0 sm:$0xff] }
 0x12c   : > { %1309 = vmatmul.bf16.gmra.mxu3 %v1172_v10  ;;  %v335_v62 = vmul.f32 %v3502_v4, %v3355_v61  ;;  %v336_v6 = vmul.f32 %v3502_v4, %v3356_v42  ;;  %v3261_v30 = vld [vmem:[%s4417_s3 + $0x140] sm:$0xff]  ;;  %v1154_v4 = vld [vmem:[#allocation2 + $0x150] sm:$0xff] }
 0x12d   : > { %4427 = vst [vmem:[#allocation7_spill] sm:$0xff] %v4219_v50  ;;  %1543 = vmatmul.bf16.gmra.mxu0 %v1406_v20  ;;  %1716 = vmatpush.bf16.msra.mxu1 %v3261_v30 }
 0x12e   : > { %v1036_v21 = vpop.f32.mrf.mxu2  ;;  %v4234_v16 = vadd.f32 %v3503_v11, %v335_v62  ;;  %v4236_v32 = vadd.f32 %v3503_v11, %v336_v6  ;;  %v1155_v6 = vld [vmem:[#allocation2 + $0x158] sm:$0xff] }
 0x12f   : > { %v1104_v24 = vadd.f32 %v1036_v21, %v835_v33  ;;  %v1270_v43 = vpop.f32.mrf.mxu3  ;;  %v921_v33 = vld [vmem:[#allocation2 + $0x142] sm:$0xff]  ;;  %v1388_v21 = vld [vmem:[#allocation2 + $0x151] sm:$0xff] }
 0x130   : > { %v836_v36 = vpop.f32.mrf.mxu1  ;;  %v4420_v61 = vmax.f32 %v4234_v16, 0.0  ;;  %v4421_v42 = vmax.f32 %v4236_v32, 0.0  ;;  %v4253_v39 = vpack.c.bf16 %v921_v33, %v920_v37 }
 0x131   : > { %v1338_v25 = vadd.f32 %v1270_v43, %v1104_v24  ;;  %v837_v62 = vadd.f32 %v836_v36, %v4068_v41  ;;  %v1389_v24 = vld [vmem:[#allocation2 + $0x159] sm:$0xff] }
 0x132   : > { %v1506_v20 = vpop.f32.mrf.mxu0  ;;  %489 = vst [vmem:[#allocation2 + $0x181] sm:$0xff] %v4420_v61  ;;  %v1173_v61 = vpack.c.bf16 %v1155_v6, %v1154_v4  ;;  %v922_v4 = vld [vmem:[#allocation2 + $0x152] sm:$0xff]  ;;  %v923_v6 = vld [vmem:[#allocation2 + $0x15a] sm:$0xff] }
 0x133   : > { %v4248_v40 = vadd.f32 %v1504_v38, %v1338_v25  ;;  %490 = vst [vmem:[#allocation2 + $0x189] sm:$0xff] %v4421_v42  ;;  %v1407_v38 = vpack.c.bf16 %v1389_v24, %v1388_v21  ;;  %v1156_v21 = vld [vmem:[#allocation2 + $0x168] sm:$0xff]  ;;  %v1157_v24 = vld [vmem:[#allocation2 + $0x170] sm:$0xff] }
 0x135   : > { %4428 = vst [vmem:[#allocation8_spill] sm:$0xff] %v4248_v40 }
 0x136   : > { %v1038_v43 = vpop.f32.mrf.mxu2 }
 0x137   : > { %v1105_v11 = vadd.f32 %v1038_v43, %v837_v62  ;;  %v1272_v30 = vpop.f32.mrf.mxu3 }
 0x138   : > { %v839_v50 = vpop.f32.mrf.mxu1 }
 0x139   : > { %v1339_v25 = vadd.f32 %v1272_v30, %v1105_v11  ;;  %v840_v41 = vadd.f32 %v839_v50, %v4081_v8  ;;  %v1391_v11 = vld [vmem:[#allocation2 + $0x171] sm:$0xff]  ;;  %v4262_v8 = vpack.c.bf16 %v923_v6, %v922_v4 }
 0x13a   : > { %v1509_v40 = vpop.f32.mrf.mxu0 }
 0x13b   : > { %878 = vmatmul.bf16.gmra.mxu1 %v1172_v10  ;;  %1080 = vmatmul.bf16.gmra.mxu2 %v4253_v39  ;;  %v4256_v46 = vadd.f32 %v1506_v20, %v1339_v25  ;;  %v1390_v20 = vld [vmem:[#allocation2 + $0x169] sm:$0xff] }
 0x13c   : > { %1314 = vmatmul.bf16.gmra.mxu3 %v1173_v61 }
 0x13d   : > { %1548 = vmatmul.bf16.gmra.mxu0 %v1407_v38 }
 0x13e   : > { %v1041_v36 = vpop.f32.mrf.mxu2 }
 0x13f   : > { %v1106_v42 = vadd.f32 %v1041_v36, %v840_v41  ;;  %v1275_v62 = vpop.f32.mrf.mxu3  ;;  %v1174_v41 = vpack.c.bf16 %v1157_v24, %v1156_v21  ;;  %v1408_v36 = vpack.c.bf16 %v1391_v11, %v1390_v20  ;;  %v924_v21 = vld [vmem:[#allocation2 + $0x16a] sm:$0xff]  ;;  %v925_v24 = vld [vmem:[#allocation2 + $0x172] sm:$0xff]  ;;  %v1158_v20 = vld [vmem:[#allocation2 + $0x180] sm:$0xff] }
 0x140   : > { %v841_v43 = vpop.f32.mrf.mxu1  ;;  %v1159_v11 = vld [vmem:[#allocation2 + $0x188] sm:$0xff] }
 0x141   : > { %v1340_v37 = vadd.f32 %v1275_v62, %v1106_v42  ;;  %v842_v10 = vadd.f32 %v841_v43, %v4091_v49 }
 0x142   : > { %v1511_v33 = vpop.f32.mrf.mxu0 }
 0x143   : > { %v4259_v53 = vadd.f32 %v1509_v40, %v1340_v37 }
 0x145   : > { %4429 = vst [vmem:[#allocation9_spill] sm:$0xff] %v4259_v53 }
 0x146   : > { %v1043_v30 = vpop.f32.mrf.mxu2 }
 0x147   : > { %v1107_v38 = vadd.f32 %v1043_v30, %v842_v10  ;;  %v1277_v25 = vpop.f32.mrf.mxu3 }
 0x148   : > { %v844_v50 = vpop.f32.mrf.mxu1 }
 0x149   : > { %v1341_v42 = vadd.f32 %v1277_v25, %v1107_v38  ;;  %v845_v49 = vadd.f32 %v844_v50, %v4101_v59  ;;  %v1175_v50 = vpack.c.bf16 %v1159_v11, %v1158_v20  ;;  %v2065_v11 = vld [vmem:[#allocation2 + $0x31] sm:$0xff] }
 0x14a   : > { %v1514_v62 = vpop.f32.mrf.mxu0 }
 0x14b   : > { %883 = vmatmul.bf16.gmra.mxu1 %v1173_v61  ;;  %1085 = vmatmul.bf16.gmra.mxu2 %v4262_v8  ;;  %v4265_v40 = vadd.f32 %v1511_v33, %v1341_v42  ;;  %v4430_v42 = vmax.f32 %v4234_v16, 0.0 }
 0x14c   : > { %1319 = vmatmul.bf16.gmra.mxu3 %v1174_v41 }
 0x14d   : > { %1553 = vmatmul.bf16.gmra.mxu0 %v1408_v36  ;;  %v4271_v36 = vpack.c.bf16 %v925_v24, %v924_v21 }
 0x14e   : > { %v1046_v43 = vpop.f32.mrf.mxu2 }
 0x14f   : > { %v1108_v37 = vadd.f32 %v1046_v43, %v845_v49  ;;  %v1280_v10 = vpop.f32.mrf.mxu3  ;;  %v4431_v49 = vmax.f32 %v4236_v32, 0.0 }
 0x150   : > { %v846_v30 = vpop.f32.mrf.mxu1 }
 0x151   : > { %v1342_v4 = vadd.f32 %v1280_v10, %v1108_v37  ;;  %v847_v61 = vadd.f32 %v846_v30, %v4117_v31  ;;  %v1409_v43 = vpack.c.bf16 %v4431_v49, %v4430_v42 }
 0x152   : > { %v1516_v6 = vpop.f32.mrf.mxu0 }
 0x153   : > { %v4268_v53 = vadd.f32 %v1514_v62, %v1342_v4 }
 0x156   : > { %v1048_v33 = vpop.f32.mrf.mxu2 }
 0x157   : > { %v1109_v38 = vadd.f32 %v1048_v33, %v847_v61  ;;  %v1282_v25 = vpop.f32.mrf.mxu3 }
 0x158   : > { %v849_v59 = vpop.f32.mrf.mxu1 }
 0x159   : > { %v1343_v62 = vadd.f32 %v1282_v25, %v1109_v38  ;;  %v850_v10 = vadd.f32 %v849_v59, %v4133_v14 }
 0x15a   : > { %v1519_v37 = vpop.f32.mrf.mxu0 }
 0x15b   : > { %888 = vmatmul.bf16.gmra.mxu1 %v1174_v41  ;;  %1090 = vmatmul.bf16.gmra.mxu2 %v4271_v36  ;;  %v4278_v31 = vadd.f32 %v1516_v6, %v1343_v62  ;;  %v2066_v41 = vld [vmem:[#allocation2 + $0x39] sm:$0xff] }
 0x15c   : > { %1324 = vmatmul.bf16.gmra.mxu3 %v1175_v50  ;;  %v2097_v50 = vpack.c.bf16 %v2066_v41, %v2065_v11 }
 0x15d   : > { %1558 = vmatmul.bf16.gmra.mxu0 %v1409_v43 }
 0x15e   : > { %v1051_v30 = vpop.f32.mrf.mxu2 }
 0x15f   : > { %v1110_v4 = vadd.f32 %v1051_v30, %v850_v10  ;;  %v1285_v21 = vpop.f32.mrf.mxu3 }
 0x160   : > { %v851_v24 = vpop.f32.mrf.mxu1 }
 0x161   : > { %v1344_v61 = vadd.f32 %v1285_v21, %v1110_v4  ;;  %v852_v32 = vadd.f32 %v851_v24, %v4142_v47  ;;  %v1598_v4 = vld [vmem:[#allocation2 + $0x32] sm:$0xff]  ;;  %v1599_v24 = vld [vmem:[#allocation2 + $0x3a] sm:$0xff] }
 0x162   : > { %v1521_v16 = vpop.f32.mrf.mxu0 }
 0x163   : > { %v4281_v20 = vadd.f32 %v1519_v37, %v1344_v61  ;;  %v1834_v61 = vld [vmem:[#allocation2 + $0x50] sm:$0xff] }
 0x166   : > { %v1053_v33 = vpop.f32.mrf.mxu2 }
 0x167   : > { %v1111_v38 = vadd.f32 %v1053_v33, %v852_v32  ;;  %v1287_v6 = vpop.f32.mrf.mxu3  ;;  %v2068_v32 = vld [vmem:[#allocation2 + $0x51] sm:$0xff] }
 0x168   : > { %v854_v25 = vpop.f32.mrf.mxu1 }
 0x169   : > { %v1345_v42 = vadd.f32 %v1287_v6, %v1111_v38  ;;  %v855_v47 = vadd.f32 %v854_v25, %v4061_v18  ;;  %v1629_v18 = vpack.c.bf16 %v1599_v24, %v1598_v4  ;;  %v1601_v24 = vld [vmem:[#allocation2 + $0x52] sm:$0xff] }
 0x16a   : > { %v1524_v49 = vpop.f32.mrf.mxu0 }
 0x16b   : > { %1717 = vmatmul.bf16.vlgmr.msra.gmra.mxu1 %v4020_v1  ;;  %1952 = vmatmul.bf16.vlgmr.msra.gmra.mxu2 %v4022_v28  ;;  %v4286_v14 = vadd.f32 %v1521_v16, %v1345_v42  ;;  %v1833_v1 = vld [vmem:[#allocation2 + $0x48] sm:$0xff] }
 0x16c   : > { %2186 = vmatmul.bf16.vlgmr.msra.gmra.mxu3 %v2097_v50  ;;  %v2067_v16 = vld [vmem:[#allocation2 + $0x49] sm:$0xff]  ;;  %v1864_v33 = vpack.c.bf16 %v1834_v61, %v1833_v1  ;;  %v1835_v1 = vld [vmem:[#allocation2 + $0x60] sm:$0xff] }
 0x16d   : > { %2420 = vmatmul.bf16.vlgmr.msra.gmra.mxu0 %v4027_v9  ;;  %v2098_v6 = vpack.c.bf16 %v2068_v32, %v2067_v16  ;;  %v1836_v61 = vld [vmem:[#allocation2 + $0x68] sm:$0xff] }
 0x16e   : > { %v1056_v59 = vpop.f32.mrf.mxu2  ;;  %v2070_v16 = vld [vmem:[#allocation2 + $0x69] sm:$0xff] }
 0x16f   : > { %v1112_v43 = vadd.f32 %v1056_v59, %v855_v47  ;;  %v1290_v62 = vpop.f32.mrf.mxu3 }
 0x170   : > { %v856_v37 = vpop.f32.mrf.mxu1 }
 0x171   : > { %v1346_v10 = vadd.f32 %v1290_v62, %v1112_v43  ;;  %v857_v28 = vadd.f32 %v856_v37, %v4075_v54 }
 0x172   : > { %v1526_v30 = vpop.f32.mrf.mxu0 }
 0x173   : > { %v4290_v21 = vadd.f32 %v1524_v49, %v1346_v10  ;;  %v1600_v10 = vld [vmem:[#allocation2 + $0x4a] sm:$0xff] }
 0x176   : > { %v1058_v11 = vpop.f32.mrf.mxu2 }
 0x177   : > { %v1113_v9 = vadd.f32 %v1058_v11, %v857_v28  ;;  %v1292_v41 = vpop.f32.mrf.mxu3  ;;  %v2069_v28 = vld [vmem:[#allocation2 + $0x61] sm:$0xff] }
 0x178   : > { %v859_v38 = vpop.f32.mrf.mxu1 }
 0x179   : > { %v1347_v25 = vadd.f32 %v1292_v41, %v1113_v9  ;;  %v860_v54 = vadd.f32 %v859_v38, %v4087_v45  ;;  %v1630_v45 = vpack.c.bf16 %v1601_v24, %v1600_v10  ;;  %v1865_v9 = vpack.c.bf16 %v1836_v61, %v1835_v1  ;;  %v1603_v10 = vld [vmem:[#allocation2 + $0x6a] sm:$0xff]  ;;  %v1837_v24 = vld [vmem:[#allocation2 + $0x78] sm:$0xff]  ;;  %v1838_v1 = vld [vmem:[#allocation2 + $0x80] sm:$0xff] }
 0x17a   : > { %v1529_v50 = vpop.f32.mrf.mxu0  ;;  %v2071_v61 = vld [vmem:[#allocation2 + $0x79] sm:$0xff] }
 0x17b   : > { %1722 = vmatmul.bf16.gmra.mxu1 %v1629_v18  ;;  %1957 = vmatmul.bf16.gmra.mxu2 %v1864_v33  ;;  %v4293_v42 = vadd.f32 %v1526_v30, %v1347_v25  ;;  %v2099_v18 = vpack.c.bf16 %v2070_v16, %v2069_v28 }
 0x17c   : > { %2191 = vmatmul.bf16.gmra.mxu3 %v2098_v6 }
 0x17d   : > { %2425 = vmatmul.bf16.gmra.mxu0 %v4043_v27 }
 0x17e   : > { %v1061_v49 = vpop.f32.mrf.mxu2 }
 0x17f   : > { %v1114_v47 = vadd.f32 %v1061_v49, %v860_v54  ;;  %v1295_v59 = vpop.f32.mrf.mxu3 }
 0x180   : > { %v861_v43 = vpop.f32.mrf.mxu1 }
 0x181   : > { %v1348_v62 = vadd.f32 %v1295_v59, %v1114_v47  ;;  %v862_v30 = vadd.f32 %v861_v43, %v4095_v63  ;;  %v1602_v43 = vld [vmem:[#allocation2 + $0x62] sm:$0xff] }
 0x182   : > { %v1531_v37 = vpop.f32.mrf.mxu0 }
 0x183   : > { %v4297_v4 = vadd.f32 %v1529_v50, %v1348_v62 }
 0x186   : > { %v1063_v32 = vpop.f32.mrf.mxu2 }
 0x187   : > { %v1115_v27 = vadd.f32 %v1063_v32, %v862_v30  ;;  %v1297_v11 = vpop.f32.mrf.mxu3  ;;  %v2072_v30 = vld [vmem:[#allocation2 + $0x81] sm:$0xff]  ;;  %v1866_v32 = vpack.c.bf16 %v1838_v1, %v1837_v24  ;;  %v2073_v24 = vld [vmem:[#allocation2 + $0x91] sm:$0xff]  ;;  %v2074_v1 = vld [vmem:[#allocation2 + $0x99] sm:$0xff] }
 0x188   : > { %v864_v41 = vpop.f32.mrf.mxu1 }
 0x189   : > { %v1349_v33 = vadd.f32 %v1297_v11, %v1115_v27  ;;  %v865_v63 = vadd.f32 %v864_v41, %v4113_v34  ;;  %v1631_v34 = vpack.c.bf16 %v1603_v10, %v1602_v43  ;;  %v2100_v11 = vpack.c.bf16 %v2072_v30, %v2071_v61  ;;  %v1839_v43 = vld [vmem:[#allocation2 + $0x90] sm:$0xff]  ;;  %v1840_v10 = vld [vmem:[#allocation2 + $0x98] sm:$0xff] }
 0x18a   : > { %v1534_v38 = vpop.f32.mrf.mxu0  ;;  %v1867_v30 = vpack.c.bf16 %v1840_v10, %v1839_v43  ;;  %v2076_v43 = vld [vmem:[#allocation2 + $0xb1] sm:$0xff] }
 0x18b   : > { %1727 = vmatmul.bf16.gmra.mxu1 %v1630_v45  ;;  %1962 = vmatmul.bf16.gmra.mxu2 %v1865_v9  ;;  %v4300_v6 = vadd.f32 %v1531_v37, %v1349_v33 }
 0x18c   : > { %2196 = vmatmul.bf16.gmra.mxu3 %v2099_v18 }
 0x18d   : > { %2430 = vmatmul.bf16.gmra.mxu0 %v4047_v15 }
 0x18e   : > { %v1066_v25 = vpop.f32.mrf.mxu2 }
 0x18f   : > { %v1116_v50 = vadd.f32 %v1066_v25, %v865_v63  ;;  %v1300_v54 = vpop.f32.mrf.mxu3 }
 0x190   : > { %v866_v49 = vpop.f32.mrf.mxu1 }
 0x191   : > { %v1350_v47 = vadd.f32 %v1300_v54, %v1116_v50  ;;  %v867_v37 = vadd.f32 %v866_v49, %v4127_v22  ;;  %v1604_v54 = vld [vmem:[#allocation2 + $0x7a] sm:$0xff] }
 0x192   : > { %v1536_v59 = vpop.f32.mrf.mxu0 }
 0x193   : > { %v4304_v62 = vadd.f32 %v1534_v38, %v1350_v47  ;;  %v1605_v47 = vld [vmem:[#allocation2 + $0x82] sm:$0xff] }
 0x196   : > { %v1068_v28 = vpop.f32.mrf.mxu2 }
 0x197   : > { %v1117_v15 = vadd.f32 %v1068_v28, %v867_v37  ;;  %v1302_v16 = vpop.f32.mrf.mxu3 }
 0x198   : > { %v869_v27 = vpop.f32.mrf.mxu1 }
 0x199   : > { %v1351_v45 = vadd.f32 %v1302_v16, %v1117_v15  ;;  %v870_v22 = vadd.f32 %v869_v27, %v4138_v3  ;;  %v1632_v3 = vpack.c.bf16 %v1605_v47, %v1604_v54  ;;  %v2101_v15 = vpack.c.bf16 %v2074_v1, %v2073_v24  ;;  %v1842_v54 = vld [vmem:[#allocation2 + $0xb0] sm:$0xff] }
 0x19a   : > { %v1539_v9 = vpop.f32.mrf.mxu0  ;;  %v2075_v47 = vld [vmem:[#allocation2 + $0xa9] sm:$0xff] }
 0x19b   : > { %1732 = vmatmul.bf16.gmra.mxu1 %v1631_v34  ;;  %1967 = vmatmul.bf16.gmra.mxu2 %v1866_v32  ;;  %v4307_v41 = vadd.f32 %v1536_v59, %v1351_v45 }
 0x19c   : > { %2201 = vmatmul.bf16.gmra.mxu3 %v2100_v11 }
 0x19d   : > { %2435 = vmatmul.bf16.gmra.mxu0 %v4079_v60 }
 0x19e   : > { %v1071_v18 = vpop.f32.mrf.mxu2 }
 0x19f   : > { %v1118_v33 = vadd.f32 %v1071_v18, %v870_v22  ;;  %v1305_v38 = vpop.f32.mrf.mxu3 }
 0x1a0   : > { %v871_v63 = vpop.f32.mrf.mxu1 }
 0x1a1   : > { %v1352_v25 = vadd.f32 %v1305_v38, %v1118_v33  ;;  %v872_v59 = vadd.f32 %v871_v63, %v4146_v51  ;;  %v1606_v33 = vld [vmem:[#allocation2 + $0x92] sm:$0xff]  ;;  %v1607_v63 = vld [vmem:[#allocation2 + $0x9a] sm:$0xff] }
 0x1a2   : > { %v1541_v50 = vpop.f32.mrf.mxu0 }
 0x1a3   : > { %v4311_v49 = vadd.f32 %v1539_v9, %v1352_v25  ;;  %v1841_v25 = vld [vmem:[#allocation2 + $0xa8] sm:$0xff] }
 0x1a4   : > { %v1868_v24 = vpack.c.bf16 %v1842_v54, %v1841_v25 }
 0x1a6   : > { %v1073_v37 = vpop.f32.mrf.mxu2 }
 0x1a7   : > { %v1119_v60 = vadd.f32 %v1073_v37, %v872_v59  ;;  %v1307_v61 = vpop.f32.mrf.mxu3  ;;  %v2102_v37 = vpack.c.bf16 %v2076_v43, %v2075_v47 }
 0x1a8   : > { %v874_v28 = vpop.f32.mrf.mxu1 }
 0x1a9   : > { %v1353_v16 = vadd.f32 %v1307_v61, %v1119_v60  ;;  %v875_v51 = vadd.f32 %v874_v28, %v4063_v19  ;;  %v1633_v19 = vpack.c.bf16 %v1607_v63, %v1606_v33  ;;  %v2077_v33 = vld [vmem:[#allocation2 + $0xc1] sm:$0xff]  ;;  %v2078_v63 = vld [vmem:[#allocation2 + $0xc9] sm:$0xff] }
 0x1aa   : > { %v1544_v34 = vpop.f32.mrf.mxu0  ;;  %v2103_v43 = vpack.c.bf16 %v2078_v63, %v2077_v33 }
 0x1ab   : > { %1737 = vmatmul.bf16.gmra.mxu1 %v1632_v3  ;;  %1972 = vmatmul.bf16.gmra.mxu2 %v1867_v30  ;;  %v4314_v32 = vadd.f32 %v1541_v50, %v1353_v16 }
 0x1ac   : > { %2206 = vmatmul.bf16.gmra.mxu3 %v2101_v15 }
 0x1ad   : > { %2440 = vmatmul.bf16.gmra.mxu0 %v4099_v2 }
 0x1ae   : > { %v1076_v27 = vpop.f32.mrf.mxu2 }
 0x1af   : > { %v1120_v11 = vadd.f32 %v1076_v27, %v875_v51  ;;  %v1310_v45 = vpop.f32.mrf.mxu3  ;;  %v1608_v27 = vld [vmem:[#allocation2 + $0xaa] sm:$0xff] }
 0x1b0   : > { %v876_v9 = vpop.f32.mrf.mxu1 }
 0x1b1   : > { %v1354_v22 = vadd.f32 %v1310_v45, %v1120_v11  ;;  %v877_v50 = vadd.f32 %v876_v9, %v4077_v58  ;;  %v1609_v45 = vld [vmem:[#allocation2 + $0xb2] sm:$0xff]  ;;  %v1843_v9 = vld [vmem:[#allocation2 + $0xc0] sm:$0xff] }
 0x1b2   : > { %v1546_v18 = vpop.f32.mrf.mxu0 }
 0x1b3   : > { %v4318_v38 = vadd.f32 %v1544_v34, %v1354_v22  ;;  %v1844_v22 = vld [vmem:[#allocation2 + $0xc8] sm:$0xff] }
 0x1b6   : > { %v1078_v10 = vpop.f32.mrf.mxu2 }
 0x1b7   : > { %v1121_v2 = vadd.f32 %v1078_v10, %v877_v50  ;;  %v1312_v59 = vpop.f32.mrf.mxu3  ;;  %v1869_v50 = vpack.c.bf16 %v1844_v22, %v1843_v9 }
 0x1b8   : > { %v879_v1 = vpop.f32.mrf.mxu1 }
 0x1b9   : > { %v1355_v60 = vadd.f32 %v1312_v59, %v1121_v2  ;;  %v880_v58 = vadd.f32 %v879_v1, %v4089_v48  ;;  %v1634_v48 = vpack.c.bf16 %v1609_v45, %v1608_v27  ;;  %v2080_v27 = vld [vmem:[#allocation2 + $0xe1] sm:$0xff] }
 0x1ba   : > { %v1549_v61 = vpop.f32.mrf.mxu0 }
 0x1bb   : > { %1742 = vmatmul.bf16.gmra.mxu1 %v1633_v19  ;;  %1977 = vmatmul.bf16.gmra.mxu2 %v1868_v24  ;;  %v4321_v3 = vadd.f32 %v1546_v18, %v1355_v60 }
 0x1bc   : > { %2211 = vmatmul.bf16.gmra.mxu3 %v2102_v37 }
 0x1bd   : > { %2445 = vmatmul.bf16.gmra.mxu0 %v4131_v13 }
 0x1be   : > { %v1081_v30 = vpop.f32.mrf.mxu2 }
 0x1bf   : > { %v1122_v28 = vadd.f32 %v1081_v30, %v880_v58  ;;  %v1315_v15 = vpop.f32.mrf.mxu3  ;;  %v1610_v58 = vld [vmem:[#allocation2 + $0xc2] sm:$0xff] }
 0x1c0   : > { %v881_v16 = vpop.f32.mrf.mxu1 }
 0x1c1   : > { %v1356_v34 = vadd.f32 %v1315_v15, %v1122_v28  ;;  %v882_v18 = vadd.f32 %v881_v16, %v4097_v0  ;;  %v1611_v28 = vld [vmem:[#allocation2 + $0xca] sm:$0xff]  ;;  %v1845_v15 = vld [vmem:[#allocation2 + $0xd8] sm:$0xff]  ;;  %v1846_v16 = vld [vmem:[#allocation2 + $0xe0] sm:$0xff] }
 0x1c2   : > { %v1551_v51 = vpop.f32.mrf.mxu0  ;;  %v1870_v22 = vpack.c.bf16 %v1846_v16, %v1845_v15 }
 0x1c3   : > { %v4325_v11 = vadd.f32 %v1549_v61, %v1356_v34 }
 0x1c6   : > { %v1083_v25 = vpop.f32.mrf.mxu2 }
 0x1c7   : > { %v1123_v13 = vadd.f32 %v1083_v25, %v882_v18  ;;  %v1317_v54 = vpop.f32.mrf.mxu3 }
 0x1c8   : > { %v884_v47 = vpop.f32.mrf.mxu1 }
 0x1c9   : > { %v1357_v10 = vadd.f32 %v1317_v54, %v1123_v13  ;;  %v885_v0 = vadd.f32 %v884_v47, %v4115_v7  ;;  %v1635_v7 = vpack.c.bf16 %v1611_v28, %v1610_v58 }
 0x1ca   : > { %v1554_v2 = vpop.f32.mrf.mxu0 }
 0x1cb   : > { %1747 = vmatmul.bf16.gmra.mxu1 %v1634_v48  ;;  %1982 = vmatmul.bf16.gmra.mxu2 %v1869_v50  ;;  %v4328_v59 = vadd.f32 %v1551_v51, %v1357_v10  ;;  %v2079_v51 = vld [vmem:[#allocation2 + $0xd9] sm:$0xff] }
 0x1cc   : > { %2216 = vmatmul.bf16.gmra.mxu3 %v2103_v43  ;;  %v2104_v33 = vpack.c.bf16 %v2080_v27, %v2079_v51 }
 0x1cd   : > { %2450 = vmatmul.bf16.gmra.mxu0 %v4150_v56 }
 0x1ce   : > { %v1086_v19 = vpop.f32.mrf.mxu2 }
 0x1cf   : > { %v1124_v24 = vadd.f32 %v1086_v19, %v885_v0  ;;  %v1320_v1 = vpop.f32.mrf.mxu3  ;;  %v2081_v19 = vld [vmem:[#allocation2 + $0xf1] sm:$0xff] }
 0x1d0   : > { %v886_v37 = vpop.f32.mrf.mxu1 }
 0x1d1   : > { %v1358_v60 = vadd.f32 %v1320_v1, %v1124_v24  ;;  %v887_v34 = vadd.f32 %v886_v37, %v4129_v12  ;;  %v2082_v24 = vld [vmem:[#allocation2 + $0xf9] sm:$0xff] }
 0x1d2   : > { %v1556_v61 = vpop.f32.mrf.mxu0  ;;  %v2105_v58 = vpack.c.bf16 %v2082_v24, %v2081_v19 }
 0x1d3   : > { %v4332_v30 = vadd.f32 %v1554_v2, %v1358_v60 }
 0x1d6   : > { %v1088_v45 = vpop.f32.mrf.mxu2 }
 0x1d7   : > { %v1125_v56 = vadd.f32 %v1088_v45, %v887_v34  ;;  %v1322_v9 = vpop.f32.mrf.mxu3 }
 0x1d8   : > { %v889_v18 = vpop.f32.mrf.mxu1 }
 0x1d9   : > { %v1359_v63 = vadd.f32 %v1322_v9, %v1125_v56  ;;  %v890_v12 = vadd.f32 %v889_v18, %v4140_v44  ;;  %v1614_v56 = vld [vmem:[#allocation2 + $0xf2] sm:$0xff] }
 0x1da   : > { %v1559_v25 = vpop.f32.mrf.mxu0  ;;  %v1850_v18 = vld [vmem:[#allocation2 + $0x110] sm:$0xff] }
 0x1db   : > { %1752 = vmatmul.bf16.gmra.mxu1 %v1635_v7  ;;  %1987 = vmatmul.bf16.gmra.mxu2 %v1870_v22  ;;  %v4335_v13 = vadd.f32 %v1556_v61, %v1359_v63  ;;  %v1615_v7 = vld [vmem:[#allocation2 + $0xfa] sm:$0xff]  ;;  %v1849_v22 = vld [vmem:[#allocation2 + $0x108] sm:$0xff] }
 0x1dc   : > { %2221 = vmatmul.bf16.gmra.mxu3 %v2104_v33  ;;  %v2084_v33 = vld [vmem:[#allocation2 + $0x111] sm:$0xff] }
 0x1dd   : > { %2455 = vmatmul.bf16.gmra.mxu0 %v4170_v57 }
 0x1de   : > { %v1091_v54 = vpop.f32.mrf.mxu2 }
 0x1df   : > { %v1126_v48 = vadd.f32 %v1091_v54, %v890_v12  ;;  %v1325_v50 = vpop.f32.mrf.mxu3  ;;  %v1637_v12 = vpack.c.bf16 %v1615_v7, %v1614_v56  ;;  %v2085_v7 = vld [vmem:[#allocation2 + $0x121] sm:$0xff] }
 0x1e0   : > { %v891_v47 = vpop.f32.mrf.mxu1 }
 0x1e1   : > { %v1360_v43 = vadd.f32 %v1325_v50, %v1126_v48  ;;  %v892_v0 = vadd.f32 %v891_v47, %v4148_v26 }
 0x1e2   : > { %v1561_v10 = vpop.f32.mrf.mxu0 }
 0x1e3   : > { %v4339_v2 = vadd.f32 %v1559_v25, %v1360_v43 }
 0x1e6   : > { %v1093_v1 = vpop.f32.mrf.mxu2 }
 0x1e7   : > { %v1127_v37 = vadd.f32 %v1093_v1, %v892_v0  ;;  %v1327_v60 = vpop.f32.mrf.mxu3 }
 0x1e8   : > { %v1718_v61 = vpop.f32.mrf.mxu1 }
 0x1e9   : > { %v1361_v28 = vadd.f32 %v1327_v60, %v1127_v37  ;;  %v1798_v26 = vadd.f32 %v1718_v61, %v4168_v23  ;;  %v1872_v23 = vpack.c.bf16 %v1850_v18, %v1849_v22  ;;  %v2086_v22 = vld [vmem:[#allocation2 + $0x129] sm:$0xff] }
 0x1ea   : > { %v2421_v15 = vpop.f32.mrf.mxu0 }
 0x1eb   : > { %1757 = vmatmul.bf16.gmra.mxu1 %v4170_v57  ;;  %1992 = vmatmul.bf16.gmra.mxu2 %v4172_v5  ;;  %v4344_v44 = vadd.f32 %v1561_v10, %v1361_v28  ;;  %v2083_v5 = vld [vmem:[#allocation2 + $0x109] sm:$0xff] }
 0x1ec   : > { %2226 = vmatmul.bf16.gmra.mxu3 %v2105_v58  ;;  %v2106_v50 = vpack.c.bf16 %v2084_v33, %v2083_v5 }
 0x1ed   : > { %2460 = vmatmul.bf16.gmra.mxu0 %v4183_v52 }
 0x1ee   : > { %v1953_v16 = vpop.f32.mrf.mxu2 }
 0x1ef   : > { %v2187_v34 = vpop.f32.mrf.mxu3  ;;  %v2033_v51 = vadd.f32 %v1953_v16, %v1798_v26 }
 0x1f0   : > { %v1720_v27 = vpop.f32.mrf.mxu1 }
 0x1f1   : > { %v2267_v9 = vadd.f32 %v2187_v34, %v2033_v51  ;;  %v1799_v57 = vadd.f32 %v1720_v27, %v4176_v29  ;;  %v1616_v34 = vld [vmem:[#allocation2 + $0x10a] sm:$0xff]  ;;  %v1617_v51 = vld [vmem:[#allocation2 + $0x112] sm:$0xff]  ;;  %v1851_v27 = vld [vmem:[#allocation2 + $0x120] sm:$0xff] }
 0x1f2   : > { %v2423_v45 = vpop.f32.mrf.mxu0  ;;  %v1638_v33 = vpack.c.bf16 %v1617_v51, %v1616_v34 }
 0x1f3   : > { %v2501_v54 = vadd.f32 %v2421_v15, %v2267_v9 }
 0x1f5   : > { %v2635_v0 = vmul.f32 %v2501_v54, %v2501_v54 }
 0x1f6   : > { %v1955_v63 = vpop.f32.mrf.mxu2 }
 0x1f7   : > { %v2034_v25 = vadd.f32 %v1955_v63, %v1799_v57  ;;  %v2189_v52 = vpop.f32.mrf.mxu3 }
 0x1f8   : > { %v1723_v48 = vpop.f32.mrf.mxu1 }
 0x1f9   : > { %v2268_v47 = vadd.f32 %v2189_v52, %v2034_v25  ;;  %v1800_v1 = vadd.f32 %v1723_v48, %v4181_v35  ;;  %v2107_v52 = vpack.c.bf16 %v2086_v22, %v2085_v7  ;;  %v4432_v48 = vld [vmem:[#allocation6_spill] sm:$0xff] }
 0x1fa   : > { %v2426_v43 = vpop.f32.mrf.mxu0 }
 0x1fb   : > { %v2502_v10 = vadd.f32 %v2423_v45, %v2268_v47  ;;  %1762 = vmatmul.bf16.gmra.mxu1 %v1637_v12  ;;  %1997 = vmatmul.bf16.gmra.mxu2 %v1872_v23  ;;  %v1852_v45 = vld [vmem:[#allocation2 + $0x128] sm:$0xff] }
 0x1fc   : > { %2231 = vmatmul.bf16.gmra.mxu3 %v2106_v50  ;;  %v1873_v63 = vpack.c.bf16 %v1852_v45, %v1851_v27  ;;  %v2087_v45 = vld [vmem:[#allocation2 + $0x139] sm:$0xff] }
 0x1fd   : > { %2465 = vmatmul.bf16.gmra.mxu0 %v4206_v17  ;;  %v3360_v29 = vpack.c.bf16 %v2502_v10, %v2501_v54  ;;  %v2597_v19 = vadd.f32 %v2502_v10, %v2501_v54  ;;  %v2636_v24 = vmul.f32 %v2502_v10, %v2502_v10 }
 0x1fe   : > { %v1958_v37 = vpop.f32.mrf.mxu2 }
 0x1ff   : > { %3361 = vst [vmem:[%s4354_s30] sm:$0xff] %v3360_v29   ;;  %v2667_v60 = vadd.f32 %v2636_v24, %v2635_v0  ;;  %v2035_v61 = vadd.f32 %v1958_v37, %v1800_v1  ;;  %v2192_v58 = vpop.f32.mrf.mxu3 }
 0x200   : > { %v1725_v28 = vpop.f32.mrf.mxu1 }
 0x201   : > { %v2269_v15 = vadd.f32 %v2192_v58, %v2035_v61  ;;  %v1801_v9 = vadd.f32 %v1725_v28, %v4188_v55  ;;  %v1618_v58 = vld [vmem:[#allocation2 + $0x122] sm:$0xff]  ;;  %v1619_v28 = vld [vmem:[#allocation2 + $0x12a] sm:$0xff] }
 0x202   : > { %v2428_v26 = vpop.f32.mrf.mxu0 }
 0x203   : > { %v2503_v16 = vadd.f32 %v2426_v43, %v2269_v15  ;;  %v4433_v43 = vld [vmem:[#allocation3_spill] sm:$0xff]  ;;  %v1853_v15 = vld [vmem:[#allocation2 + $0x138] sm:$0xff] }
 0x205   : > { %v2598_v56 = vadd.f32 %v2597_v19, %v2503_v16  ;;  %v2637_v17 = vmul.f32 %v2503_v16, %v2503_v16 }
 0x206   : > { %v1960_v35 = vpop.f32.mrf.mxu2 }
 0x207   : > { %v2668_v18 = vadd.f32 %v2667_v60, %v2637_v17  ;;  %v2036_v57 = vadd.f32 %v1960_v35, %v1801_v9  ;;  %v2194_v5 = vpop.f32.mrf.mxu3  ;;  %v1639_v35 = vpack.c.bf16 %v1619_v28, %v1618_v58 }
 0x208   : > { %v1728_v25 = vpop.f32.mrf.mxu1 }
 0x209   : > { %v2270_v12 = vadd.f32 %v2194_v5, %v2036_v57  ;;  %v1802_v10 = vadd.f32 %v1728_v25, %v4433_v43 }
 0x20a   : > { %v2431_v23 = vpop.f32.mrf.mxu0 }
 0x20b   : > { %v2504_v54 = vadd.f32 %v2428_v26, %v2270_v12  ;;  %1767 = vmatmul.bf16.gmra.mxu1 %v1638_v33  ;;  %2002 = vmatmul.bf16.gmra.mxu2 %v1873_v63  ;;  %v1854_v26 = vld [vmem:[#allocation2 + $0x140] sm:$0xff] }
 0x20c   : > { %2236 = vmatmul.bf16.gmra.mxu3 %v2107_v52 }
 0x20d   : > { %2470 = vmatmul.bf16.gmra.mxu0 %v4432_v48  ;;  %v3365_v55 = vpack.c.bf16 %v2504_v54, %v2503_v16  ;;  %v2599_v50 = vadd.f32 %v2598_v56, %v2504_v54  ;;  %v2638_v47 = vmul.f32 %v2504_v54, %v2504_v54  ;;  %v4434_v16 = vld [vmem:[#allocation4_spill] sm:$0xff]  ;;  %v2088_v56 = vld [vmem:[#allocation2 + $0x141] sm:$0xff] }
 0x20e   : > { %v1963_v0 = vpop.f32.mrf.mxu2  ;;  %v2108_v5 = vpack.c.bf16 %v2088_v56, %v2087_v45  ;;  %v4435_v54 = vld [vmem:[#allocation5_spill] sm:$0xff] }
 0x20f   : > { %3452 = vst [vmem:[%s4354_s30 + $0x8] sm:$0xff] %v3365_v55   ;;  %v2669_v29 = vadd.f32 %v2668_v18, %v2638_v47  ;;  %v2037_v19 = vadd.f32 %v1963_v0, %v1802_v10  ;;  %v2197_v24 = vpop.f32.mrf.mxu3  ;;  %v1874_v18 = vpack.c.bf16 %v1854_v26, %v1853_v15  ;;  %v2089_v15 = vld [vmem:[#allocation2 + $0x151] sm:$0xff]  ;;  %v2090_v26 = vld [vmem:[#allocation2 + $0x159] sm:$0xff] }
 0x210   : > { %v1730_v1 = vpop.f32.mrf.mxu1 }
 0x211   : > { %v2271_v37 = vadd.f32 %v2197_v24, %v2037_v19  ;;  %v1803_v27 = vadd.f32 %v1730_v1, %v4434_v16  ;;  %v1620_v24 = vld [vmem:[#allocation2 + $0x13a] sm:$0xff]  ;;  %v1621_v1 = vld [vmem:[#allocation2 + $0x142] sm:$0xff] }
 0x212   : > { %v2433_v60 = vpop.f32.mrf.mxu0  ;;  %v1640_v45 = vpack.c.bf16 %v1621_v1, %v1620_v24  ;;  %v2091_v24 = vld [vmem:[#allocation2 + $0x169] sm:$0xff]  ;;  %v2092_v1 = vld [vmem:[#allocation2 + $0x171] sm:$0xff] }
 0x213   : > { %v2505_v61 = vadd.f32 %v2431_v23, %v2271_v37  ;;  %v1855_v37 = vld [vmem:[#allocation2 + $0x150] sm:$0xff] }
 0x215   : > { %v2600_v34 = vadd.f32 %v2599_v50, %v2505_v61  ;;  %v2639_v51 = vmul.f32 %v2505_v61, %v2505_v61 }
 0x216   : > { %v1965_v17 = vpop.f32.mrf.mxu2 }
 0x217   : > { %v2670_v9 = vadd.f32 %v2669_v29, %v2639_v51  ;;  %v2038_v7 = vadd.f32 %v1965_v17, %v1803_v27  ;;  %v2199_v22 = vpop.f32.mrf.mxu3 }
 0x218   : > { %v1733_v57 = vpop.f32.mrf.mxu1 }
 0x219   : > { %v2272_v33 = vadd.f32 %v2199_v22, %v2038_v7  ;;  %v1804_v48 = vadd.f32 %v1733_v57, %v4435_v54 }
 0x21a   : > { %v2436_v63 = vpop.f32.mrf.mxu0 }
 0x21b   : > { %v2506_v25 = vadd.f32 %v2433_v60, %v2272_v33  ;;  %1772 = vmatmul.bf16.gmra.mxu1 %v1639_v35  ;;  %2007 = vmatmul.bf16.gmra.mxu2 %v1874_v18  ;;  %v1856_v60 = vld [vmem:[#allocation2 + $0x158] sm:$0xff] }
 0x21c   : > { %2241 = vmatmul.bf16.gmra.mxu3 %v2108_v5  ;;  %v1875_v56 = vpack.c.bf16 %v1856_v60, %v1855_v37  ;;  %v4437_v33 = vld [vmem:[#allocation8_spill] sm:$0xff] }
 0x21d   : > { %2475 = vmatmul.bf16.gmra.mxu0 %v4253_v39  ;;  %v3370_v52 = vpack.c.bf16 %v2506_v25, %v2505_v61  ;;  %v2601_v12 = vadd.f32 %v2600_v34, %v2506_v25  ;;  %v2640_v23 = vmul.f32 %v2506_v25, %v2506_v25  ;;  %v4436_v61 = vld [vmem:[#allocation7_spill] sm:$0xff] }
 0x21e   : > { %v1968_v55 = vpop.f32.mrf.mxu2 }
 0x21f   : > { %3453 = vst [vmem:[%s4354_s30 + $0x10] sm:$0xff] %v3370_v52   ;;  %v2671_v50 = vadd.f32 %v2670_v9, %v2640_v23  ;;  %v2039_v47 = vadd.f32 %v1968_v55, %v1804_v48  ;;  %v2202_v43 = vpop.f32.mrf.mxu3  ;;  %v2109_v9 = vpack.c.bf16 %v2090_v26, %v2089_v15  ;;  %v2110_v26 = vpack.c.bf16 %v2092_v1, %v2091_v24 }
 0x220   : > { %v1735_v10 = vpop.f32.mrf.mxu1 }
 0x221   : > { %v2273_v0 = vadd.f32 %v2202_v43, %v2039_v47  ;;  %v1805_v28 = vadd.f32 %v1735_v10, %v4436_v61  ;;  %v1622_v47 = vld [vmem:[#allocation2 + $0x152] sm:$0xff]  ;;  %v1623_v43 = vld [vmem:[#allocation2 + $0x15a] sm:$0xff]  ;;  %v1857_v10 = vld [vmem:[#allocation2 + $0x168] sm:$0xff] }
 0x222   : > { %v2438_v29 = vpop.f32.mrf.mxu0  ;;  %v1641_v61 = vpack.c.bf16 %v1623_v43, %v1622_v47  ;;  %v2328_v47 = vld [vmem:[#allocation2 + $0x18a] sm:$0xff] }
 0x223   : > { %v2507_v19 = vadd.f32 %v2436_v63, %v2273_v0  ;;  %v1858_v0 = vld [vmem:[#allocation2 + $0x170] sm:$0xff] }
 0x225   : > { %v2602_v58 = vadd.f32 %v2601_v12, %v2507_v19  ;;  %v2641_v39 = vmul.f32 %v2507_v19, %v2507_v19 }
 0x226   : > { %v1970_v34 = vpop.f32.mrf.mxu2 }
 0x227   : > { %v2672_v51 = vadd.f32 %v2671_v50, %v2641_v39  ;;  %v2040_v16 = vadd.f32 %v1970_v34, %v1805_v28  ;;  %v2204_v27 = vpop.f32.mrf.mxu3  ;;  %v1876_v28 = vpack.c.bf16 %v1858_v0, %v1857_v10 }
 0x228   : > { %v1738_v17 = vpop.f32.mrf.mxu1 }
 0x229   : > { %v2274_v7 = vadd.f32 %v2204_v27, %v2040_v16  ;;  %v1806_v63 = vadd.f32 %v1738_v17, %v4437_v33 }
 0x22a   : > { %v2441_v22 = vpop.f32.mrf.mxu0 }
 0x22b   : > { %v2508_v35 = vadd.f32 %v2438_v29, %v2274_v7  ;;  %1777 = vmatmul.bf16.gmra.mxu1 %v1640_v45  ;;  %2012 = vmatmul.bf16.gmra.mxu2 %v1875_v56  ;;  %v4438_v56 = vld [vmem:[#allocation9_spill] sm:$0xff] }
 0x22c   : > { %2246 = vmatmul.bf16.gmra.mxu3 %v2109_v9 }
 0x22d   : > { %2480 = vmatmul.bf16.gmra.mxu0 %v4262_v8  ;;  %v3375_v18 = vpack.c.bf16 %v2508_v35, %v2507_v19  ;;  %v2603_v57 = vadd.f32 %v2602_v58, %v2508_v35  ;;  %v2642_v5 = vmul.f32 %v2508_v35, %v2508_v35 }
 0x22e   : > { %v1973_v25 = vpop.f32.mrf.mxu2 }
 0x22f   : > { %3454 = vst [vmem:[%s4354_s30 + $0x18] sm:$0xff] %v3375_v18   ;;  %v2673_v52 = vadd.f32 %v2672_v51, %v2642_v5  ;;  %v2041_v12 = vadd.f32 %v1973_v25, %v1806_v63  ;;  %v2207_v23 = vpop.f32.mrf.mxu3  ;;  %v1624_v63 = vld [vmem:[#allocation2 + $0x16a] sm:$0xff]  ;;  %v1625_v25 = vld [vmem:[#allocation2 + $0x172] sm:$0xff] }
 0x230   : > { %v1740_v54 = vpop.f32.mrf.mxu1 }
 0x231   : > { %v2275_v48 = vadd.f32 %v2207_v23, %v2041_v12  ;;  %v1807_v19 = vadd.f32 %v1740_v54, %v4256_v46  ;;  %v1860_v12 = vld [vmem:[#allocation2 + $0x188] sm:$0xff] }
 0x232   : > { %v2443_v55 = vpop.f32.mrf.mxu0  ;;  %v2093_v23 = vld [vmem:[#allocation2 + $0x181] sm:$0xff] }
 0x233   : > { %v2509_v50 = vadd.f32 %v2441_v22, %v2275_v48 }
 0x235   : > { %v2604_v29 = vadd.f32 %v2603_v57, %v2509_v50  ;;  %v2643_v8 = vmul.f32 %v2509_v50, %v2509_v50 }
 0x236   : > { %v1975_v37 = vpop.f32.mrf.mxu2 }
 0x237   : > { %v2674_v60 = vadd.f32 %v2673_v52, %v2643_v8  ;;  %v2042_v58 = vadd.f32 %v1975_v37, %v1807_v19  ;;  %v2209_v39 = vpop.f32.mrf.mxu3  ;;  %v1859_v52 = vld [vmem:[#allocation2 + $0x180] sm:$0xff]  ;;  %v1642_v8 = vpack.c.bf16 %v1625_v25, %v1624_v63 }
 0x238   : > { %v1743_v15 = vpop.f32.mrf.mxu1  ;;  %v1877_v19 = vpack.c.bf16 %v1860_v12, %v1859_v52  ;;  %v3504_v25 = vld [vmem:[#allocation2] sm:$0xff] }
 0x239   : > { %v2276_v34 = vadd.f32 %v2209_v39, %v2042_v58  ;;  %v1808_v17 = vadd.f32 %v1743_v15, %v4438_v56  ;;  %v1878_v52 = vpack.c.bf16 %v3504_v25, %v3504_v25 }
 0x23a   : > { %v2446_v51 = vpop.f32.mrf.mxu0 }
 0x23b   : > { %v2510_v16 = vadd.f32 %v2443_v55, %v2276_v34  ;;  %1782 = vmatmul.bf16.gmra.mxu1 %v1641_v61  ;;  %2017 = vmatmul.bf16.gmra.mxu2 %v1876_v28  ;;  %v2094_v55 = vld [vmem:[#allocation2 + $0x189] sm:$0xff] }
 0x23c   : > { %2251 = vmatmul.bf16.gmra.mxu3 %v2110_v26  ;;  %v2111_v1 = vpack.c.bf16 %v2094_v55, %v2093_v23 }
 0x23d   : > { %2485 = vmatmul.bf16.gmra.mxu0 %v4271_v36  ;;  %v3380_v46 = vpack.c.bf16 %v2510_v16, %v2509_v50  ;;  %v2605_v27 = vadd.f32 %v2604_v29, %v2510_v16  ;;  %v2644_v45 = vmul.f32 %v2510_v16, %v2510_v16  ;;  %v2327_v50 = vld [vmem:[#allocation2 + $0x182] sm:$0xff] }
 0x23e   : > { %v1978_v9 = vpop.f32.mrf.mxu2  ;;  %v2345_v37 = vpack.c.bf16 %v2328_v47, %v2327_v50 }
 0x23f   : > { %3455 = vst [vmem:[%s4354_s30 + $0x20] sm:$0xff] %v3380_v46   ;;  %v2675_v7 = vadd.f32 %v2674_v60, %v2644_v45  ;;  %v2043_v22 = vadd.f32 %v1978_v9, %v1808_v17  ;;  %v2212_v35 = vpop.f32.mrf.mxu3  ;;  %v2095_v17 = vld [vmem:[#allocation2 + $0x199] sm:$0xff] }
 0x240   : > { %v1745_v18 = vpop.f32.mrf.mxu1 }
 0x241   : > { %v2277_v57 = vadd.f32 %v2212_v35, %v2043_v22  ;;  %v1809_v48 = vadd.f32 %v1745_v18, %v4265_v40  ;;  %v2096_v35 = vld [vmem:[#allocation2 + $0x1a1] sm:$0xff] }
 0x242   : > { %v2448_v5 = vpop.f32.mrf.mxu0  ;;  %v2329_v18 = vld [vmem:[#allocation2 + $0x19a] sm:$0xff]  ;;  %v2112_v23 = vpack.c.bf16 %v2096_v35, %v2095_v17 }
 0x243   : > { %v2511_v33 = vadd.f32 %v2446_v51, %v2277_v57  ;;  %v2330_v57 = vld [vmem:[#allocation2 + $0x1a2] sm:$0xff] }
 0x245   : > { %v2606_v36 = vadd.f32 %v2605_v27, %v2511_v33  ;;  %v2645_v54 = vmul.f32 %v2511_v33, %v2511_v33 }
 0x246   : > { %v1980_v43 = vpop.f32.mrf.mxu2 }
 0x247   : > { %v2676_v10 = vadd.f32 %v2675_v7, %v2645_v54  ;;  %v2044_v0 = vadd.f32 %v1980_v43, %v1809_v48  ;;  %v2214_v29 = vpop.f32.mrf.mxu3 }
 0x248   : > { %v1748_v24 = vpop.f32.mrf.mxu1 }
 0x249   : > { %v2278_v60 = vadd.f32 %v2214_v29, %v2044_v0  ;;  %v1810_v15 = vadd.f32 %v1748_v24, %v4268_v53 }
 0x24a   : > { %v2451_v58 = vpop.f32.mrf.mxu0 }
 0x24b   : > { %v2512_v39 = vadd.f32 %v2448_v5, %v2278_v60  ;;  %1787 = vmatmul.bf16.gmra.mxu1 %v1642_v8  ;;  %2022 = vmatmul.bf16.gmra.mxu2 %v1877_v19 }
 0x24c   : > { %2256 = vmatmul.bf16.gmra.mxu3 %v2111_v1 }
 0x24d   : > { %2490 = vmatmul.bf16.gmra.mxu0 %v2345_v37  ;;  %v3385_v40 = vpack.c.bf16 %v2512_v39, %v2511_v33  ;;  %v2607_v61 = vadd.f32 %v2606_v36, %v2512_v39  ;;  %v2646_v28 = vmul.f32 %v2512_v39, %v2512_v39  ;;  %v2346_v36 = vpack.c.bf16 %v2330_v57, %v2329_v18 }
 0x24e   : > { %v1983_v26 = vpop.f32.mrf.mxu2 }
 0x24f   : > { %3456 = vst [vmem:[%s4354_s30 + $0x28] sm:$0xff] %v3385_v40   ;;  %v2677_v34 = vadd.f32 %v2676_v10, %v2646_v28  ;;  %v2045_v51 = vadd.f32 %v1983_v26, %v1810_v15  ;;  %v2217_v16 = vpop.f32.mrf.mxu3 }
 0x250   : > { %v1750_v46 = vpop.f32.mrf.mxu1 }
 0x251   : > { %v2279_v27 = vadd.f32 %v2217_v16, %v2045_v51  ;;  %v1811_v22 = vadd.f32 %v1750_v46, %v4278_v31 }
 0x252   : > { %v2453_v45 = vpop.f32.mrf.mxu0 }
 0x253   : > { %v2513_v56 = vadd.f32 %v2451_v58, %v2279_v27 }
 0x255   : > { %v2608_v9 = vadd.f32 %v2607_v61, %v2513_v56  ;;  %v2647_v7 = vmul.f32 %v2513_v56, %v2513_v56 }
 0x256   : > { %v1985_v5 = vpop.f32.mrf.mxu2 }
 0x257   : > { %v2678_v33 = vadd.f32 %v2677_v34, %v2647_v7  ;;  %v2046_v53 = vadd.f32 %v1985_v5, %v1811_v22  ;;  %v2219_v63 = vpop.f32.mrf.mxu3 }
 0x258   : > { %v1753_v12 = vpop.f32.mrf.mxu1 }
 0x259   : > { %v2280_v54 = vadd.f32 %v2219_v63, %v2046_v53  ;;  %v1812_v43 = vadd.f32 %v1753_v12, %v4281_v20 }
 0x25a   : > { %v2456_v48 = vpop.f32.mrf.mxu0 }
 0x25b   : > { %v2514_v55 = vadd.f32 %v2453_v45, %v2280_v54  ;;  %1792 = vmatmul.bf16.gmra.mxu1 %v2345_v37  ;;  %2027 = vmatmul.bf16.gmra.mxu2 %v1878_v52 }
 0x25c   : > { %2261 = vmatmul.bf16.gmra.mxu3 %v2112_v23 }
 0x25d   : > { %2495 = vmatmul.bf16.gmra.mxu0 %v2346_v36  ;;  %v3390_v31 = vpack.c.bf16 %v2514_v55, %v2513_v56  ;;  %v2609_v50 = vadd.f32 %v2608_v9, %v2514_v55  ;;  %v2648_v47 = vmul.f32 %v2514_v55, %v2514_v55 }
 0x25e   : > { %v1988_v10 = vpop.f32.mrf.mxu2 }
 0x25f   : > { %3457 = vst [vmem:[%s4354_s30 + $0x30] sm:$0xff] %v3390_v31   ;;  %v2679_v0 = vadd.f32 %v2678_v33, %v2648_v47  ;;  %v2047_v29 = vadd.f32 %v1988_v10, %v1812_v43  ;;  %v2222_v8 = vpop.f32.mrf.mxu3 }
 0x260   : > { %v1755_v19 = vpop.f32.mrf.mxu1 }
 0x261   : > { %v2281_v24 = vadd.f32 %v2222_v8, %v2047_v29  ;;  %v1813_v39 = vadd.f32 %v1755_v19, %v4286_v14 }
 0x262   : > { %v2458_v1 = vpop.f32.mrf.mxu0 }
 0x263   : > { %v2515_v60 = vadd.f32 %v2456_v48, %v2281_v24 }
 0x265   : > { %v2610_v58 = vadd.f32 %v2609_v50, %v2515_v60  ;;  %v2649_v37 = vmul.f32 %v2515_v60, %v2515_v60 }
 0x266   : > { %v1990_v40 = vpop.f32.mrf.mxu2 }
 0x267   : > { %v2680_v61 = vadd.f32 %v2679_v0, %v2649_v37  ;;  %v2048_v28 = vadd.f32 %v1990_v40, %v1813_v39  ;;  %v2224_v15 = vpop.f32.mrf.mxu3 }
 0x268   : > { %v1758_v26 = vpop.f32.mrf.mxu1 }
 0x269   : > { %v2282_v20 = vadd.f32 %v2224_v15, %v2048_v28  ;;  %v1814_v45 = vadd.f32 %v1758_v26, %v4290_v21 }
 0x26a   : > { %v2461_v34 = vpop.f32.mrf.mxu0 }
 0x26b   : > { %v2516_v51 = vadd.f32 %v2458_v1, %v2282_v20 }
 0x26d   : > { %v3395_v16 = vpack.c.bf16 %v2516_v51, %v2515_v60  ;;  %v2611_v46 = vadd.f32 %v2610_v58, %v2516_v51  ;;  %v2650_v27 = vmul.f32 %v2516_v51, %v2516_v51 }
 0x26e   : > { %v1993_v56 = vpop.f32.mrf.mxu2 }
 0x26f   : > { %3458 = vst [vmem:[%s4354_s30 + $0x38] sm:$0xff] %v3395_v16   ;;  %v2681_v17 = vadd.f32 %v2680_v61, %v2650_v27  ;;  %v2049_v9 = vadd.f32 %v1993_v56, %v1814_v45  ;;  %v2227_v7 = vpop.f32.mrf.mxu3 }
 0x270   : > { %v1760_v22 = vpop.f32.mrf.mxu1 }
 0x271   : > { %v2283_v14 = vadd.f32 %v2227_v7, %v2049_v9  ;;  %v1815_v33 = vadd.f32 %v1760_v22, %v4293_v42 }
 0x272   : > { %v2463_v35 = vpop.f32.mrf.mxu0 }
 0x273   : > { %v2517_v18 = vadd.f32 %v2461_v34, %v2283_v14 }
 0x275   : > { %v2612_v57 = vadd.f32 %v2611_v46, %v2517_v18  ;;  %v2651_v5 = vmul.f32 %v2517_v18, %v2517_v18 }
 0x276   : > { %v1995_v53 = vpop.f32.mrf.mxu2 }
 0x277   : > { %v2682_v63 = vadd.f32 %v2681_v17, %v2651_v5  ;;  %v2050_v25 = vadd.f32 %v1995_v53, %v1815_v33  ;;  %v2229_v52 = vpop.f32.mrf.mxu3 }
 0x278   : > { %v1763_v12 = vpop.f32.mrf.mxu1 }
 0x279   : > { %v2284_v21 = vadd.f32 %v2229_v52, %v2050_v25  ;;  %v1816_v31 = vadd.f32 %v1763_v12, %v4297_v4 }
 0x27a   : > { %v2466_v23 = vpop.f32.mrf.mxu0 }
 0x27b   : > { %v2518_v36 = vadd.f32 %v2463_v35, %v2284_v21 }
 0x27d   : > { %v3400_v54 = vpack.c.bf16 %v2518_v36, %v2517_v18  ;;  %v2613_v48 = vadd.f32 %v2612_v57, %v2518_v36  ;;  %v2652_v55 = vmul.f32 %v2518_v36, %v2518_v36 }
 0x27e   : > { %v1998_v50 = vpop.f32.mrf.mxu2 }
 0x27f   : > { %3459 = vst [vmem:[%s4354_s30 + $0x40] sm:$0xff] %v3400_v54   ;;  %v2683_v47 = vadd.f32 %v2682_v63, %v2652_v55  ;;  %v2051_v43 = vadd.f32 %v1998_v50, %v1816_v31  ;;  %v2232_v10 = vpop.f32.mrf.mxu3 }
 0x280   : > { %v1765_v0 = vpop.f32.mrf.mxu1 }
 0x281   : > { %v2285_v42 = vadd.f32 %v2232_v10, %v2051_v43  ;;  %v1817_v1 = vadd.f32 %v1765_v0, %v4300_v6 }
 0x282   : > { %v2468_v29 = vpop.f32.mrf.mxu0 }
 0x283   : > { %v2519_v8 = vadd.f32 %v2466_v23, %v2285_v42 }
 0x285   : > { %v2614_v19 = vadd.f32 %v2613_v48, %v2519_v8  ;;  %v2653_v24 = vmul.f32 %v2519_v8, %v2519_v8 }
 0x286   : > { %v2000_v60 = vpop.f32.mrf.mxu2 }
 0x287   : > { %v2684_v58 = vadd.f32 %v2683_v47, %v2653_v24  ;;  %v2052_v37 = vadd.f32 %v2000_v60, %v1817_v1  ;;  %v2234_v39 = vpop.f32.mrf.mxu3 }
 0x288   : > { %v1768_v40 = vpop.f32.mrf.mxu1 }
 0x289   : > { %v2286_v4 = vadd.f32 %v2234_v39, %v2052_v37  ;;  %v1818_v34 = vadd.f32 %v1768_v40, %v4304_v62 }
 0x28a   : > { %v2471_v61 = vpop.f32.mrf.mxu0 }
 0x28b   : > { %v2520_v28 = vadd.f32 %v2468_v29, %v2286_v4 }
 0x28d   : > { %v3405_v15 = vpack.c.bf16 %v2520_v28, %v2519_v8  ;;  %v2615_v26 = vadd.f32 %v2614_v19, %v2520_v28  ;;  %v2654_v20 = vmul.f32 %v2520_v28, %v2520_v28 }
 0x28e   : > { %v2003_v51 = vpop.f32.mrf.mxu2 }
 0x28f   : > { %3460 = vst [vmem:[%s4354_s30 + $0x48] sm:$0xff] %v3405_v15   ;;  %v2685_v16 = vadd.f32 %v2684_v58, %v2654_v20  ;;  %v2053_v46 = vadd.f32 %v2003_v51, %v1818_v34  ;;  %v2237_v27 = vpop.f32.mrf.mxu3 }
 0x290   : > { %v1770_v45 = vpop.f32.mrf.mxu1 }
 0x291   : > { %v2287_v6 = vadd.f32 %v2237_v27, %v2053_v46  ;;  %v1819_v22 = vadd.f32 %v1770_v45, %v4307_v41 }
 0x292   : > { %v2473_v56 = vpop.f32.mrf.mxu0 }
 0x293   : > { %v2521_v17 = vadd.f32 %v2471_v61, %v2287_v6 }
 0x295   : > { %v2616_v9 = vadd.f32 %v2615_v26, %v2521_v17  ;;  %v2655_v7 = vmul.f32 %v2521_v17, %v2521_v17 }
 0x296   : > { %v2005_v14 = vpop.f32.mrf.mxu2 }
 0x297   : > { %v2686_v35 = vadd.f32 %v2685_v16, %v2655_v7  ;;  %v2054_v18 = vadd.f32 %v2005_v14, %v1819_v22  ;;  %v2239_v57 = vpop.f32.mrf.mxu3 }
 0x298   : > { %v1773_v5 = vpop.f32.mrf.mxu1 }
 0x299   : > { %v2288_v62 = vadd.f32 %v2239_v57, %v2054_v18  ;;  %v1820_v12 = vadd.f32 %v1773_v5, %v4311_v49 }
 0x29a   : > { %v2476_v33 = vpop.f32.mrf.mxu0 }
 0x29b   : > { %v2522_v53 = vadd.f32 %v2473_v56, %v2288_v62 }
 0x29d   : > { %v3410_v63 = vpack.c.bf16 %v2522_v53, %v2521_v17  ;;  %v2617_v25 = vadd.f32 %v2616_v9, %v2522_v53  ;;  %v2656_v52 = vmul.f32 %v2522_v53, %v2522_v53 }
 0x29e   : > { %v2008_v21 = vpop.f32.mrf.mxu2 }
 0x29f   : > { %3461 = vst [vmem:[%s4354_s30 + $0x50] sm:$0xff] %v3410_v63   ;;  %v2687_v23 = vadd.f32 %v2686_v35, %v2656_v52  ;;  %v2055_v36 = vadd.f32 %v2008_v21, %v1820_v12  ;;  %v2242_v54 = vpop.f32.mrf.mxu3 }
 0x2a0   : > { %v1775_v48 = vpop.f32.mrf.mxu1 }
 0x2a1   : > { %v2289_v41 = vadd.f32 %v2242_v54, %v2055_v36  ;;  %v1821_v43 = vadd.f32 %v1775_v48, %v4314_v32 }
 0x2a2   : > { %v2478_v55 = vpop.f32.mrf.mxu0 }
 0x2a3   : > { %v2523_v31 = vadd.f32 %v2476_v33, %v2289_v41 }
 0x2a5   : > { %v2618_v50 = vadd.f32 %v2617_v25, %v2523_v31  ;;  %v2657_v47 = vmul.f32 %v2523_v31, %v2523_v31 }
 0x2a6   : > { %v2010_v10 = vpop.f32.mrf.mxu2 }
 0x2a7   : > { %v2688_v0 = vadd.f32 %v2687_v23, %v2657_v47  ;;  %v2056_v42 = vadd.f32 %v2010_v10, %v1821_v43  ;;  %v2244_v29 = vpop.f32.mrf.mxu3 }
 0x2a8   : > { %v1778_v8 = vpop.f32.mrf.mxu1 }
 0x2a9   : > { %v2290_v49 = vadd.f32 %v2244_v29, %v2056_v42  ;;  %v1822_v37 = vadd.f32 %v1778_v8, %v4318_v38 }
 0x2aa   : > { %v2481_v19 = vpop.f32.mrf.mxu0 }
 0x2ab   : > { %v2524_v24 = vadd.f32 %v2478_v55, %v2290_v49 }
 0x2ad   : > { %v3415_v1 = vpack.c.bf16 %v2524_v24, %v2523_v31  ;;  %v2619_v60 = vadd.f32 %v2618_v50, %v2524_v24  ;;  %v2658_v58 = vmul.f32 %v2524_v24, %v2524_v24 }
 0x2ae   : > { %v2013_v39 = vpop.f32.mrf.mxu2 }
 0x2af   : > { %3462 = vst [vmem:[%s4354_s30 + $0x58] sm:$0xff] %v3415_v1   ;;  %v2689_v40 = vadd.f32 %v2688_v0, %v2658_v58  ;;  %v2057_v4 = vadd.f32 %v2013_v39, %v1822_v37  ;;  %v2247_v61 = vpop.f32.mrf.mxu3 }
 0x2b0   : > { %v1780_v28 = vpop.f32.mrf.mxu1 }
 0x2b1   : > { %v2291_v32 = vadd.f32 %v2247_v61, %v2057_v4  ;;  %v1823_v51 = vadd.f32 %v1780_v28, %v4321_v3 }
 0x2b2   : > { %v2483_v15 = vpop.f32.mrf.mxu0 }
 0x2b3   : > { %v2525_v26 = vadd.f32 %v2481_v19, %v2291_v32 }
 0x2b5   : > { %v2620_v20 = vadd.f32 %v2619_v60, %v2525_v26  ;;  %v2659_v34 = vmul.f32 %v2525_v26, %v2525_v26 }
 0x2b6   : > { %v2015_v16 = vpop.f32.mrf.mxu2 }
 0x2b7   : > { %v2690_v46 = vadd.f32 %v2689_v40, %v2659_v34  ;;  %v2058_v27 = vadd.f32 %v2015_v16, %v1823_v51  ;;  %v2249_v45 = vpop.f32.mrf.mxu3 }
 0x2b8   : > { %v1783_v6 = vpop.f32.mrf.mxu1 }
 0x2b9   : > { %v2292_v38 = vadd.f32 %v2249_v45, %v2058_v27  ;;  %v1824_v14 = vadd.f32 %v1783_v6, %v4325_v11 }
 0x2ba   : > { %v2486_v56 = vpop.f32.mrf.mxu0 }
 0x2bb   : > { %v2526_v17 = vadd.f32 %v2483_v15, %v2292_v38 }
 0x2bd   : > { %v3420_v9 = vpack.c.bf16 %v2526_v17, %v2525_v26  ;;  %v2621_v7 = vadd.f32 %v2620_v20, %v2526_v17  ;;  %v2660_v22 = vmul.f32 %v2526_v17, %v2526_v17 }
 0x2be   : > { %v2018_v35 = vpop.f32.mrf.mxu2 }
 0x2bf   : > { %3463 = vst [vmem:[%s4354_s30 + $0x60] sm:$0xff] %v3420_v9   ;;  %v2691_v18 = vadd.f32 %v2690_v46, %v2660_v22  ;;  %v2059_v57 = vadd.f32 %v2018_v35, %v1824_v14  ;;  %v2252_v5 = vpop.f32.mrf.mxu3 }
 0x2c0   : > { %v1785_v62 = vpop.f32.mrf.mxu1 }
 0x2c1   : > { %v2293_v3 = vadd.f32 %v2252_v5, %v2059_v57  ;;  %v1825_v52 = vadd.f32 %v1785_v62, %v4328_v59 }
 0x2c2   : > { %v2488_v33 = vpop.f32.mrf.mxu0 }
 0x2c3   : > { %v2527_v53 = vadd.f32 %v2486_v56, %v2293_v3 }
 0x2c5   : > { %v2622_v63 = vadd.f32 %v2621_v7, %v2527_v53  ;;  %v2661_v25 = vmul.f32 %v2527_v53, %v2527_v53 }
 0x2c6   : > { %v2020_v12 = vpop.f32.mrf.mxu2 }
 0x2c7   : > { %v2692_v21 = vadd.f32 %v2691_v18, %v2661_v25  ;;  %v2060_v23 = vadd.f32 %v2020_v12, %v1825_v52  ;;  %v2254_v36 = vpop.f32.mrf.mxu3 }
 0x2c8   : > { %v1788_v54 = vpop.f32.mrf.mxu1 }
 0x2c9   : > { %v2294_v11 = vadd.f32 %v2254_v36, %v2060_v23  ;;  %v1826_v47 = vadd.f32 %v1788_v54, %v4332_v30 }
 0x2ca   : > { %v2491_v41 = vpop.f32.mrf.mxu0 }
 0x2cb   : > { %v2528_v48 = vadd.f32 %v2488_v33, %v2294_v11 }
 0x2cd   : > { %v3425_v55 = vpack.c.bf16 %v2528_v48, %v2527_v53  ;;  %v2623_v31 = vadd.f32 %v2622_v63, %v2528_v48  ;;  %v2662_v50 = vmul.f32 %v2528_v48, %v2528_v48 }
 0x2ce   : > { %v2023_v43 = vpop.f32.mrf.mxu2 }
 0x2cf   : > { %3464 = vst [vmem:[%s4354_s30 + $0x68] sm:$0xff] %v3425_v55   ;;  %v2693_v10 = vadd.f32 %v2692_v21, %v2662_v50  ;;  %v2061_v0 = vadd.f32 %v2023_v43, %v1826_v47  ;;  %v2257_v42 = vpop.f32.mrf.mxu3 }
 0x2d0   : > { %v1790_v29 = vpop.f32.mrf.mxu1 }
 0x2d1   : > { %v2295_v59 = vadd.f32 %v2257_v42, %v2061_v0  ;;  %v1827_v24 = vadd.f32 %v1790_v29, %v4335_v13 }
 0x2d2   : > { %v2493_v1 = vpop.f32.mrf.mxu0 }
 0x2d3   : > { %v2529_v8 = vadd.f32 %v2491_v41, %v2295_v59 }
 0x2d5   : > { %v2624_v49 = vadd.f32 %v2623_v31, %v2529_v8  ;;  %v2663_v19 = vmul.f32 %v2529_v8, %v2529_v8 }
 0x2d6   : > { %v2025_v60 = vpop.f32.mrf.mxu2 }
 0x2d7   : > { %v2694_v58 = vadd.f32 %v2693_v10, %v2663_v19  ;;  %v2062_v37 = vadd.f32 %v2025_v60, %v1827_v24  ;;  %v2259_v39 = vpop.f32.mrf.mxu3 }
 0x2d8   : > { %v1793_v40 = vpop.f32.mrf.mxu1 }
 0x2d9   : > { %v2296_v30 = vadd.f32 %v2259_v39, %v2062_v37  ;;  %v1828_v15 = vadd.f32 %v1793_v40, %v4339_v2 }
 0x2da   : > { %v2496_v16 = vpop.f32.mrf.mxu0 }
 0x2db   : > { %v2530_v4 = vadd.f32 %v2493_v1, %v2296_v30 }
 0x2dd   : > { %v3430_v61 = vpack.c.bf16 %v2530_v4, %v2529_v8  ;;  %v2625_v28 = vadd.f32 %v2624_v49, %v2530_v4  ;;  %v2664_v32 = vmul.f32 %v2530_v4, %v2530_v4 }
 0x2de   : > { %v2028_v26 = vpop.f32.mrf.mxu2 }
 0x2df   : > { %3465 = vst [vmem:[%s4354_s30 + $0x70] sm:$0xff] %v3430_v61   ;;  %v2695_v20 = vadd.f32 %v2694_v58, %v2664_v32  ;;  %v2063_v34 = vadd.f32 %v2028_v26, %v1828_v15  ;;  %v2262_v51 = vpop.f32.mrf.mxu3 }
 0x2e0   : > { %v1795_v46 = vpop.f32.mrf.mxu1 }
 0x2e1   : > { %v2297_v13 = vadd.f32 %v2262_v51, %v2063_v34  ;;  %v1829_v38 = vadd.f32 %v1795_v46, %v4344_v44 }
 0x2e2   : > { %v2498_v22 = vpop.f32.mrf.mxu0 }
 0x2e3   : > { %v2531_v27 = vadd.f32 %v2496_v16, %v2297_v13 }
 0x2e5   : > { %v2626_v45 = vadd.f32 %v2625_v28, %v2531_v27  ;;  %v2665_v6 = vmul.f32 %v2531_v27, %v2531_v27 }
 0x2e6   : > { %v2030_v56 = vpop.f32.mrf.mxu2 }
 0x2e7   : > { %v2696_v17 = vadd.f32 %v2695_v20, %v2665_v6  ;;  %v2064_v9 = vadd.f32 %v2030_v56, %v1829_v38  ;;  %v2264_v7 = vpop.f32.mrf.mxu3 }
 0x2e9   : > { %v2298_v2 = vadd.f32 %v2264_v7, %v2064_v9 }
 0x2eb   : > { %v2532_v14 = vadd.f32 %v2498_v22, %v2298_v2 }
 0x2ed   : > { %v3435_v35 = vpack.c.bf16 %v2532_v14, %v2531_v27  ;;  %v2627_v18 = vadd.f32 %v2626_v45, %v2532_v14  ;;  %v2666_v57 = vmul.f32 %v2532_v14, %v2532_v14 }
 0x2ef   : > { %3466 = vst [vmem:[%s4354_s30 + $0x78] sm:$0xff] %v3435_v35   ;;  %v2628_v5 = vrot.slane %v2627_v18, 4  ;;  %v2697_v62 = vadd.f32 %v2696_v17, %v2666_v57 }
 0x2f1   : > { %v2629_v3 = vadd.f32 %v2628_v5, %v2627_v18  ;;  %v2698_v33 = vrot.slane %v2697_v62, 4 }
 0x2f3   : > { %v2630_v53 = vrot.slane %v2629_v3, 2  ;;  %v2699_v63 = vadd.f32 %v2698_v33, %v2697_v62 }
 0x2f5   : > { %v2631_v44 = vadd.f32 %v2630_v53, %v2629_v3  ;;  %v2700_v25 = vrot.slane %v2699_v63, 2 }
 0x2f7   : > { %v2632_v52 = vrot.slane %v2631_v44, 1  ;;  %v2701_v12 = vadd.f32 %v2700_v25, %v2699_v63 }
 0x2f9   : > { %v2633_v21 = vadd.f32 %v2632_v52, %v2631_v44  ;;  %v2702_v23 = vrot.slane %v2701_v12, 1 }
 0x2fb   : > { %2634 = vst [vmem:[%s235_s8] sm:$0x1] %v2633_v21  ;;  %v2703_v36 = vadd.f32 %v2702_v23, %v2701_v12 }
 0x2fd   : > { %2704 = vst [vmem:[%s235_s8 + $0x1] sm:$0x1] %v2703_v36 }
 0x2fe PF: > { %s16_s18 = sadd.s32 1, %s3511_s18  }
 0x2ff   : > { %p13_p4 = scmp.ge.s32.totalorder %s16_s18, 4  }
 0x301   :  { %15 = sbr.rel (!%p13_p4) target bundleno = 1 (0x1), region = 88 }

</bundles_post_ra>
